<compile_context>
chip_gen: v5e
topology: v5e:2x2
jax: 0.10.0
libtpu: 0.0.40
codegen_flags: <defaults>
</compile_context>

<pallas_src>
import jax
import jax.numpy as jnp
from jax import lax
from jax.experimental import pallas as pl
from jax.experimental.pallas import tpu as pltpu

EPS = 1e-5  # PyTorch BatchNorm2d default


# ----------------------------- Pallas kernel --------------------------------
def conv3x3s2_bn_relu_kernel(x_ref, w_ref, bias_ref, o_ref, pad_ref):
    # x_ref:    (NB*4, Ho, Wo, Cin) bf16  stride-2 phase planes; row n*4+p,
    #                                     p = 2*pr+pc holds x[n, 2*i+pr, 2*j+pc]
    # w_ref:    (9*Cin, Cout)       bf16  conv weights, tap-major, BN scale folded
    # bias_ref: (1, Cout)           f32   folded conv-bias + BN shift
    # o_ref:    (NB, Cout, Ho, Wo)  f32   NCHW output block (consumer layout)
    # pad_ref:  (NB*4, Ho+1, Wo+1, Cin) bf16 scratch; zero top row / left col
    #                                        realizes the conv's 1-px halo.
    NB, Cout, Ho, Wo = o_ref.shape
    Cin = x_ref.shape[-1]
    M = NB * Ho * Wo

    # Halo: zero only the border (the interior is fully overwritten each step).
    pad_ref[:, 0:1, :, :] = jnp.zeros((NB * 4, 1, Wo + 1, Cin), pad_ref.dtype)
    pad_ref[:, :, 0:1, :] = jnp.zeros((NB * 4, Ho + 1, 1, Cin), pad_ref.dtype)
    pad_ref[:, 1:1 + Ho, 1:1 + Wo, :] = x_ref[...]

    padded = pad_ref[...].reshape(NB, 4, Ho + 1, Wo + 1, Cin)  # bf16

    # im2col: each of the 9 taps is a contiguous static slice of one phase
    # plane; batch is folded into the matmul M dimension.
    taps = []
    for dy in range(3):
        pr, r0 = (dy + 1) % 2, min(dy, 1)
        for dx in range(3):
            pc, c0 = (dx + 1) % 2, min(dx, 1)
            t = padded[:, pr * 2 + pc, r0:r0 + Ho, c0:c0 + Wo, :]
            taps.append(t.reshape(M, Cin))
    patches = jnp.concatenate(taps, axis=1)          # (M, 9*Cin) bf16

    # Single bf16 MXU matmul with f32 accumulation; BN scale already folded
    # into the weights, so the epilogue is just bias + ReLU.
    acc = jnp.dot(patches, w_ref[...], preferred_element_type=jnp.float32)
    y = jnp.maximum(acc + bias_ref[...], 0.0)         # (M, Cout) f32

    # Emit the consumer's NCHW layout directly (XLU transpose in-kernel);
    # removes the separate XLA transpose pass over the f32 output in HBM.
    y = jnp.transpose(y.reshape(NB, Ho * Wo, Cout), (0, 2, 1))
    o_ref[...] = y.reshape(NB, Cout, Ho, Wo).astype(o_ref.dtype)


# ------------------------------ wrapper --------------------------------------
def _pick_batch_block(n_batch):
    """Images per grid step.

    v7x has 2 TensorCores -> keep >=2 'parallel' grid steps so both are fed.
    v5e/v6e have a single TC -> fold the whole batch into one step (larger
    matmul M, amortizes the ~0.35us/step grid overhead).
    """
    kind = ""
    try:
        kind = jax.devices()[0].device_kind.lower()
    except Exception:
        pass
    steps = 2 if ("v7" in kind and n_batch >= 2 and n_batch % 2 == 0) else 1
    return n_batch // steps


def conv_bn_relu_forward(x_nchw, p):
    """ConvBnRelu.forward for the module defaults (k=3, stride=2, pad=1)."""
    N, Cin, H, W = x_nchw.shape
    KH, KW, WCin, Cout = p["w"].shape
    assert (KH, KW) == (3, 3) and WCin == Cin
    assert H % 2 == 0 and W % 2 == 0, "stride-2 path assumes even H, W"
    Ho, Wo = H // 2, W // 2

    # Fold eval-mode BN into a per-channel affine, and fold the scale straight
    # into the conv weights (tap-major (9*Cin, Cout), bf16 MXU operands).
    scale = p["gamma"] / jnp.sqrt(p["var"] + EPS)                    # (Cout,)
    bias2 = (p["beta"] + scale * (p["b"] - p["mean"])).reshape(1, Cout)
    bias2 = bias2.astype(jnp.float32)
    w9 = (p["w"].astype(jnp.float32).reshape(9 * Cin, Cout)
          * scale[None, :]).astype(jnp.bfloat16)

    # Stride-2 phase split (space-to-depth): one XLA transpose+convert pass
    # that replaces both the NCHW->NHWC transpose and a separate pad pass.
    # xp[n*4 + 2*pr + pc, i, j, c] = x[n, c, 2*i + pr, 2*j + pc]
    # TODO(synk): if the producer can emit this layout (or bf16 NHWC) directly,
    # this standalone HBM pass disappears entirely.
    xp = (x_nchw.reshape(N, Cin, Ho, 2, Wo, 2)
                .transpose(0, 3, 5, 2, 4, 1)
                .reshape(N * 4, Ho, Wo, Cin)
                .astype(jnp.bfloat16))

    NB = _pick_batch_block(N)
    grid = (N // NB,)

    # Per-step VMEM footprint (bytes), generous headroom, never below default.
    step_bytes = (
        2 * 2 * NB * 4 * Ho * Wo * Cin             # double-buffered x (bf16)
        + 2 * 2 * 9 * Cin * Cout                   # double-buffered w (bf16)
        + 2 * 4 * Cout                             # bias (f32)
        + 2 * 4 * NB * Cout * Ho * Wo              # double-buffered out (f32)
        + 2 * NB * 4 * (Ho + 1) * (Wo + 1) * Cin   # halo scratch (bf16)
        + 2 * NB * Ho * Wo * 9 * Cin               # im2col patches (bf16)
        + 4 * NB * Ho * Wo * Cout                  # f32 accumulator
    )
    vmem_limit = int(max(32 * 1024 * 1024, 4 * step_bytes))

    out_nchw = pl.pallas_call(
        conv3x3s2_bn_relu_kernel,
        out_shape=jax.ShapeDtypeStruct((N, Cout, Ho, Wo), jnp.float32),
        grid_spec=pltpu.PrefetchScalarGridSpec(
            num_scalar_prefetch=0,
            grid=grid,
            in_specs=[
                pl.BlockSpec((NB * 4, Ho, Wo, Cin), lambda n: (n, 0, 0, 0)),
                pl.BlockSpec((9 * Cin, Cout), lambda n: (0, 0)),
                pl.BlockSpec((1, Cout), lambda n: (0, 0)),
            ],
            out_specs=pl.BlockSpec((NB, Cout, Ho, Wo), lambda n: (n, 0, 0, 0)),
            scratch_shapes=[
                pltpu.VMEM((NB * 4, Ho + 1, Wo + 1, Cin), jnp.bfloat16)],
        ),
        compiler_params=pltpu.CompilerParams(
            dimension_semantics=("parallel",),
            vmem_limit_bytes=vmem_limit),
    )(xp, w9, bias2)

    return out_nchw  # already NCHW; no trailing transpose pass


# ----------------------------- pure-JAX references ---------------------------
def ref_conv_bn_relu(x_nchw, p):
    """Exact module semantics in f32."""
    y = lax.conv_general_dilated(
        x_nchw, p["w"], window_strides=(2, 2), padding=((1, 1), (1, 1)),
        dimension_numbers=("NCHW", "HWIO", "NCHW"),
        preferred_element_type=jnp.float32)
    y = y + p["b"][None, :, None, None]
    inv = p["gamma"] / jnp.sqrt(p["var"] + EPS)
    y = (inv[None, :, None, None] * (y - p["mean"][None, :, None, None])
         + p["beta"][None, :, None, None])
    return jax.nn.relu(y)


def ref_matched_precision(x_nchw, p):
    """Same math as the kernel: bf16 x, bf16 scale-folded weights, f32 acc."""
    scale = p["gamma"] / jnp.sqrt(p["var"] + EPS)
    bias = p["beta"] + scale * (p["b"] - p["mean"])
    w_folded = (p["w"] * scale[None, None, None, :]).astype(jnp.bfloat16)
    y = lax.conv_general_dilated(
        x_nchw.astype(jnp.bfloat16), w_folded,
        window_strides=(2, 2), padding=((1, 1), (1, 1)),
        dimension_numbers=("NCHW", "HWIO", "NCHW"),
        preferred_element_type=jnp.float32)
    return jax.nn.relu(y + bias[None, :, None, None])


# --------------------------------- main ---------------------------------------
if __name__ == "__main__":
    key = jax.random.PRNGKey(0)
    ks = jax.random.split(key, 7)

    N, Cin, Cout = 2, 4, 8
    H = W = 16

    x = jax.random.normal(ks[0], (N, Cin, H, W), jnp.float32)
    params = {
        "w": jax.random.normal(ks[1], (3, 3, Cin, Cout), jnp.float32) * 0.1,
        "b": jax.random.normal(ks[2], (Cout,), jnp.float32) * 0.1,
        "gamma": jax.random.normal(ks[3], (Cout,), jnp.float32) * 0.1 + 1.0,
        "beta": jax.random.normal(ks[4], (Cout,), jnp.float32) * 0.1,
        "mean": jax.random.normal(ks[5], (Cout,), jnp.float32) * 0.1,
        "var": jax.random.uniform(ks[6], (Cout,), jnp.float32, 0.5, 1.5),
    }

    out = jax.block_until_ready(conv_bn_relu_forward(x, params))
    assert out.shape == (N, Cout, H // 2, W // 2), out.shape

    ref_m = jax.block_until_ready(ref_matched_precision(x, params))
    ref_f = jax.block_until_ready(ref_conv_bn_relu(x, params))

    # Same-precision check (bf16 operands, scale-folded weights, f32 accum).
    err_m = float(jnp.max(jnp.abs(out - ref_m)))
    assert err_m < 2e-3, f"max abs error vs matched-precision ref: {err_m}"
    # Semantic sanity check against the full-f32 reference.
    err_f = float(jnp.max(jnp.abs(out - ref_f)))
    assert err_f < 5e-2, f"max abs error vs f32 reference: {err_f}"
    print("KERNEL_OK")
</pallas_src>

<mosaic_0001>
module attributes {stable_mosaic.version = 11 : i64} {
  func.func @conv3x3s2_bn_relu_kernel(%arg0: i32, %arg1: memref<8x8x8x4xbf16, #tpu.memory_space<vmem>>, %arg2: memref<36x8xbf16, #tpu.memory_space<vmem>>, %arg3: memref<1x8xf32, #tpu.memory_space<vmem>>, %arg4: memref<2x8x8x8xf32, #tpu.memory_space<vmem>>, %arg5: memref<8x9x9x4xbf16, #tpu.memory_space<vmem>>) attributes {dimension_semantics = [#tpu.dimension_semantics<parallel>], iteration_bounds = array<i64: 1>, scalar_prefetch = 0 : i64, scratch_operands = 1 : i64, tpu.core_type = #tpu.core_type<tc>, window_params = [{transform_indices = @transform_0, window_bounds = array<i64: 8, 8, 8, 4>}, {pipeline_mode = #tpu.pipeline_mode<synchronous>, transform_indices = @transform_1, window_bounds = array<i64: 36, 8>}, {pipeline_mode = #tpu.pipeline_mode<synchronous>, transform_indices = @transform_2, window_bounds = array<i64: 1, 8>}, {transform_indices = @transform_3, window_bounds = array<i64: 2, 8, 8, 8>}]} {
    %cst = arith.constant 0.000000e+00 : bf16
    %0 = vector.broadcast %cst : bf16 to vector<8x1x9x4xbf16>
    %c0 = arith.constant 0 : index
    %c0_0 = arith.constant 0 : index
    %c0_1 = arith.constant 0 : index
    %c0_2 = arith.constant 0 : index
    %1 = vector.load %arg5[%c0, %c0_0, %c0_1, %c0_2] : memref<8x9x9x4xbf16, #tpu.memory_space<vmem>>, vector<8x1x9x4xbf16>
    tpu.vector_store %arg5[%c0, %c0_0, %c0_1, %c0_2], %0 {strides = array<i32>} : memref<8x9x9x4xbf16, #tpu.memory_space<vmem>>, vector<8x1x9x4xbf16>,
    %cst_3 = arith.constant 0.000000e+00 : bf16
    %2 = vector.broadcast %cst_3 : bf16 to vector<8x9x1x4xbf16>
    %c0_4 = arith.constant 0 : index
    %c0_5 = arith.constant 0 : index
    %c0_6 = arith.constant 0 : index
    %c0_7 = arith.constant 0 : index
    %3 = vector.load %arg5[%c0_4, %c0_5, %c0_6, %c0_7] : memref<8x9x9x4xbf16, #tpu.memory_space<vmem>>, vector<8x9x1x4xbf16>
    tpu.vector_store %arg5[%c0_4, %c0_5, %c0_6, %c0_7], %2 {strides = array<i32>} : memref<8x9x9x4xbf16, #tpu.memory_space<vmem>>, vector<8x9x1x4xbf16>,
    %c0_8 = arith.constant 0 : index
    %c0_9 = arith.constant 0 : index
    %c0_10 = arith.constant 0 : index
    %c0_11 = arith.constant 0 : index
    %4 = vector.load %arg1[%c0_8, %c0_9, %c0_10, %c0_11] : memref<8x8x8x4xbf16, #tpu.memory_space<vmem>>, vector<8x8x8x4xbf16>
    %c0_12 = arith.constant 0 : index
    %c1 = arith.constant 1 : index
    %c1_13 = arith.constant 1 : index
    %c0_14 = arith.constant 0 : index
    %5 = vector.load %arg5[%c0_12, %c1, %c1_13, %c0_14] : memref<8x9x9x4xbf16, #tpu.memory_space<vmem>>, vector<8x8x8x4xbf16>
    tpu.vector_store %arg5[%c0_12, %c1, %c1_13, %c0_14], %4 {strides = array<i32>} : memref<8x9x9x4xbf16, #tpu.memory_space<vmem>>, vector<8x8x8x4xbf16>,
    %c0_15 = arith.constant 0 : index
    %c0_16 = arith.constant 0 : index
    %c0_17 = arith.constant 0 : index
    %c0_18 = arith.constant 0 : index
    %6 = vector.load %arg5[%c0_15, %c0_16, %c0_17, %c0_18] : memref<8x9x9x4xbf16, #tpu.memory_space<vmem>>, vector<8x9x9x4xbf16>
    %7 = vector.shape_cast %6 : vector<8x9x9x4xbf16> to vector<2x4x9x9x4xbf16>
    %8 = vector.extract_strided_slice %7 {offsets = [0, 3, 0, 0, 0], sizes = [2, 1, 8, 8, 4], strides = [1, 1, 1, 1, 1]} : vector<2x4x9x9x4xbf16> to vector<2x1x8x8x4xbf16>
    %9 = vector.shape_cast %8 : vector<2x1x8x8x4xbf16> to vector<2x8x8x4xbf16>
    %10 = vector.shape_cast %9 : vector<2x8x8x4xbf16> to vector<128x4xbf16>
    %11 = vector.extract_strided_slice %7 {offsets = [0, 2, 0, 1, 0], sizes = [2, 1, 8, 8, 4], strides = [1, 1, 1, 1, 1]} : vector<2x4x9x9x4xbf16> to vector<2x1x8x8x4xbf16>
    %12 = vector.shape_cast %11 : vector<2x1x8x8x4xbf16> to vector<2x8x8x4xbf16>
    %13 = vector.shape_cast %12 : vector<2x8x8x4xbf16> to vector<128x4xbf16>
    %14 = vector.extract_strided_slice %7 {offsets = [0, 3, 0, 1, 0], sizes = [2, 1, 8, 8, 4], strides = [1, 1, 1, 1, 1]} : vector<2x4x9x9x4xbf16> to vector<2x1x8x8x4xbf16>
    %15 = vector.shape_cast %14 : vector<2x1x8x8x4xbf16> to vector<2x8x8x4xbf16>
    %16 = vector.shape_cast %15 : vector<2x8x8x4xbf16> to vector<128x4xbf16>
    %17 = vector.extract_strided_slice %7 {offsets = [0, 1, 1, 0, 0], sizes = [2, 1, 8, 8, 4], strides = [1, 1, 1, 1, 1]} : vector<2x4x9x9x4xbf16> to vector<2x1x8x8x4xbf16>
    %18 = vector.shape_cast %17 : vector<2x1x8x8x4xbf16> to vector<2x8x8x4xbf16>
    %19 = vector.shape_cast %18 : vector<2x8x8x4xbf16> to vector<128x4xbf16>
    %20 = vector.extract_strided_slice %7 {offsets = [0, 0, 1, 1, 0], sizes = [2, 1, 8, 8, 4], strides = [1, 1, 1, 1, 1]} : vector<2x4x9x9x4xbf16> to vector<2x1x8x8x4xbf16>
    %21 = vector.shape_cast %20 : vector<2x1x8x8x4xbf16> to vector<2x8x8x4xbf16>
    %22 = vector.shape_cast %21 : vector<2x8x8x4xbf16> to vector<128x4xbf16>
    %23 = vector.extract_strided_slice %7 {offsets = [0, 1, 1, 1, 0], sizes = [2, 1, 8, 8, 4], strides = [1, 1, 1, 1, 1]} : vector<2x4x9x9x4xbf16> to vector<2x1x8x8x4xbf16>
    %24 = vector.shape_cast %23 : vector<2x1x8x8x4xbf16> to vector<2x8x8x4xbf16>
    %25 = vector.shape_cast %24 : vector<2x8x8x4xbf16> to vector<128x4xbf16>
    %26 = vector.extract_strided_slice %7 {offsets = [0, 3, 1, 0, 0], sizes = [2, 1, 8, 8, 4], strides = [1, 1, 1, 1, 1]} : vector<2x4x9x9x4xbf16> to vector<2x1x8x8x4xbf16>
    %27 = vector.shape_cast %26 : vector<2x1x8x8x4xbf16> to vector<2x8x8x4xbf16>
    %28 = vector.shape_cast %27 : vector<2x8x8x4xbf16> to vector<128x4xbf16>
    %29 = vector.extract_strided_slice %7 {offsets = [0, 2, 1, 1, 0], sizes = [2, 1, 8, 8, 4], strides = [1, 1, 1, 1, 1]} : vector<2x4x9x9x4xbf16> to vector<2x1x8x8x4xbf16>
    %30 = vector.shape_cast %29 : vector<2x1x8x8x4xbf16> to vector<2x8x8x4xbf16>
    %31 = vector.shape_cast %30 : vector<2x8x8x4xbf16> to vector<128x4xbf16>
    %32 = vector.extract_strided_slice %7 {offsets = [0, 3, 1, 1, 0], sizes = [2, 1, 8, 8, 4], strides = [1, 1, 1, 1, 1]} : vector<2x4x9x9x4xbf16> to vector<2x1x8x8x4xbf16>
    %33 = vector.shape_cast %32 : vector<2x1x8x8x4xbf16> to vector<2x8x8x4xbf16>
    %34 = vector.shape_cast %33 : vector<2x8x8x4xbf16> to vector<128x4xbf16>
    %35 = tpu.concatenate %10, %13, %16, %19, %22, %25, %28, %31, %34 in 1 : vector<128x4xbf16>, vector<128x4xbf16>, vector<128x4xbf16>, vector<128x4xbf16>, vector<128x4xbf16>, vector<128x4xbf16>, vector<128x4xbf16>, vector<128x4xbf16>, vector<128x4xbf16> -> vector<128x36xbf16>
    %c0_19 = arith.constant 0 : index
    %c0_20 = arith.constant 0 : index
    %36 = vector.load %arg2[%c0_19, %c0_20] : memref<36x8xbf16, #tpu.memory_space<vmem>>, vector<36x8xbf16>
    %cst_21 = arith.constant dense<0.000000e+00> : vector<128x8xf32>
    %37 = tpu.matmul %35, %36, %cst_21 {dimension_numbers = #tpu.dot_dimension_numbers<[1], [0], [0], [1], [0, 0, 1, 1], [], []>} : vector<128x36xbf16>, vector<36x8xbf16>, vector<128x8xf32> -> vector<128x8xf32>
    %c0_22 = arith.constant 0 : index
    %c0_23 = arith.constant 0 : index
    %38 = vector.load %arg3[%c0_22, %c0_23] : memref<1x8xf32, #tpu.memory_space<vmem>>, vector<1x8xf32>
    %39 = vector.broadcast %38 : vector<1x8xf32> to vector<128x8xf32>
    %40 = arith.addf %37, %39 : vector<128x8xf32>
    %cst_24 = arith.constant 0.000000e+00 : f32
    %41 = vector.broadcast %cst_24 : f32 to vector<128x8xf32>
    %42 = arith.maximumf %40, %41 : vector<128x8xf32>
    %43 = vector.shape_cast %42 : vector<128x8xf32> to vector<2x64x8xf32>
    %44 = tpu.transpose %43, [0, 2, 1] : vector<2x64x8xf32> -> vector<2x8x64xf32>
    %45 = vector.shape_cast %44 : vector<2x8x64xf32> to vector<2x8x8x8xf32>
    %c0_25 = arith.constant 0 : index
    %c0_26 = arith.constant 0 : index
    %c0_27 = arith.constant 0 : index
    %c0_28 = arith.constant 0 : index
    %46 = vector.load %arg4[%c0_25, %c0_26, %c0_27, %c0_28] : memref<2x8x8x8xf32, #tpu.memory_space<vmem>>, vector<2x8x8x8xf32>
    tpu.vector_store %arg4[%c0_25, %c0_26, %c0_27, %c0_28], %45 {strides = array<i32>} : memref<2x8x8x8xf32, #tpu.memory_space<vmem>>, vector<2x8x8x8xf32>,
    return
  }
  func.func @transform_0(%arg0: i32) -> (i32, i32, i32, i32) {
    %c0_i32 = arith.constant 0 : i32
    %c0_i32_0 = arith.constant 0 : i32
    %c0_i32_1 = arith.constant 0 : i32
    %c0_i32_2 = arith.constant 0 : i32
    return %arg0, %c0_i32, %c0_i32_0, %c0_i32_1 : i32, i32, i32, i32
  }
  func.func @transform_1(%arg0: i32) -> (i32, i32) {
    %c0_i32 = arith.constant 0 : i32
    %c0_i32_0 = arith.constant 0 : i32
    %c0_i32_1 = arith.constant 0 : i32
    return %c0_i32, %c0_i32_0 : i32, i32
  }
  func.func @transform_2(%arg0: i32) -> (i32, i32) {
    %c0_i32 = arith.constant 0 : i32
    %c0_i32_0 = arith.constant 0 : i32
    %c0_i32_1 = arith.constant 0 : i32
    return %c0_i32, %c0_i32_0 : i32, i32
  }
  func.func @transform_3(%arg0: i32) -> (i32, i32, i32, i32) {
    %c0_i32 = arith.constant 0 : i32
    %c0_i32_0 = arith.constant 0 : i32
    %c0_i32_1 = arith.constant 0 : i32
    %c0_i32_2 = arith.constant 0 : i32
    return %arg0, %c0_i32, %c0_i32_0, %c0_i32_1 : i32, i32, i32, i32
  }
}

</mosaic_0001>

<bundles_post_ra>
// kernel: tpu_custom_call.1
= control target key start
LH: loop header
LB: loop body
LE: loop exit
PB: predicated region body
PF: predicated region fallthrough
CT: control target
= control target key end

     0   :  { %vm18_vm0 = vcmask 24576   ;;  %vm19_vm1 = vsmask.f32 256  ;;  %v190_v0 = vld [vmem:[#allocation2 + $0x170] sm:$0x1]  ;;  %vm16_vm4 = vcmask 27648   ;;  %s5130_s0 = inlined_call_operand.vmem [shape: bf16[8,8,8,4], index: 0, kind: input, shape index: {}]   ;;  %s5131_s1 = inlined_call_operand.vmem [shape: bf16[36,8], index: 1, kind: input, shape index: {}]   ;;  %s5132_s2 = inlined_call_operand.vmem [shape: f32[1,8], index: 2, kind: input, shape index: {}]   ;;  %s5133_s3 = inlined_call_operand.hbm [shape: f32[2,8,8,8], index: 3, kind: output, shape index: {}]  }
   0x1   :  { %vm3570_vm2 = vmand %vm18_vm0, %vm19_vm1  ;;  %v193_v2 = vld [vmem:[#allocation2 + $0x178] sm:$0x1]  ;;  %v308_v3 = vld [vmem:[%s5130_s0 + $0xa0] sm:$0xf]  ;;  %vm974_vm3 = vsmask.f32 7938 }
   0x2   :  { %v191_v4 = vsel %vm3570_vm2, 0, %v190_v0  ;;  %v194_v5 = vsel %vm3570_vm2, 0, %v193_v2  ;;  %v309_v6 = vld [vmem:[%s5130_s0 + $0xa4] sm:$0xf]  ;;  %v653_v7 = vshrl.u32 %v308_v3, 16  ;;  %v656_v8 = vshll.u32 %v308_v3, 16  ;;  %vm3602_vm5 = vmand %vm16_vm4, %vm974_vm3 }
   0x3   :  { %192 = vst [vmem:[#allocation2 + $0x170] sm:$0x1] %v191_v4  ;;  %v661_v9 = vshrl.u32 %v309_v6, 16  ;;  %v664_v11 = vshll.u32 %v309_v6, 16  ;;  %v118_v12 = vld [vmem:[#allocation2 + $0xb0] sm:$0x1] }
   0x4   :  { %195 = vst [vmem:[#allocation2 + $0x178] sm:$0x1] %v194_v5  ;;  %v3584_v10 = vrot.slane %v653_v7, 7  ;;  %v119_v14 = vsel %vm3570_vm2, 0, %v118_v12  ;;  %v121_v15 = vld [vmem:[#allocation2 + $0xb8] sm:$0x1] }
   0x5   :  { %v3586_v13 = vrot.slane %v661_v9, 7  ;;  %v287_v16 = vld [vmem:[%s5130_s0 + $0x4c] sm:$0xf]  ;;  %120 = vst [vmem:[#allocation2 + $0xb0] sm:$0x1] %v119_v14  ;;  %v122_v17 = vsel %vm3570_vm2, 0, %v121_v15 }
   0x6   :  { %v288_v18 = vld [vmem:[%s5130_s0 + $0x50] sm:$0xf]  ;;  %v658_v19 = vor.u32 %v656_v8, %v3584_v10  ;;  %123 = vst [vmem:[#allocation2 + $0xb8] sm:$0x1] %v122_v17  ;;  %v485_v20 = vshrl.u32 %v287_v16, 16  ;;  %v488_v21 = vshll.u32 %v287_v16, 16 }
   0x7   :  { %v666_v22 = vor.u32 %v664_v11, %v3586_v13  ;;  %v493_v23 = vshrl.u32 %v288_v18, 16  ;;  %v496_v24 = vshll.u32 %v288_v18, 16  ;;  %v1093_v26 = vld [vmem:[#allocation2 + $0xb4] sm:$0x1]  ;;  %v3530_v30 = vmov 0   ;;  %s3531_s24 = smov 12  }
   0x8   :  { %v487_v25 = vrot.slane %v485_v20, 7  ;;  %44 = vst.msk [vmem:[#allocation2 + $0x1b0] sm:$0xf] %vm16_vm4, %v3530_v30  ;;  %v1099_v35 = vld [vmem:[#allocation2 + $0xbc] sm:$0x1]  ;;  %s3532_s29 = smov 4  }
   0x9   :  { %v495_v29 = vrot.slane %v493_v23, 7  ;;  %v45_v39 = vld [vmem:[#allocation2 + $0x1b4] sm:$0x1]  ;;  %v217_v42 = vld [vmem:[#allocation2 + $0x1b8] sm:$0x1]  ;;  %s3533_s4 = smov 8  }
   0xa   :  { %v1216_v28 = vld [vmem:[#allocation2 + $0x170] sm:$0xf]  ;;  %v490_v33 = vor.u32 %v488_v21, %v487_v25  ;;  %v491_v34 = vrot.slane %v487_v25, 4  ;;  %v316_v46 = vld [vmem:[%s5130_s0 + $0xc0] sm:$0xf]  ;;  %v46_v48 = vsel %vm3570_vm2, 0, %v45_v39 }
   0xb   :  { %v1217_v31 = vsel %vm3602_vm5, %v658_v19, %v1216_v28  ;;  %v1222_v32 = vld [vmem:[#allocation2 + $0x178] sm:$0xf]  ;;  %v498_v37 = vor.u32 %v496_v24, %v495_v29  ;;  %v499_v38 = vrot.slane %v495_v29, 4  ;;  %v717_v49 = vshrl.u32 %v316_v46, 16  ;;  %47 = vst [vmem:[#allocation2 + $0x1b4] sm:$0x1] %v46_v48 }
   0xc   :  { %1218 = vst [vmem:[#allocation2 + $0x170] sm:$0xf] %v1217_v31  ;;  %v1223_v36 = vsel %vm3602_vm5, %v666_v22, %v1222_v32  ;;  %v1090_v40 = vld [vmem:[#allocation2 + $0xb0] sm:$0xf]  ;;  %v1094_v41 = vsel %vm3570_vm2, %v491_v34, %v1093_v26  ;;  %vm1496_vm6 = vsmask.f32 3328 }
   0xd   :  { %1224 = vst [vmem:[#allocation2 + $0x178] sm:$0xf] %v1223_v36  ;;  %v1091_v43 = vsel %vm3602_vm5, %v490_v33, %v1090_v40  ;;  %v1096_v44 = vld [vmem:[#allocation2 + $0xb8] sm:$0xf]  ;;  %v1100_v45 = vsel %vm3570_vm2, %v499_v38, %v1099_v35  ;;  %vm1497_vm7 = vsmask.f32 7440 }
   0xe   :  { %1095 = vst [vmem:[#allocation2 + $0xb4] sm:$0x1] %v1094_v41  ;;  %v1097_v47 = vsel %vm3602_vm5, %v498_v37, %v1096_v44  ;;  %v218_v51 = vsel %vm3570_vm2, 0, %v217_v42  ;;  %v719_v52 = vrot.slane %v717_v49, 7  ;;  %v1267_v54 = vld [vmem:[#allocation2 + $0x1bc] sm:$0x1]  ;;  %vm3651_vm8 = vmor %vm1496_vm6, %vm1497_vm7 }
   0xf   :  { %1092 = vst [vmem:[#allocation2 + $0xb0] sm:$0xf] %v1091_v43  ;;  %v214_v50 = vld [vmem:[#allocation2 + $0x1b0] sm:$0x1]  ;;  %v720_v56 = vshll.u32 %v316_v46, 16  ;;  %s3534_s16 = smov 24  }
  0x10   :  { %1098 = vst [vmem:[#allocation2 + $0xb8] sm:$0xf] %v1097_v47  ;;  %v215_v53 = vsel %vm3570_vm2, 0, %v214_v50  ;;  %v723_v57 = vrot.slane %v719_v52, 4  ;;  %v3629_v59 = vld [vmem:[#allocation2 + $0x94] sm:$0x1] }
  0x11   :  { %1101 = vst [vmem:[#allocation2 + $0xbc] sm:$0x1] %v1100_v45  ;;  %v3638_v63 = vld [vmem:[%s5130_s0 + $0x40] sm:$0xf]  ;;  %v722_v9 = vor.u32 %v720_v56, %v719_v52  ;;  %v30_v11 = vsel %vm3570_vm2, 0, %v3629_v59  ;;  %s3535_s26 = smov 16  }
  0x12   :  { %216 = vst [vmem:[#allocation2 + $0x1b0] sm:$0x1] %v215_v53  ;;  %v1268_v62 = vsel %vm3570_vm2, %v723_v57, %v1267_v54  ;;  %v3646_v16 = vld [vmem:[#allocation2 + $0x98] sm:$0x1]  ;;  %v461_v17 = vshrl.u32 %v3638_v63, 16  ;;  %v464_v38 = vshll.u32 %v3638_v63, 16 }
  0x13   :  { %v3426_v55 = vld [vmem:[#allocation2 + $0x170] sm:$0xf]  ;;  %219 = vst [vmem:[#allocation2 + $0x1b8] sm:$0x1] %v218_v51  ;;  %v1461_v21 = vld [vmem:[#allocation2 + $0x1b4] sm:$0x1] }
  0x14   :  { %v3460_v58 = vld [vmem:[#allocation2 + $0x174] sm:$0xf0]  ;;  %17 = vst.msk [vmem:[#allocation2] sm:$0xf] %vm16_vm4, %v3530_v30  ;;  %v110_v34 = vsel %vm3570_vm2, 0, %v3646_v16  ;;  %v1621_v37 = vshll.u32 %v1461_v21, 16 }
  0x15   :  { %v3427_v60 = vor.u32 %v3460_v58, %v3426_v55  ;;  %v1401_v61 = vld [vmem:[#allocation2 + $0xb4] sm:$0x1]  ;;  %1269 = vst [vmem:[#allocation2 + $0x1bc] sm:$0x1] %v1268_v62  ;;  %v463_v42 = vrot.slane %v461_v17, 7  ;;  %s3536_s27 = smov 28  }
  0x16   :  { %v1400_v0 = vld [vmem:[#allocation2 + $0xb0] sm:$0xf]  ;;  %v1565_v2 = vshll.u32 %v1401_v61, 16  ;;  %24 = vst.msk [vmem:[#allocation2 + $0x48] sm:$0xf] %vm16_vm4, %v3530_v30  ;;  %v1623_v52 = vrot.slane %v1621_v37, 5 }
  0x17   :  { %2619 = vrot.lane.b32.xlu1 %v3427_v60, %s3531_s24  ;;  %v1402_v3 = vld [vmem:[#allocation2 + $0xb8] sm:$0xf]  ;;  %v1556_v4 = vshrl.u32 %v1400_v0, 16  ;;  %v1559_v5 = vshll.u32 %v1400_v0, 16  ;;  %36 = vst.msk [vmem:[#allocation2 + $0x120] sm:$0xf] %vm16_vm4, %v3530_v30 }
  0x18   :  { %v1403_v6 = vld [vmem:[#allocation2 + $0xbc] sm:$0x1]  ;;  %v1570_v7 = vshrl.u32 %v1402_v3, 16  ;;  %v1573_v8 = vshll.u32 %v1402_v3, 16  ;;  %v1567_v23 = vrot.slane %v1565_v2, 5  ;;  %v467_v49 = vrot.slane %v463_v42, 4 }
  0x19   :  { %v1558_v12 = vrot.slane %v1556_v4, 4  ;;  %v1561_v14 = vrot.slane %v1559_v5, 5  ;;  %v1579_v15 = vshll.u32 %v1403_v6, 16  ;;  %v1460_v20 = vld [vmem:[#allocation2 + $0x1b0] sm:$0xf]  ;;  %s3537_s28 = smov 20  }
  0x1a   :  { %v1572_v18 = vrot.slane %v1570_v7, 4  ;;  %v1575_v19 = vrot.slane %v1573_v8, 5  ;;  %v1264_v24 = vld [vmem:[#allocation2 + $0x1b8] sm:$0xf]  ;;  %v1612_v25 = vshrl.u32 %v1460_v20, 16  ;;  %v1615_v26 = vshll.u32 %v1460_v20, 16 }
  0x1b   :  { %v1562_v22 = vor.u32 %v1561_v14, %v1558_v12  ;;  %v1581_v31 = vrot.slane %v1579_v15, 5  ;;  %v1265_v32 = vsel %vm3602_vm5, %v722_v9, %v1264_v24  ;;  %v52_v33 = vld [vmem:[#allocation2] sm:$0x1]  ;;  %40 = vst.msk [vmem:[#allocation2 + $0x168] sm:$0xf] %vm16_vm4, %v3530_v30  ;;  %s3538_s8 = smov 32  }
  0x1c   :  { %v1576_v29 = vor.u32 %v1575_v19, %v1572_v18  ;;  %1266 = vst [vmem:[#allocation2 + $0x1b8] sm:$0xf] %v1265_v32  ;;  %v1614_v36 = vrot.slane %v1612_v25, 4  ;;  %v1617_v40 = vrot.slane %v1615_v26, 5  ;;  %v53_v41 = vsel %vm3570_vm2, 0, %v52_v33 }
  0x1d   :  { %v1563_v35 = vrot.slane %v1562_v22, 4  ;;  %v1463_v44 = vld [vmem:[#allocation2 + $0x1bc] sm:$0x1]  ;;  %54 = vst [vmem:[#allocation2] sm:$0x1] %v53_v41  ;;  %v466_v22 = vor.u32 %v464_v38, %v463_v42  ;;  %vm2787_vm9 = vcmask 31744  }
  0x1e   :  { %v1577_v39 = vrot.slane %v1576_v29, 4  ;;  %v79_v45 = vld [vmem:[#allocation2 + $0x48] sm:$0x1]  ;;  %v1618_v48 = vor.u32 %v1617_v40, %v1614_v36  ;;  %28 = vst.msk [vmem:[#allocation2 + $0x90] sm:$0xf] %vm16_vm4, %v3530_v30  ;;  %v1635_v56 = vshll.u32 %v1463_v44, 16 }
  0x1f   :  { %v1568_v43 = vsel %vm3651_vm8, %v1563_v35, %v1567_v23  ;;  %v1075_v50 = vld [vmem:[#allocation2 + $0x9c] sm:$0x1]  ;;  %v80_v53 = vsel %vm3570_vm2, 0, %v79_v45  ;;  %32 = vst.msk [vmem:[#allocation2 + $0xd8] sm:$0xf] %vm16_vm4, %v3530_v30  ;;  %vm2812_vm10 = vcmask 64512  }
  0x20   :  { %v1582_v46 = vsel %vm3651_vm8, %v1577_v39, %v1581_v31  ;;  %v3671_v47 = vunpack.c.l.b16 %v1568_v43  ;;  %v124_v54 = vld [vmem:[#allocation2 + $0xc0] sm:$0x1]  ;;  %v1619_v55 = vrot.slane %v1618_v48, 4  ;;  %81 = vst [vmem:[#allocation2 + $0x48] sm:$0x1] %v80_v53  ;;  %v1637_v20 = vrot.slane %v1635_v56, 5 }
  0x21   :  { %v3675_v51 = vunpack.c.l.b16 %v1582_v46  ;;  %v289_v57 = vld [vmem:[%s5130_s0 + $0x54] sm:$0xf]  ;;  %v160_v59 = vld [vmem:[#allocation2 + $0x120] sm:$0x1]  ;;  %48 = vst.msk [vmem:[#allocation2 + $0x1f8] sm:$0xf] %vm16_vm4, %v3530_v30  ;;  %v1076_v30 = vsel %vm3570_vm2, %v467_v49, %v1075_v50 }
  0x22   :  { %v127_v60 = vld [vmem:[#allocation2 + $0xc8] sm:$0x1]  ;;  %v290_v61 = vld [vmem:[%s5130_s0 + $0x58] sm:$0xf]  ;;  %v161_v63 = vsel %vm3570_vm2, 0, %v160_v59  ;;  %v501_v0 = vshrl.u32 %v289_v57, 16  ;;  %v1624_v18 = vsel %vm3651_vm8, %v1619_v55, %v1623_v52 }
  0x23   :  { %v2509_v58 = vpack.c.b16 %v3675_v51, %v3671_v47  ;;  %v1462_v62 = vld [vmem:[#allocation2 + $0x1b8] sm:$0xf]  ;;  %31 = vst [vmem:[#allocation2 + $0x94] sm:$0x1] %v30_v11  ;;  %v187_v4 = vld [vmem:[#allocation2 + $0x168] sm:$0x1]  ;;  %v2499_v33 = vunpack.c.l.b16 %v1624_v18 }
  0x24   :  { %v1626_v2 = vshrl.u32 %v1462_v62, 16  ;;  %v1629_v3 = vshll.u32 %v1462_v62, 16  ;;  %162 = vst [vmem:[#allocation2 + $0x120] sm:$0x1] %v161_v63  ;;  %v188_v5 = vsel %vm3570_vm2, 0, %v187_v4  ;;  %v125_v6 = vsel %vm3570_vm2, 0, %v124_v54 }
  0x25   :  { %2519 = vrot.lane.b32.xlu1 %v2509_v58, %s3532_s29  ;;  %111 = vst [vmem:[#allocation2 + $0x98] sm:$0x1] %v110_v34  ;;  %v503_v7 = vrot.slane %v501_v0, 7  ;;  %v509_v8 = vshrl.u32 %v290_v61, 16  ;;  %v106_v12 = vld [vmem:[#allocation2 + $0x90] sm:$0x1] }
  0x26   :  { %v1628_v9 = vrot.slane %v1626_v2, 4  ;;  %v1631_v11 = vrot.slane %v1629_v3, 5  ;;  %189 = vst [vmem:[#allocation2 + $0x168] sm:$0x1] %v188_v5  ;;  %v107_v14 = vsel %vm3570_vm2, 0, %v106_v12  ;;  %v128_v15 = vsel %vm3570_vm2, 0, %v127_v60 }
  0x27   :  { %1077 = vst [vmem:[#allocation2 + $0x9c] sm:$0x1] %v1076_v30  ;;  %v507_v16 = vrot.slane %v503_v7, 4  ;;  %v511_v17 = vrot.slane %v509_v8, 7  ;;  %v1105_v21 = vld [vmem:[#allocation2 + $0xc4] sm:$0x1] }
  0x28   :  { %v1632_v19 = vor.u32 %v1631_v11, %v1628_v9  ;;  %108 = vst [vmem:[#allocation2 + $0x90] sm:$0x1] %v107_v14  ;;  %v504_v23 = vshll.u32 %v289_v57, 16  ;;  %v1111_v26 = vld [vmem:[#allocation2 + $0xcc] sm:$0x1]  ;;  %v512_v32 = vshll.u32 %v290_v61, 16 }
  0x29   :  { %126 = vst [vmem:[#allocation2 + $0xc0] sm:$0x1] %v125_v6  ;;  %v515_v24 = vrot.slane %v511_v17, 4  ;;  %v1106_v25 = vsel %vm3570_vm2, %v507_v16, %v1105_v21  ;;  %v220_v36 = vld [vmem:[#allocation2 + $0x1c0] sm:$0x1]  ;;  %vm2829_vm11 = vcmask 97280  }
  0x2a   :  { %v1633_v29 = vrot.slane %v1632_v19, 4  ;;  %v1393_v31 = vld [vmem:[#allocation2 + $0x94] sm:$0x1]  ;;  %129 = vst [vmem:[#allocation2 + $0xc8] sm:$0x1] %v128_v15  ;;  %v221_v39 = vsel %vm3570_vm2, 0, %v220_v36  ;;  %v506_v42 = vor.u32 %v504_v23, %v503_v7  ;;  %v514_v45 = vor.u32 %v512_v32, %v511_v17 }
  0x2b   :  { %v1509_v34 = vshll.u32 %v1393_v31, 16  ;;  %1107 = vst [vmem:[#allocation2 + $0xc4] sm:$0x1] %v1106_v25  ;;  %v1112_v35 = vsel %vm3570_vm2, %v515_v24, %v1111_v26  ;;  %v223_v43 = vld [vmem:[#allocation2 + $0x1c8] sm:$0x1]  ;;  %vm2972_vm12 = vcmask 1041408  }
  0x2c   :  { %v1638_v37 = vsel %vm3651_vm8, %v1633_v29, %v1637_v20  ;;  %v1072_v38 = vld [vmem:[#allocation2 + $0x98] sm:$0xf]  ;;  %1113 = vst [vmem:[#allocation2 + $0xcc] sm:$0x1] %v1112_v35  ;;  %v224_v46 = vsel %vm3570_vm2, 0, %v223_v43  ;;  %vm2846_vm13 = vcmask 130048  }
  0x2d   :  { %v3714_v40 = vunpack.c.l.b16 %v1638_v37  ;;  %v1073_v41 = vsel %vm3602_vm5, %v466_v22, %v1072_v38  ;;  %222 = vst [vmem:[#allocation2 + $0x1c0] sm:$0x1] %v221_v39  ;;  %v1511_v50 = vrot.slane %v1509_v34, 5  ;;  %v317_v55 = vld [vmem:[%s5130_s0 + $0xc4] sm:$0xf]  ;;  %vm2863_vm14 = vcmask 162816  }
  0x2e   :  { %1074 = vst [vmem:[#allocation2 + $0x98] sm:$0xf] %v1073_v41  ;;  %v1395_v44 = vld [vmem:[#allocation2 + $0x9c] sm:$0x1]  ;;  %v318_v59 = vld [vmem:[%s5130_s0 + $0xc8] sm:$0xf] }
  0x2f   :  { %v2511_v48 = vpack.c.b16 %v3714_v40, %v2499_v33  ;;  %v1392_v49 = vld [vmem:[#allocation2 + $0x90] sm:$0xf]  ;;  %225 = vst [vmem:[#allocation2 + $0x1c8] sm:$0x1] %v224_v46  ;;  %v1523_v56 = vshll.u32 %v1395_v44, 16  ;;  %v725_v60 = vshrl.u32 %v317_v55, 16 }
  0x30   :  { %v1500_v52 = vshrl.u32 %v1392_v49, 16  ;;  %v1503_v53 = vshll.u32 %v1392_v49, 16  ;;  %v1102_v54 = vld [vmem:[#allocation2 + $0xc0] sm:$0xf]  ;;  %v728_v6 = vshll.u32 %v317_v55, 16  ;;  %v733_v7 = vshrl.u32 %v318_v59, 16 }
  0x31   :  { %2523 = vrot.lane.b32.xlu2 %v2511_v48, %s3532_s29  ;;  %v1103_v57 = vsel %vm3602_vm5, %v506_v42, %v1102_v54  ;;  %v1108_v58 = vld [vmem:[#allocation2 + $0xc8] sm:$0xf]  ;;  %v727_v4 = vrot.slane %v725_v60, 7  ;;  %v736_v11 = vshll.u32 %v318_v59, 16  ;;  %v1525_v17 = vrot.slane %v1523_v56, 5 }
  0x32   :  { %v1502_v61 = vrot.slane %v1500_v52, 4  ;;  %v1505_v62 = vrot.slane %v1503_v53, 5  ;;  %1104 = vst [vmem:[#allocation2 + $0xc0] sm:$0xf] %v1103_v57  ;;  %v1109_v63 = vsel %vm3602_vm5, %v514_v45, %v1108_v58  ;;  %v1405_v0 = vld [vmem:[#allocation2 + $0xc4] sm:$0x1] }
  0x33   :  { %1110 = vst [vmem:[#allocation2 + $0xc8] sm:$0xf] %v1109_v63  ;;  %v1407_v2 = vld [vmem:[#allocation2 + $0xcc] sm:$0x1]  ;;  %v1593_v3 = vshll.u32 %v1405_v0, 16  ;;  %v731_v9 = vrot.slane %v727_v4, 4  ;;  %v730_v20 = vor.u32 %v728_v6, %v727_v4 }
  0x34   :  { %v1506_v30 = vor.u32 %v1505_v62, %v1502_v61  ;;  %v1607_v5 = vshll.u32 %v1407_v2, 16  ;;  %v1270_v12 = vld [vmem:[#allocation2 + $0x1c0] sm:$0xf]  ;;  %v1273_v18 = vld [vmem:[#allocation2 + $0x1c4] sm:$0x1]  ;;  %v735_v21 = vrot.slane %v733_v7, 7 }
  0x35   :  { %v1394_v8 = vld [vmem:[#allocation2 + $0x98] sm:$0xf]  ;;  %v3732_v19 = vrot.slane %v1593_v3, 5  ;;  %v1274_v22 = vsel %vm3570_vm2, %v731_v9, %v1273_v18  ;;  %v1279_v24 = vld [vmem:[#allocation2 + $0x1cc] sm:$0x1]  ;;  %v1271_v36 = vsel %vm3602_vm5, %v730_v20, %v1270_v12  ;;  %vm2880_vm15 = vcmask 195584  }
  0x36   :  { %v1507_v14 = vrot.slane %v1506_v30, 4  ;;  %v1514_v15 = vshrl.u32 %v1394_v8, 16  ;;  %v1517_v16 = vshll.u32 %v1394_v8, 16  ;;  %v1276_v23 = vld [vmem:[#allocation2 + $0x1c8] sm:$0xf]  ;;  %v1609_v33 = vrot.slane %v1607_v5, 5 }
  0x37   :  { %1275 = vst [vmem:[#allocation2 + $0x1c4] sm:$0x1] %v1274_v22  ;;  %v112_v31 = vld [vmem:[#allocation2 + $0xa0] sm:$0x1]  ;;  %v738_v34 = vor.u32 %v736_v11, %v735_v21  ;;  %v739_v35 = vrot.slane %v735_v21, 4  ;;  %vm2897_vm0 = vcmask 228352  }
  0x38   :  { %v1512_v25 = vsel %vm3651_vm8, %v1507_v14, %v1511_v50  ;;  %v1516_v26 = vrot.slane %v1514_v15, 4  ;;  %v1519_v29 = vrot.slane %v1517_v16, 5  ;;  %v115_v37 = vld [vmem:[#allocation2 + $0xa8] sm:$0x1]  ;;  %1272 = vst [vmem:[#allocation2 + $0x1c0] sm:$0xf] %v1271_v36 }
  0x39   :  { %v1404_v32 = vld [vmem:[#allocation2 + $0xc0] sm:$0xf]  ;;  %v2491_v39 = vunpack.c.l.b16 %v1512_v25  ;;  %v1277_v46 = vsel %vm3602_vm5, %v738_v34, %v1276_v23  ;;  %v1280_v48 = vsel %vm3570_vm2, %v739_v35, %v1279_v24  ;;  %v285_v49 = vld [vmem:[%s5130_s0 + $0x44] sm:$0xf]  ;;  %v286_v50 = vld [vmem:[%s5130_s0 + $0x48] sm:$0xf] }
  0x3a   :  { %v1520_v38 = vor.u32 %v1519_v29, %v1516_v26  ;;  %v1406_v41 = vld [vmem:[#allocation2 + $0xc8] sm:$0xf]  ;;  %v1584_v42 = vshrl.u32 %v1404_v32, 16  ;;  %v1587_v43 = vshll.u32 %v1404_v32, 16  ;;  %1278 = vst [vmem:[#allocation2 + $0x1c8] sm:$0xf] %v1277_v46 }
  0x3b   :  { %v1598_v44 = vshrl.u32 %v1406_v41, 16  ;;  %v1601_v45 = vshll.u32 %v1406_v41, 16  ;;  %v113_v55 = vsel %vm3570_vm2, 0, %v112_v31  ;;  %1281 = vst [vmem:[#allocation2 + $0x1cc] sm:$0x1] %v1280_v48  ;;  %v116_v58 = vsel %vm3570_vm2, 0, %v115_v37 }
  0x3c   :  { %v1521_v52 = vrot.slane %v1520_v38, 4  ;;  %v1586_v53 = vrot.slane %v1584_v42, 4  ;;  %v1589_v54 = vrot.slane %v1587_v43, 5  ;;  %v469_v59 = vshrl.u32 %v285_v49, 16  ;;  %114 = vst [vmem:[#allocation2 + $0xa0] sm:$0x1] %v113_v55 }
  0x3d   :  { %v1600_v56 = vrot.slane %v1598_v44, 4  ;;  %v1603_v57 = vrot.slane %v1601_v45, 5  ;;  %v472_v62 = vshll.u32 %v285_v49, 16  ;;  %v477_v63 = vshrl.u32 %v286_v50, 16  ;;  %117 = vst [vmem:[#allocation2 + $0xa8] sm:$0x1] %v116_v58 }
  0x3e   :  { %v1526_v60 = vsel %vm3651_vm8, %v1521_v52, %v1525_v17  ;;  %v1590_v61 = vor.u32 %v1589_v54, %v1586_v53  ;;  %v1465_v3 = vld [vmem:[#allocation2 + $0x1c4] sm:$0x1]  ;;  %v471_v4 = vrot.slane %v469_v59, 7  ;;  %v480_v30 = vshll.u32 %v286_v50, 16  ;;  %v1087_v16 = vld [vmem:[#allocation2 + $0xac] sm:$0x1] }
  0x3f   :  { %v3756_v0 = vunpack.c.l.b16 %v1526_v60  ;;  %v1604_v2 = vor.u32 %v1603_v57, %v1600_v56  ;;  %v1649_v6 = vshll.u32 %v1465_v3, 16  ;;  %v479_v7 = vrot.slane %v477_v63, 7  ;;  %v1081_v8 = vld [vmem:[#allocation2 + $0xa4] sm:$0x1]  ;;  %v1464_v12 = vld [vmem:[#allocation2 + $0x1c0] sm:$0xf] }
  0x40   :  { %v1591_v5 = vrot.slane %v1590_v61, 4  ;;  %v474_v14 = vor.u32 %v472_v62, %v471_v4  ;;  %v475_v15 = vrot.slane %v471_v4, 4  ;;  %v1640_v18 = vshrl.u32 %v1464_v12, 16  ;;  %v232_v22 = vld [vmem:[#allocation2 + $0x1e0] sm:$0x1] }
  0x41   :  { %v2507_v9 = vpack.c.b16 %v3756_v0, %v2491_v39  ;;  %v1605_v11 = vrot.slane %v1604_v2, 4  ;;  %v1643_v20 = vshll.u32 %v1464_v12, 16  ;;  %v1651_v21 = vrot.slane %v1649_v6, 5  ;;  %v1466_v25 = vld [vmem:[#allocation2 + $0x1c8] sm:$0xf] }
  0x42   :  { %v1596_v17 = vsel %vm3651_vm8, %v1591_v5, %v3732_v19  ;;  %v482_v26 = vor.u32 %v480_v30, %v479_v7  ;;  %v483_v29 = vrot.slane %v479_v7, 4  ;;  %v235_v31 = vld [vmem:[#allocation2 + $0x1e8] sm:$0x1]  ;;  %v321_v32 = vld [vmem:[%s5130_s0 + $0xd4] sm:$0xf]  ;;  %v1642_v35 = vrot.slane %v1640_v18, 4 }
  0x43   :  { %2515 = vrot.lane.b32.xlu0 %v2507_v9, %s3532_s29  ;;  %v1610_v23 = vsel %vm3651_vm8, %v1605_v11, %v1609_v33  ;;  %v3765_v24 = vunpack.c.l.b16 %v1596_v17  ;;  %v1467_v34 = vld [vmem:[#allocation2 + $0x1cc] sm:$0x1]  ;;  %v1645_v36 = vrot.slane %v1643_v20, 5  ;;  %v1654_v37 = vshrl.u32 %v1466_v25, 16  ;;  %v1078_v41 = vld [vmem:[#allocation2 + $0xa0] sm:$0xf] }
  0x44   :  { %v3770_v19 = vunpack.c.l.b16 %v1610_v23  ;;  %v1657_v38 = vshll.u32 %v1466_v25, 16  ;;  %v1663_v39 = vshll.u32 %v1467_v34, 16  ;;  %v1082_v33 = vsel %vm3570_vm2, %v475_v15, %v1081_v8  ;;  %v322_v43 = vld [vmem:[%s5130_s0 + $0xd8] sm:$0xf]  ;;  %v1084_v49 = vld [vmem:[#allocation2 + $0xa8] sm:$0xf] }
  0x45   :  { %v1088_v42 = vsel %vm3570_vm2, %v483_v29, %v1087_v16  ;;  %v1646_v45 = vor.u32 %v1645_v36, %v1642_v35  ;;  %v1656_v46 = vrot.slane %v1654_v37, 4  ;;  %v1079_v48 = vsel %vm3602_vm5, %v474_v14, %v1078_v41  ;;  %1083 = vst [vmem:[#allocation2 + $0xa4] sm:$0x1] %v1082_v33  ;;  %v1297_v61 = vld [vmem:[#allocation2 + $0x1e4] sm:$0x1] }
  0x46   :  { %v2510_v44 = vpack.c.b16 %v3770_v19, %v3765_v24  ;;  %v1659_v50 = vrot.slane %v1657_v38, 5  ;;  %1080 = vst [vmem:[#allocation2 + $0xa0] sm:$0xf] %v1079_v48  ;;  %v1085_v52 = vsel %vm3602_vm5, %v482_v26, %v1084_v49  ;;  %v233_v53 = vsel %vm3570_vm2, 0, %v232_v22  ;;  %v1303_v3 = vld [vmem:[#allocation2 + $0x1ec] sm:$0x1] }
  0x47   :  { %v1647_v54 = vrot.slane %v1646_v45, 4  ;;  %v1665_v55 = vrot.slane %v1663_v39, 5  ;;  %1086 = vst [vmem:[#allocation2 + $0xa8] sm:$0xf] %v1085_v52  ;;  %v236_v56 = vsel %vm3570_vm2, 0, %v235_v31  ;;  %v757_v57 = vshrl.u32 %v321_v32, 16 }
  0x48   :  { %2521 = vrot.lane.b32.xlu1 %v2510_v44, %s3532_s29  ;;  %v1660_v58 = vor.u32 %v1659_v50, %v1656_v46  ;;  %1089 = vst [vmem:[#allocation2 + $0xac] sm:$0x1] %v1088_v42  ;;  %v760_v59 = vshll.u32 %v321_v32, 16  ;;  %v765_v60 = vshrl.u32 %v322_v43, 16  ;;  %v768_v2 = vshll.u32 %v322_v43, 16 }
  0x49   :  { %v1652_v62 = vsel %vm3651_vm8, %v1647_v54, %v1651_v21  ;;  %234 = vst [vmem:[#allocation2 + $0x1e0] sm:$0x1] %v233_v53  ;;  %v759_v63 = vrot.slane %v757_v57, 7  ;;  %v33_v5 = vld [vmem:[#allocation2 + $0xdc] sm:$0x1]  ;;  %vm2914_vm1 = vcmask 261120  }
  0x4a   :  { %v1661_v4 = vrot.slane %v1660_v58, 4  ;;  %237 = vst [vmem:[#allocation2 + $0x1e8] sm:$0x1] %v236_v56  ;;  %v767_v30 = vrot.slane %v765_v60, 7  ;;  %v3792_v6 = vunpack.c.l.b16 %v1652_v62  ;;  %v34_v8 = vsel %vm3570_vm2, 0, %v33_v5 }
  0x4b   :  { %v763_v7 = vrot.slane %v759_v63, 4  ;;  %v133_v9 = vld [vmem:[#allocation2 + $0xd8] sm:$0x1]  ;;  %v136_v11 = vld [vmem:[#allocation2 + $0xe0] sm:$0x1]  ;;  %v762_v21 = vor.u32 %v760_v59, %v759_v63  ;;  %vm2955_vm3 = vcmask 293888  }
  0x4c   :  { %v1666_v12 = vsel %vm3651_vm8, %v1661_v4, %v1665_v55  ;;  %v1397_v14 = vld [vmem:[#allocation2 + $0xa4] sm:$0x1]  ;;  %v771_v15 = vrot.slane %v767_v30, 4  ;;  %35 = vst [vmem:[#allocation2 + $0xdc] sm:$0x1] %v34_v8  ;;  %v134_v16 = vsel %vm3570_vm2, 0, %v133_v9  ;;  %v770_v29 = vor.u32 %v768_v2, %v767_v30 }
  0x4d   :  { %v3800_v17 = vunpack.c.l.b16 %v1666_v12  ;;  %v1396_v18 = vld [vmem:[#allocation2 + $0xa0] sm:$0xf]  ;;  %v1537_v20 = vshll.u32 %v1397_v14, 16  ;;  %v1298_v22 = vsel %vm3570_vm2, %v763_v7, %v1297_v61  ;;  %135 = vst [vmem:[#allocation2 + $0xd8] sm:$0x1] %v134_v16  ;;  %v137_v33 = vsel %vm3570_vm2, 0, %v136_v11 }
  0x4e   :  { %v1398_v23 = vld [vmem:[#allocation2 + $0xa8] sm:$0xf]  ;;  %v1528_v25 = vshrl.u32 %v1396_v18, 16  ;;  %v1531_v26 = vshll.u32 %v1396_v18, 16  ;;  %1299 = vst [vmem:[#allocation2 + $0x1e4] sm:$0x1] %v1298_v22  ;;  %v1304_v31 = vsel %vm3570_vm2, %v771_v15, %v1303_v3 }
  0x4f   :  { %v2512_v32 = vpack.c.b16 %v3800_v17, %v3792_v6  ;;  %v1399_v34 = vld [vmem:[#allocation2 + $0xac] sm:$0x1]  ;;  %v1542_v35 = vshrl.u32 %v1398_v23, 16  ;;  %v1545_v36 = vshll.u32 %v1398_v23, 16  ;;  %1305 = vst [vmem:[#allocation2 + $0x1ec] sm:$0x1] %v1304_v31 }
  0x50   :  { %v1530_v37 = vrot.slane %v1528_v25, 4  ;;  %v1533_v38 = vrot.slane %v1531_v26, 5  ;;  %v1551_v39 = vshll.u32 %v1399_v34, 16  ;;  %v1294_v41 = vld [vmem:[#allocation2 + $0x1e0] sm:$0xf]  ;;  %v1539_v48 = vrot.slane %v1537_v20, 5 }
  0x51   :  { %2525 = vrot.lane.b32.xlu2 %v2512_v32, %s3532_s29  ;;  %v1544_v42 = vrot.slane %v1542_v35, 4  ;;  %v1547_v43 = vrot.slane %v1545_v36, 5  ;;  %v1295_v44 = vsel %vm3602_vm5, %v762_v21, %v1294_v41  ;;  %v1300_v45 = vld [vmem:[#allocation2 + $0x1e8] sm:$0xf]  ;;  %v292_v50 = vld [vmem:[%s5130_s0 + $0x60] sm:$0xf] }
  0x52   :  { %v1534_v46 = vor.u32 %v1533_v38, %v1530_v37  ;;  %1296 = vst [vmem:[#allocation2 + $0x1e0] sm:$0xf] %v1295_v44  ;;  %v1301_v49 = vsel %vm3602_vm5, %v770_v29, %v1300_v45  ;;  %v1553_v53 = vrot.slane %v1551_v39, 5  ;;  %v525_v54 = vshrl.u32 %v292_v50, 16  ;;  %v1123_v61 = vld [vmem:[#allocation2 + $0xe4] sm:$0x1] }
  0x53   :  { %v1548_v52 = vor.u32 %v1547_v43, %v1544_v42  ;;  %1302 = vst [vmem:[#allocation2 + $0x1e8] sm:$0xf] %v1301_v49  ;;  %v528_v56 = vshll.u32 %v292_v50, 16  ;;  %v1411_v63 = vld [vmem:[#allocation2 + $0xdc] sm:$0x1] }
  0x54   :  { %v1535_v55 = vrot.slane %v1534_v46, 4  ;;  %138 = vst [vmem:[#allocation2 + $0xe0] sm:$0x1] %v137_v33  ;;  %v1410_v57 = vld [vmem:[#allocation2 + $0xd8] sm:$0xf]  ;;  %v527_v60 = vrot.slane %v525_v54, 7 }
  0x55   :  { %v1549_v58 = vrot.slane %v1548_v52, 4  ;;  %v1473_v59 = vld [vmem:[#allocation2 + $0x1e4] sm:$0x1]  ;;  %v1724_v2 = vshrl.u32 %v1410_v57, 16  ;;  %v1727_v3 = vshll.u32 %v1410_v57, 16  ;;  %v1733_v23 = vshll.u32 %v1411_v63, 16 }
  0x56   :  { %v1540_v62 = vsel %vm3651_vm8, %v1535_v55, %v1539_v48  ;;  %v226_v4 = vld [vmem:[#allocation2 + $0x1d0] sm:$0x1]  ;;  %v1705_v7 = vshll.u32 %v1473_v59, 16  ;;  %v531_v8 = vrot.slane %v527_v60, 4  ;;  %v1475_v11 = vld [vmem:[#allocation2 + $0x1ec] sm:$0x1]  ;;  %v530_v12 = vor.u32 %v528_v56, %v527_v60 }
  0x57   :  { %v1554_v30 = vsel %vm3651_vm8, %v1549_v58, %v1553_v53  ;;  %v3822_v5 = vunpack.c.l.b16 %v1540_v62  ;;  %v1726_v14 = vrot.slane %v1724_v2, 4  ;;  %v1729_v15 = vrot.slane %v1727_v3, 5  ;;  %v229_v16 = vld [vmem:[#allocation2 + $0x1d8] sm:$0x1]  ;;  %v319_v18 = vld [vmem:[%s5130_s0 + $0xcc] sm:$0xf] }
  0x58   :  { %v3824_v9 = vunpack.c.l.b16 %v1554_v30  ;;  %v1719_v21 = vshll.u32 %v1475_v11, 16  ;;  %v1124_v22 = vsel %vm3570_vm2, %v531_v8, %v1123_v61  ;;  %v227_v25 = vsel %vm3570_vm2, 0, %v226_v4  ;;  %v320_v50 = vld [vmem:[%s5130_s0 + $0xd0] sm:$0xf]  ;;  %v1285_v57 = vld [vmem:[#allocation2 + $0x1d4] sm:$0x1] }
  0x59   :  { %v1472_v20 = vld [vmem:[#allocation2 + $0x1e0] sm:$0xf]  ;;  %1125 = vst [vmem:[#allocation2 + $0xe4] sm:$0x1] %v1124_v22  ;;  %v1707_v34 = vrot.slane %v1705_v7, 5  ;;  %v1730_v38 = vor.u32 %v1729_v15, %v1726_v14  ;;  %v230_v45 = vsel %vm3570_vm2, 0, %v229_v16 }
  0x5a   :  { %v2508_v26 = vpack.c.b16 %v3824_v9, %v3822_v5  ;;  %v1474_v29 = vld [vmem:[#allocation2 + $0x1e8] sm:$0xf]  ;;  %v1696_v31 = vshrl.u32 %v1472_v20, 16  ;;  %v1699_v32 = vshll.u32 %v1472_v20, 16  ;;  %v1721_v33 = vrot.slane %v1719_v21, 5 }
  0x5b   :  { %v1710_v35 = vshrl.u32 %v1474_v29, 16  ;;  %v1713_v36 = vshll.u32 %v1474_v29, 16  ;;  %v1120_v37 = vld [vmem:[#allocation2 + $0xe0] sm:$0xf]  ;;  %228 = vst [vmem:[#allocation2 + $0x1d0] sm:$0x1] %v227_v25 }
  0x5c   :  { %2517 = vrot.lane.b32.xlu0 %v2508_v26, %s3532_s29  ;;  %v1698_v39 = vrot.slane %v1696_v31, 4  ;;  %v1701_v41 = vrot.slane %v1699_v32, 5  ;;  %v1121_v42 = vsel %vm3602_vm5, %v530_v12, %v1120_v37  ;;  %v741_v46 = vshrl.u32 %v319_v18, 16  ;;  %231 = vst [vmem:[#allocation2 + $0x1d8] sm:$0x1] %v230_v45 }
  0x5d   :  { %v1712_v43 = vrot.slane %v1710_v35, 4  ;;  %v1715_v44 = vrot.slane %v1713_v36, 5  ;;  %1122 = vst [vmem:[#allocation2 + $0xe0] sm:$0xf] %v1121_v42  ;;  %v3840_v49 = vrot.slane %v1733_v23, 5  ;;  %v744_v52 = vshll.u32 %v319_v18, 16 }
  0x5e   :  { %v1702_v48 = vor.u32 %v1701_v41, %v1698_v39  ;;  %v3845_v54 = vrot.slane %v1730_v38, 4  ;;  %v743_v55 = vrot.slane %v741_v46, 7  ;;  %v749_v56 = vshrl.u32 %v320_v50, 16  ;;  %v145_v60 = vld [vmem:[#allocation2 + $0xf8] sm:$0x1] }
  0x5f   :  { %v1716_v53 = vor.u32 %v1715_v44, %v1712_v43  ;;  %v752_v59 = vshll.u32 %v320_v50, 16  ;;  %v148_v61 = vld [vmem:[#allocation2 + $0x100] sm:$0x1]  ;;  %v1291_v7 = vld [vmem:[#allocation2 + $0x1dc] sm:$0x1]  ;;  %v146_v8 = vsel %vm3570_vm2, 0, %v145_v60 }
  0x60   :  { %v1703_v58 = vrot.slane %v1702_v48, 4  ;;  %v1413_v63 = vld [vmem:[#allocation2 + $0xe4] sm:$0x1]  ;;  %v746_v2 = vor.u32 %v744_v52, %v743_v55  ;;  %v747_v3 = vrot.slane %v743_v55, 4  ;;  %v751_v4 = vrot.slane %v749_v56, 7 }
  0x61   :  { %v1717_v62 = vrot.slane %v1716_v53, 4  ;;  %v149_v11 = vsel %vm3570_vm2, 0, %v148_v61  ;;  %v295_v12 = vld [vmem:[%s5130_s0 + $0x6c] sm:$0xf]  ;;  %147 = vst [vmem:[#allocation2 + $0xf8] sm:$0x1] %v146_v8  ;;  %v1736_v46 = vsel %vm3651_vm8, %v3845_v54, %v3840_v49 }
  0x62   :  { %v1708_v30 = vsel %vm3651_vm8, %v1703_v58, %v1707_v34  ;;  %v754_v16 = vor.u32 %v752_v59, %v751_v4  ;;  %v755_v18 = vrot.slane %v751_v4, 4  ;;  %v1282_v20 = vld [vmem:[#allocation2 + $0x1d0] sm:$0xf]  ;;  %v1747_v23 = vshll.u32 %v1413_v63, 16  ;;  %150 = vst [vmem:[#allocation2 + $0x100] sm:$0x1] %v149_v11 }
  0x63   :  { %v1722_v14 = vsel %vm3651_vm8, %v1717_v62, %v1721_v33  ;;  %v3858_v15 = vunpack.c.l.b16 %v1708_v30  ;;  %v1283_v25 = vsel %vm3602_vm5, %v746_v2, %v1282_v20  ;;  %v1286_v26 = vsel %vm3570_vm2, %v747_v3, %v1285_v57  ;;  %v1288_v32 = vld [vmem:[#allocation2 + $0x1d8] sm:$0xf]  ;;  %v296_v37 = vld [vmem:[%s5130_s0 + $0x70] sm:$0xf]  ;;  %v1141_v45 = vld [vmem:[#allocation2 + $0xfc] sm:$0x1] }
  0x64   :  { %v3860_v21 = vunpack.c.l.b16 %v1722_v14  ;;  %v3862_v22 = vld [vmem:[#allocation2 + $0xe0] sm:$0xf]  ;;  %1284 = vst [vmem:[#allocation2 + $0x1d0] sm:$0xf] %v1283_v25  ;;  %v1292_v34 = vsel %vm3570_vm2, %v755_v18, %v1291_v7  ;;  %v1289_v36 = vsel %vm3602_vm5, %v754_v16, %v1288_v32  ;;  %v549_v38 = vshrl.u32 %v295_v12, 16 }
  0x65   :  { %v1738_v29 = vshrl.u32 %v3862_v22, 16  ;;  %v1741_v31 = vshll.u32 %v3862_v22, 16  ;;  %1287 = vst [vmem:[#allocation2 + $0x1d4] sm:$0x1] %v1286_v26  ;;  %v552_v39 = vshll.u32 %v295_v12, 16  ;;  %v557_v42 = vshrl.u32 %v296_v37, 16 }
  0x66   :  { %v2514_v35 = vpack.c.b16 %v3860_v21, %v3858_v15  ;;  %1290 = vst [vmem:[#allocation2 + $0x1d8] sm:$0xf] %v1289_v36  ;;  %v560_v43 = vshll.u32 %v296_v37, 16  ;;  %v551_v44 = vrot.slane %v549_v38, 7  ;;  %v1749_v50 = vrot.slane %v1747_v23, 5 }
  0x67   :  { %v1740_v41 = vrot.slane %v1738_v29, 4  ;;  %v1743_v33 = vrot.slane %v1741_v31, 5  ;;  %1293 = vst [vmem:[#allocation2 + $0x1dc] sm:$0x1] %v1292_v34  ;;  %v559_v52 = vrot.slane %v557_v42, 7  ;;  %v2531_v3 = vunpack.c.l.b16 %v1736_v46 }
  0x68   :  { %2529 = vrot.lane.b32.xlu1 %v2514_v35, %s3532_s29  ;;  %v1147_v53 = vld [vmem:[#allocation2 + $0x104] sm:$0x1]  ;;  %v151_v55 = vld [vmem:[#allocation2 + $0x108] sm:$0x1]  ;;  %v554_v56 = vor.u32 %v552_v39, %v551_v44  ;;  %v555_v57 = vrot.slane %v551_v44, 4 }
  0x69   :  { %v1744_v48 = vor.u32 %v1743_v33, %v1740_v41  ;;  %v1138_v58 = vld [vmem:[#allocation2 + $0xf8] sm:$0xf]  ;;  %v152_v59 = vsel %vm3570_vm2, 0, %v151_v55  ;;  %v154_v60 = vld [vmem:[#allocation2 + $0x110] sm:$0x1]  ;;  %v562_v62 = vor.u32 %v560_v43, %v559_v52  ;;  %v563_v63 = vrot.slane %v559_v52, 4 }
  0x6a   :  { %v1144_v2 = vld [vmem:[#allocation2 + $0x100] sm:$0xf]  ;;  %153 = vst [vmem:[#allocation2 + $0x108] sm:$0x1] %v152_v59  ;;  %v1139_v49 = vsel %vm3602_vm5, %v554_v56, %v1138_v58  ;;  %v1142_v54 = vsel %vm3570_vm2, %v555_v57, %v1141_v45  ;;  %v155_v30 = vsel %vm3570_vm2, 0, %v154_v60 }
  0x6b   :  { %v1745_v61 = vrot.slane %v1744_v48, 4  ;;  %v1468_v4 = vld [vmem:[#allocation2 + $0x1d0] sm:$0xf]  ;;  %v297_v7 = vld [vmem:[%s5130_s0 + $0x74] sm:$0xf]  ;;  %v1145_v16 = vsel %vm3602_vm5, %v562_v62, %v1144_v2  ;;  %v1148_v25 = vsel %vm3570_vm2, %v563_v63, %v1147_v53 }
  0x6c   :  { %v1469_v11 = vld [vmem:[#allocation2 + $0x1d4] sm:$0x1]  ;;  %v1668_v12 = vshrl.u32 %v1468_v4, 16  ;;  %v1671_v14 = vshll.u32 %v1468_v4, 16  ;;  %1140 = vst [vmem:[#allocation2 + $0xf8] sm:$0xf] %v1139_v49 }
  0x6d   :  { %v1750_v8 = vsel %vm3651_vm8, %v1745_v61, %v1749_v50  ;;  %v1470_v20 = vld [vmem:[#allocation2 + $0x1d8] sm:$0xf]  ;;  %v1677_v23 = vshll.u32 %v1469_v11, 16  ;;  %1143 = vst [vmem:[#allocation2 + $0xfc] sm:$0x1] %v1142_v54  ;;  %v565_v26 = vshrl.u32 %v297_v7, 16 }
  0x6e   :  { %v3899_v18 = vunpack.c.l.b16 %v1750_v8  ;;  %v1471_v29 = vld [vmem:[#allocation2 + $0x1dc] sm:$0x1]  ;;  %v1670_v31 = vrot.slane %v1668_v12, 4  ;;  %v1673_v32 = vrot.slane %v1671_v14, 5  ;;  %v1682_v34 = vshrl.u32 %v1470_v20, 16 }
  0x6f   :  { %v1685_v35 = vshll.u32 %v1470_v20, 16  ;;  %v1679_v37 = vrot.slane %v1677_v23, 5  ;;  %v1691_v38 = vshll.u32 %v1471_v29, 16  ;;  %1146 = vst [vmem:[#allocation2 + $0x100] sm:$0xf] %v1145_v16  ;;  %v567_v43 = vrot.slane %v565_v26, 7 }
  0x70   :  { %v2547_v36 = vpack.c.b16 %v3899_v18, %v2531_v3  ;;  %v298_v39 = vld [vmem:[%s5130_s0 + $0x78] sm:$0xf]  ;;  %v1674_v41 = vor.u32 %v1673_v32, %v1670_v31  ;;  %v1684_v33 = vrot.slane %v1682_v34, 4  ;;  %1149 = vst [vmem:[#allocation2 + $0x104] sm:$0x1] %v1148_v25  ;;  %v568_v44 = vshll.u32 %v297_v7, 16 }
  0x71   :  { %v1687_v42 = vrot.slane %v1685_v35, 5  ;;  %156 = vst [vmem:[#allocation2 + $0x110] sm:$0x1] %v155_v30  ;;  %v573_v45 = vshrl.u32 %v298_v39, 16  ;;  %v576_v46 = vshll.u32 %v298_v39, 16  ;;  %v1693_v52 = vrot.slane %v1691_v38, 5 }
  0x72   :  { %2555 = vrot.lane.b32.xlu2 %v2547_v36, %s3533_s4  ;;  %v1675_v48 = vrot.slane %v1674_v41, 4  ;;  %v1150_v53 = vld [vmem:[#allocation2 + $0x108] sm:$0xf]  ;;  %v570_v56 = vor.u32 %v568_v44, %v567_v43  ;;  %v571_v57 = vrot.slane %v567_v43, 4  ;;  %v1153_v59 = vld [vmem:[#allocation2 + $0x10c] sm:$0x1] }
  0x73   :  { %v1688_v50 = vor.u32 %v1687_v42, %v1684_v33  ;;  %v1418_v55 = vld [vmem:[#allocation2 + $0xf8] sm:$0xf]  ;;  %v575_v58 = vrot.slane %v573_v45, 7  ;;  %v1159_v60 = vld [vmem:[#allocation2 + $0x114] sm:$0x1] }
  0x74   :  { %v1680_v61 = vsel %vm3651_vm8, %v1675_v48, %v1679_v37  ;;  %v1419_v63 = vld [vmem:[#allocation2 + $0xfc] sm:$0x1]  ;;  %v1780_v2 = vshrl.u32 %v1418_v55, 16  ;;  %v1783_v3 = vshll.u32 %v1418_v55, 16  ;;  %v139_v7 = vld [vmem:[#allocation2 + $0xe8] sm:$0x1]  ;;  %v1151_v20 = vsel %vm3602_vm5, %v570_v56, %v1150_v53 }
  0x75   :  { %v1689_v62 = vrot.slane %v1688_v50, 4  ;;  %v3910_v4 = vunpack.c.l.b16 %v1680_v61  ;;  %v1789_v49 = vshll.u32 %v1419_v63, 16  ;;  %v578_v54 = vor.u32 %v576_v46, %v575_v58  ;;  %v142_v8 = vld [vmem:[#allocation2 + $0xf0] sm:$0x1]  ;;  %v293_v23 = vld [vmem:[%s5130_s0 + $0x64] sm:$0xf] }
  0x76   :  { %v579_v30 = vrot.slane %v575_v58, 4  ;;  %v1420_v12 = vld [vmem:[#allocation2 + $0x100] sm:$0xf]  ;;  %v1782_v14 = vrot.slane %v1780_v2, 4  ;;  %v1785_v16 = vrot.slane %v1783_v3, 5  ;;  %v1154_v36 = vsel %vm3570_vm2, %v571_v57, %v1153_v59 }
  0x77   :  { %v1694_v11 = vsel %vm3651_vm8, %v1689_v62, %v1693_v52  ;;  %v1421_v26 = vld [vmem:[#allocation2 + $0x104] sm:$0x1]  ;;  %v1791_v29 = vrot.slane %v1789_v49, 5  ;;  %v1794_v31 = vshrl.u32 %v1420_v12, 16  ;;  %v1797_v32 = vshll.u32 %v1420_v12, 16 }
  0x78   :  { %v3919_v25 = vunpack.c.l.b16 %v1694_v11  ;;  %v1786_v34 = vor.u32 %v1785_v16, %v1782_v14  ;;  %v1803_v35 = vshll.u32 %v1421_v26, 16  ;;  %1152 = vst [vmem:[#allocation2 + $0x108] sm:$0xf] %v1151_v20  ;;  %v1156_v37 = vld [vmem:[#allocation2 + $0x110] sm:$0xf]  ;;  %v1160_v38 = vsel %vm3570_vm2, %v579_v30, %v1159_v60 }
  0x79   :  { %v1796_v41 = vrot.slane %v1794_v31, 4  ;;  %v1799_v33 = vrot.slane %v1797_v32, 5  ;;  %1155 = vst [vmem:[#allocation2 + $0x10c] sm:$0x1] %v1154_v36  ;;  %v1157_v42 = vsel %vm3602_vm5, %v578_v54, %v1156_v37  ;;  %v294_v43 = vld [vmem:[%s5130_s0 + $0x68] sm:$0xf] }
  0x7a   :  { %v2513_v39 = vpack.c.b16 %v3919_v25, %v3910_v4  ;;  %v1787_v44 = vrot.slane %v1786_v34, 4  ;;  %v1805_v45 = vrot.slane %v1803_v35, 5  ;;  %1158 = vst [vmem:[#allocation2 + $0x110] sm:$0xf] %v1157_v42  ;;  %v140_v46 = vsel %vm3570_vm2, 0, %v139_v7 }
  0x7b   :  { %v143_v48 = vsel %vm3570_vm2, 0, %v142_v8  ;;  %v1800_v50 = vor.u32 %v1799_v33, %v1796_v41  ;;  %1161 = vst [vmem:[#allocation2 + $0x114] sm:$0x1] %v1160_v38  ;;  %v533_v52 = vshrl.u32 %v293_v23, 16  ;;  %v536_v53 = vshll.u32 %v293_v23, 16 }
  0x7c   :  { %2527 = vrot.lane.b32.xlu0 %v2513_v39, %s3532_s29  ;;  %v541_v55 = vshrl.u32 %v294_v43, 16  ;;  %v1792_v56 = vsel %vm3651_vm8, %v1787_v44, %v1791_v29  ;;  %141 = vst [vmem:[#allocation2 + $0xe8] sm:$0x1] %v140_v46  ;;  %v544_v60 = vshll.u32 %v294_v43, 16  ;;  %v1129_v62 = vld [vmem:[#allocation2 + $0xec] sm:$0x1] }
  0x7d   :  { %v1801_v57 = vrot.slane %v1800_v50, 4  ;;  %144 = vst [vmem:[#allocation2 + $0xf0] sm:$0x1] %v143_v48  ;;  %v535_v58 = vrot.slane %v533_v52, 7  ;;  %v3939_v61 = vunpack.c.l.b16 %v1792_v56  ;;  %v244_v63 = vld [vmem:[#allocation2 + $0x200] sm:$0x1] }
  0x7e   :  { %v543_v59 = vrot.slane %v541_v55, 7  ;;  %v1135_v30 = vld [vmem:[#allocation2 + $0xf4] sm:$0x1]  ;;  %v247_v16 = vld [vmem:[#allocation2 + $0x208] sm:$0x1]  ;;  %v245_v31 = vsel %vm3570_vm2, 0, %v244_v63 }
  0x7f   :  { %v1806_v2 = vsel %vm3651_vm8, %v1801_v57, %v1805_v45  ;;  %v1422_v3 = vld [vmem:[#allocation2 + $0x108] sm:$0xf]  ;;  %v538_v49 = vor.u32 %v536_v53, %v535_v58  ;;  %v539_v54 = vrot.slane %v535_v58, 4  ;;  %v324_v32 = vld [vmem:[%s5130_s0 + $0xe0] sm:$0xf]  ;;  %v248_v55 = vsel %vm3570_vm2, 0, %v247_v16 }
  0x80   :  { %v3943_v7 = vunpack.c.l.b16 %v1806_v2  ;;  %v1423_v8 = vld [vmem:[#allocation2 + $0x10c] sm:$0x1]  ;;  %v1808_v11 = vshrl.u32 %v1422_v3, 16  ;;  %v1811_v12 = vshll.u32 %v1422_v3, 16  ;;  %v547_v14 = vrot.slane %v543_v59, 4 }
  0x81   :  { %v1424_v20 = vld [vmem:[#allocation2 + $0x110] sm:$0xf]  ;;  %v1817_v23 = vshll.u32 %v1423_v8, 16  ;;  %v546_v26 = vor.u32 %v544_v60, %v543_v59  ;;  %v1130_v29 = vsel %vm3570_vm2, %v539_v54, %v1129_v62  ;;  %v781_v50 = vshrl.u32 %v324_v32, 16  ;;  %v325_v56 = vld [vmem:[%s5130_s0 + $0xe4] sm:$0xf] }
  0x82   :  { %v2549_v34 = vpack.c.b16 %v3943_v7, %v3939_v61  ;;  %v1425_v35 = vld [vmem:[#allocation2 + $0x114] sm:$0x1]  ;;  %v1810_v36 = vrot.slane %v1808_v11, 4  ;;  %v1813_v37 = vrot.slane %v1811_v12, 5  ;;  %v1822_v38 = vshrl.u32 %v1424_v20, 16 }
  0x83   :  { %v1819_v39 = vrot.slane %v1817_v23, 5  ;;  %v1825_v41 = vshll.u32 %v1424_v20, 16  ;;  %v1831_v33 = vshll.u32 %v1425_v35, 16  ;;  %v1126_v42 = vld [vmem:[#allocation2 + $0xe8] sm:$0xf]  ;;  %v1136_v43 = vsel %vm3570_vm2, %v547_v14, %v1135_v30 }
  0x84   :  { %2559 = vrot.lane.b32.xlu1 %v2549_v34, %s3533_s4  ;;  %v1814_v44 = vor.u32 %v1813_v37, %v1810_v36  ;;  %v1824_v45 = vrot.slane %v1822_v38, 4  ;;  %v1127_v46 = vsel %vm3602_vm5, %v538_v49, %v1126_v42  ;;  %1131 = vst [vmem:[#allocation2 + $0xec] sm:$0x1] %v1130_v29  ;;  %v1132_v48 = vld [vmem:[#allocation2 + $0xf0] sm:$0xf]  ;;  %v3966_v59 = vrot.slane %v781_v50, 7 }
  0x85   :  { %v1827_v52 = vrot.slane %v1825_v41, 5  ;;  %1128 = vst [vmem:[#allocation2 + $0xe8] sm:$0xf] %v1127_v46  ;;  %v1133_v53 = vsel %vm3602_vm5, %v546_v26, %v1132_v48  ;;  %v1833_v58 = vrot.slane %v1831_v33, 5  ;;  %v789_v60 = vshrl.u32 %v325_v56, 16 }
  0x86   :  { %v1815_v57 = vrot.slane %v1814_v44, 4  ;;  %1134 = vst [vmem:[#allocation2 + $0xf0] sm:$0xf] %v1133_v53  ;;  %v784_v63 = vshll.u32 %v324_v32, 16  ;;  %v792_v2 = vshll.u32 %v325_v56, 16 }
  0x87   :  { %v1828_v62 = vor.u32 %v1827_v52, %v1824_v45  ;;  %1137 = vst [vmem:[#allocation2 + $0xf4] sm:$0x1] %v1136_v43  ;;  %v163_v3 = vld [vmem:[#allocation2 + $0x128] sm:$0x1]  ;;  %v3970_v54 = vrot.slane %v789_v60, 7 }
  0x88   :  { %v1820_v49 = vsel %vm3651_vm8, %v1815_v57, %v1819_v39  ;;  %246 = vst [vmem:[#allocation2 + $0x200] sm:$0x1] %v245_v31  ;;  %v164_v30 = vsel %vm3570_vm2, 0, %v163_v3  ;;  %v166_v8 = vld [vmem:[#allocation2 + $0x130] sm:$0x1]  ;;  %v786_v31 = vor.u32 %v784_v63, %v3966_v59 }
  0x89   :  { %v1829_v11 = vrot.slane %v1828_v62, 4  ;;  %249 = vst [vmem:[#allocation2 + $0x208] sm:$0x1] %v248_v55  ;;  %v167_v12 = vsel %vm3570_vm2, 0, %v166_v8  ;;  %v300_v14 = vld [vmem:[%s5130_s0 + $0x80] sm:$0xf]  ;;  %v3979_v16 = vunpack.c.l.b16 %v1820_v49  ;;  %v794_v38 = vor.u32 %v792_v2, %v3970_v54 }
  0x8a   :  { %165 = vst [vmem:[#allocation2 + $0x128] sm:$0x1] %v164_v30  ;;  %v301_v20 = vld [vmem:[%s5130_s0 + $0x84] sm:$0xf]  ;;  %v589_v23 = vshrl.u32 %v300_v14, 16  ;;  %v592_v32 = vshll.u32 %v300_v14, 16 }
  0x8b   :  { %v1834_v26 = vsel %vm3651_vm8, %v1829_v11, %v1833_v58  ;;  %v1415_v29 = vld [vmem:[#allocation2 + $0xec] sm:$0x1]  ;;  %168 = vst [vmem:[#allocation2 + $0x130] sm:$0x1] %v167_v12  ;;  %v597_v34 = vshrl.u32 %v301_v20, 16  ;;  %v600_v44 = vshll.u32 %v301_v20, 16 }
  0x8c   :  { %v3987_v35 = vunpack.c.l.b16 %v1834_v26  ;;  %v3989_v36 = vld [vmem:[#allocation2 + $0xe8] sm:$0xf]  ;;  %v1761_v37 = vshll.u32 %v1415_v29, 16  ;;  %v591_v39 = vrot.slane %v589_v23, 7  ;;  %v1171_v45 = vld [vmem:[#allocation2 + $0x12c] sm:$0x1] }
  0x8d   :  { %v1416_v41 = vld [vmem:[#allocation2 + $0xf0] sm:$0xf]  ;;  %v1752_v33 = vshrl.u32 %v3989_v36, 16  ;;  %v1755_v42 = vshll.u32 %v3989_v36, 16  ;;  %v599_v43 = vrot.slane %v597_v34, 7 }
  0x8e   :  { %v2550_v46 = vpack.c.b16 %v3987_v35, %v3979_v16  ;;  %v1417_v48 = vld [vmem:[#allocation2 + $0xf4] sm:$0x1]  ;;  %v1763_v50 = vrot.slane %v1761_v37, 5  ;;  %v1766_v52 = vshrl.u32 %v1416_v41, 16  ;;  %v1769_v53 = vshll.u32 %v1416_v41, 16 }
  0x8f   :  { %v1754_v55 = vrot.slane %v1752_v33, 4  ;;  %v1757_v56 = vrot.slane %v1755_v42, 5  ;;  %v1775_v57 = vshll.u32 %v1417_v48, 16  ;;  %v1312_v58 = vld [vmem:[#allocation2 + $0x200] sm:$0xf]  ;;  %v594_v60 = vor.u32 %v592_v32, %v591_v39 }
  0x90   :  { %2561 = vrot.lane.b32.xlu2 %v2550_v46, %s3533_s4  ;;  %v1768_v62 = vrot.slane %v1766_v52, 4  ;;  %v1771_v63 = vrot.slane %v1769_v53, 5  ;;  %v1313_v2 = vsel %vm3602_vm5, %v786_v31, %v1312_v58  ;;  %v1318_v3 = vld [vmem:[#allocation2 + $0x208] sm:$0xf]  ;;  %v595_v49 = vrot.slane %v591_v39, 4 }
  0x91   :  { %v1758_v30 = vor.u32 %v1757_v56, %v1754_v55  ;;  %v1777_v8 = vrot.slane %v1775_v57, 5  ;;  %1314 = vst [vmem:[#allocation2 + $0x200] sm:$0xf] %v1313_v2  ;;  %v1319_v11 = vsel %vm3602_vm5, %v794_v38, %v1318_v3  ;;  %v602_v12 = vor.u32 %v600_v44, %v599_v43  ;;  %v1168_v14 = vld [vmem:[#allocation2 + $0x128] sm:$0xf] }
  0x92   :  { %v1772_v20 = vor.u32 %v1771_v63, %v1768_v62  ;;  %1320 = vst [vmem:[#allocation2 + $0x208] sm:$0xf] %v1319_v11  ;;  %v603_v23 = vrot.slane %v599_v43, 4  ;;  %v1169_v26 = vsel %vm3602_vm5, %v594_v60, %v1168_v14  ;;  %v1172_v29 = vsel %vm3570_vm2, %v595_v49, %v1171_v45  ;;  %v1174_v31 = vld [vmem:[#allocation2 + $0x130] sm:$0xf] }
  0x93   :  { %v1759_v32 = vrot.slane %v1758_v30, 4  ;;  %1170 = vst [vmem:[#allocation2 + $0x128] sm:$0xf] %v1169_v26  ;;  %v1175_v34 = vsel %vm3602_vm5, %v602_v12, %v1174_v31  ;;  %v1177_v37 = vld [vmem:[#allocation2 + $0x134] sm:$0x1]  ;;  %v787_v38 = vrot.slane %v3966_v59, 4 }
  0x94   :  { %v659_v39 = vrot.slane %v3584_v10, 4  ;;  %v1773_v41 = vrot.slane %v1772_v20, 4  ;;  %1173 = vst [vmem:[#allocation2 + $0x12c] sm:$0x1] %v1172_v29  ;;  %v1178_v33 = vsel %vm3570_vm2, %v603_v23, %v1177_v37  ;;  %v49_v42 = vld [vmem:[#allocation2 + $0x1fc] sm:$0x1] }
  0x95   :  { %v667_v43 = vrot.slane %v3586_v13, 4  ;;  %v1764_v44 = vsel %vm3651_vm8, %v1759_v32, %v1763_v50  ;;  %1176 = vst [vmem:[#allocation2 + $0x130] sm:$0xf] %v1175_v34  ;;  %v50_v45 = vsel %vm3570_vm2, 0, %v49_v42  ;;  %v241_v46 = vld [vmem:[#allocation2 + $0x1f8] sm:$0x1] }
  0x96   :  { %v1778_v59 = vsel %vm3651_vm8, %v1773_v41, %v1777_v8  ;;  %v4018_v48 = vunpack.c.l.b16 %v1764_v44  ;;  %1179 = vst [vmem:[#allocation2 + $0x134] sm:$0x1] %v1178_v33  ;;  %v242_v52 = vsel %vm3570_vm2, 0, %v241_v46  ;;  %v1315_v53 = vld [vmem:[#allocation2 + $0x204] sm:$0x1]  ;;  %v795_v62 = vrot.slane %v3970_v54, 4 }
  0x97   :  { %v4022_v55 = vunpack.c.l.b16 %v1778_v59  ;;  %51 = vst [vmem:[#allocation2 + $0x1fc] sm:$0x1] %v50_v45  ;;  %v1316_v50 = vsel %vm3570_vm2, %v787_v38, %v1315_v53  ;;  %v82_v56 = vld [vmem:[#allocation2 + $0x50] sm:$0x1]  ;;  %v85_v57 = vld [vmem:[#allocation2 + $0x58] sm:$0x1] }
  0x98   :  { %v4026_v58 = vld [vmem:[#allocation2 + $0x200] sm:$0xf]  ;;  %243 = vst [vmem:[#allocation2 + $0x1f8] sm:$0x1] %v242_v52  ;;  %v83_v60 = vsel %vm3570_vm2, 0, %v82_v56  ;;  %v86_v14 = vsel %vm3570_vm2, 0, %v85_v57 }
  0x99   :  { %v2548_v63 = vpack.c.b16 %v4022_v55, %v4018_v48  ;;  %v4033_v2 = vld [vmem:[#allocation2 + $0x208] sm:$0xf]  ;;  %v1850_v3 = vshrl.u32 %v4026_v58, 16  ;;  %v1853_v49 = vshll.u32 %v4026_v58, 16  ;;  %v5134_v30 = vunpack.c.l.b16 %v4026_v58  ;;  %1317 = vst [vmem:[#allocation2 + $0x204] sm:$0x1] %v1316_v50 }
  0x9a   :  { %v1864_v8 = vshrl.u32 %v4033_v2, 16  ;;  %v5135_v11 = vunpack.c.l.b16 %v4033_v2  ;;  %v1428_v12 = vld [vmem:[#allocation2 + $0x128] sm:$0xf]  ;;  %84 = vst [vmem:[#allocation2 + $0x50] sm:$0x1] %v83_v60  ;;  %v1867_v34 = vshll.u32 %v4033_v2, 16 }
  0x9b   :  { %2557 = vrot.lane.b32.xlu0 %v2548_v63, %s3533_s4  ;;  %v1852_v20 = vrot.slane %v1850_v3, 4  ;;  %v1855_v23 = vrot.slane %v1853_v49, 5  ;;  %v1429_v26 = vld [vmem:[#allocation2 + $0x12c] sm:$0x1]  ;;  %v2060_v29 = vshrl.u32 %v1428_v12, 16  ;;  %v2063_v31 = vshll.u32 %v1428_v12, 16 }
  0x9c   :  { %v4043_v32 = vrot.slane %v1864_v8, 4  ;;  %v2715_v37 = vpack.c.b16 %v5135_v11, %v5134_v30  ;;  %v1430_v38 = vld [vmem:[#allocation2 + $0x130] sm:$0xf]  ;;  %v2069_v41 = vshll.u32 %v1429_v26, 16  ;;  %87 = vst [vmem:[#allocation2 + $0x58] sm:$0x1] %v86_v14 }
  0x9d   :  { %v1431_v33 = vld [vmem:[#allocation2 + $0x134] sm:$0x1]  ;;  %v2062_v42 = vrot.slane %v2060_v29, 4  ;;  %v2065_v44 = vrot.slane %v2063_v31, 5  ;;  %v2074_v45 = vshrl.u32 %v1430_v38, 16  ;;  %v2077_v46 = vshll.u32 %v1430_v38, 16 }
  0x9e   :  { %2727 = vrot.lane.b32.xlu1 %v2715_v37, %s3534_s16  ;;  %v2071_v59 = vrot.slane %v2069_v41, 5  ;;  %v2083_v52 = vshll.u32 %v1431_v33, 16  ;;  %v1479_v53 = vld [vmem:[#allocation2 + $0x1fc] sm:$0x1]  ;;  %v1856_v50 = vor.u32 %v1855_v23, %v1852_v20  ;;  %v276_v37 = vld [vmem:[%s5130_s0 + $0x20] sm:$0xf] }
  0x9f   :  { %v2066_v56 = vor.u32 %v2065_v44, %v2062_v42  ;;  %v2076_v57 = vrot.slane %v2074_v45, 4  ;;  %v2079_v60 = vrot.slane %v2077_v46, 5  ;;  %v1478_v63 = vld [vmem:[#allocation2 + $0x1f8] sm:$0xf]  ;;  %v1845_v3 = vshll.u32 %v1479_v53, 16 }
  0xa0   :  { %v2085_v49 = vrot.slane %v2083_v52, 5  ;;  %v1481_v8 = vld [vmem:[#allocation2 + $0x204] sm:$0x1]  ;;  %v1836_v12 = vshrl.u32 %v1478_v63, 16  ;;  %v1839_v26 = vshll.u32 %v1478_v63, 16  ;;  %v1857_v29 = vrot.slane %v1856_v50, 4 }
  0xa1   :  { %v2067_v31 = vrot.slane %v2066_v56, 4  ;;  %v2080_v38 = vor.u32 %v2079_v60, %v2076_v57  ;;  %v1847_v30 = vrot.slane %v1845_v3, 5  ;;  %v1859_v11 = vshll.u32 %v1481_v8, 16  ;;  %v277_v23 = vld [vmem:[%s5130_s0 + $0x24] sm:$0xf] }
  0xa2   :  { %v1838_v20 = vrot.slane %v1836_v12, 4  ;;  %v1841_v14 = vrot.slane %v1839_v26, 5  ;;  %v397_v41 = vshrl.u32 %v276_v37, 16  ;;  %v400_v33 = vshll.u32 %v276_v37, 16  ;;  %v1024_v52 = vld [vmem:[#allocation2 + $0x50] sm:$0xf] }
  0xa3   :  { %v2072_v42 = vsel %vm3651_vm8, %v2067_v31, %v2071_v59  ;;  %v2081_v44 = vrot.slane %v2080_v38, 4  ;;  %v1861_v45 = vrot.slane %v1859_v11, 5  ;;  %v405_v46 = vshrl.u32 %v277_v23, 16  ;;  %v1219_v60 = vld [vmem:[#allocation2 + $0x174] sm:$0x1] }
  0xa4   :  { %v2635_v53 = vunpack.c.l.b16 %v2072_v42  ;;  %v1842_v50 = vor.u32 %v1841_v14, %v1838_v20  ;;  %v4059_v56 = vrot.slane %v397_v41, 7  ;;  %v408_v57 = vshll.u32 %v277_v23, 16  ;;  %v1225_v63 = vld [vmem:[#allocation2 + $0x17c] sm:$0x1]  ;;  %v1030_v59 = vld [vmem:[#allocation2 + $0x58] sm:$0xf] }
  0xa5   :  { %v2086_v3 = vsel %vm3651_vm8, %v2081_v44, %v2085_v49  ;;  %v1862_v8 = vsel %vm3651_vm8, %v1857_v29, %v1861_v45  ;;  %v4065_v12 = vrot.slane %v405_v46, 7  ;;  %v1220_v11 = vsel %vm3570_vm2, %v659_v39, %v1219_v60  ;;  %v1444_v26 = vld [vmem:[#allocation2 + $0x170] sm:$0xf]  ;;  %v1446_v49 = vld [vmem:[#allocation2 + $0x178] sm:$0xf] }
  0xa6   :  { %v2636_v31 = vunpack.c.l.b16 %v2086_v3  ;;  %v1843_v38 = vrot.slane %v1842_v50, 4  ;;  %v4071_v37 = vunpack.c.l.b16 %v1862_v8  ;;  %v402_v20 = vor.u32 %v400_v33, %v4059_v56  ;;  %1221 = vst [vmem:[#allocation2 + $0x174] sm:$0x1] %v1220_v11  ;;  %v55_v41 = vld [vmem:[#allocation2 + $0x8] sm:$0x1] }
  0xa7   :  { %v410_v14 = vor.u32 %v408_v57, %v4065_v12  ;;  %v1226_v29 = vsel %vm3570_vm2, %v667_v43, %v1225_v63  ;;  %v2284_v10 = vshrl.u32 %v1444_v26, 16  ;;  %v2287_v23 = vshll.u32 %v1444_v26, 16  ;;  %v58_v39 = vld [vmem:[#allocation2 + $0x10] sm:$0x1]  ;;  %v268_v13 = vld [vmem:[%s5130_s0] sm:$0xf] }
  0xa8   :  { %v2647_v42 = vpack.c.b16 %v2636_v31, %v2635_v53  ;;  %v1848_v44 = vsel %vm3651_vm8, %v1843_v38, %v1847_v30  ;;  %v1025_v33 = vsel %vm3602_vm5, %v402_v20, %v1024_v52  ;;  %1227 = vst [vmem:[#allocation2 + $0x17c] sm:$0x1] %v1226_v29  ;;  %v2298_v45 = vshrl.u32 %v1446_v49, 16  ;;  %v269_v30 = vld [vmem:[%s5130_s0 + $0x4] sm:$0xf] }
  0xa9   :  { %v2539_v46 = vunpack.c.l.b16 %v1848_v44  ;;  %1026 = vst [vmem:[#allocation2 + $0x50] sm:$0xf] %v1025_v33  ;;  %v1031_v43 = vsel %vm3602_vm5, %v410_v14, %v1030_v59  ;;  %v2286_v50 = vrot.slane %v2284_v10, 4  ;;  %v2289_v57 = vrot.slane %v2287_v23, 5  ;;  %v979_v10 = vld [vmem:[#allocation2 + $0xc] sm:$0x1] }
  0xaa   :  { %v4093_v52 = vrot.slane %v1867_v34, 5  ;;  %2659 = vrot.lane.b32.xlu2 %v2647_v42, %s3535_s26  ;;  %1032 = vst [vmem:[#allocation2 + $0x58] sm:$0xf] %v1031_v43  ;;  %v2300_v53 = vrot.slane %v2298_v45, 4  ;;  %v2301_v60 = vshll.u32 %v1446_v49, 16  ;;  %v56_v63 = vsel %vm3570_vm2, 0, %v55_v41 }
  0xab   :  { %v2551_v3 = vpack.c.b16 %v4071_v37, %v2539_v46  ;;  %v2290_v8 = vor.u32 %v2289_v57, %v2286_v50  ;;  %57 = vst [vmem:[#allocation2 + $0x8] sm:$0x1] %v56_v63  ;;  %v59_v59 = vsel %vm3570_vm2, 0, %v58_v39  ;;  %v333_v11 = vshrl.u32 %v268_v13, 16  ;;  %v985_v44 = vld [vmem:[#allocation2 + $0x14] sm:$0x1] }
  0xac   :  { %v2303_v26 = vrot.slane %v2301_v60, 5  ;;  %60 = vst [vmem:[#allocation2 + $0x10] sm:$0x1] %v59_v59  ;;  %v336_v34 = vshll.u32 %v268_v13, 16  ;;  %v341_v31 = vshrl.u32 %v269_v30, 16  ;;  %v344_v38 = vshll.u32 %v269_v30, 16 }
  0xad   :  { %2563 = vrot.lane.b32.xlu0 %v2551_v3, %s3533_s4  ;;  %v2741_v20 = vpack.c.b16 %v3792_v6, %v3714_v40  ;;  %v1445_v49 = vld [vmem:[#allocation2 + $0x174] sm:$0x1]  ;;  %v2291_v14 = vrot.slane %v2290_v8, 4  ;;  %v335_v29 = vrot.slane %v333_v11, 7  ;;  %v5138_v42 = vunpack.c.l.b16 %v3862_v22  ;;  %v1321_v33 = vld [vmem:[#allocation2 + $0x20c] sm:$0x1] }
  0xae   :  { %v2293_v23 = vshll.u32 %v1445_v49, 16  ;;  %v2304_v41 = vor.u32 %v2303_v26, %v2300_v53  ;;  %v343_v39 = vrot.slane %v341_v31, 7  ;;  %v1027_v45 = vld [vmem:[#allocation2 + $0x54] sm:$0x1]  ;;  %v2469_v46 = vunpack.c.l.b16 %v3989_v36  ;;  %v1033_v6 = vld [vmem:[#allocation2 + $0x5c] sm:$0x1] }
  0xaf   :  { %v1447_v13 = vld [vmem:[#allocation2 + $0x17c] sm:$0x1]  ;;  %v338_v43 = vor.u32 %v336_v34, %v335_v29  ;;  %v339_v50 = vrot.slane %v335_v29, 4  ;;  %v1322_v40 = vsel %vm3570_vm2, %v795_v62, %v1321_v33  ;;  %v1870_v11 = vor.u32 %v4093_v52, %v4043_v32 }
  0xb0   :  { %v3410_v57 = vld [vmem:[#allocation2 + $0x50] sm:$0xf]  ;;  %v2295_v30 = vrot.slane %v2293_v23, 5  ;;  %v2305_v53 = vrot.slane %v2304_v41, 4  ;;  %v2307_v60 = vshll.u32 %v1447_v13, 16  ;;  %v346_v63 = vor.u32 %v344_v38, %v343_v39 }
  0xb1   :  { %v3456_v3 = vld [vmem:[#allocation2 + $0x54] sm:$0xf0]  ;;  %v347_v8 = vrot.slane %v343_v39, 4  ;;  %v980_v59 = vsel %vm3570_vm2, %v339_v50, %v979_v10  ;;  %1323 = vst [vmem:[#allocation2 + $0x20c] sm:$0x1] %v1322_v40  ;;  %v403_v54 = vrot.slane %v4059_v56, 4 }
  0xb2   :  { %v3411_v26 = vor.u32 %v3456_v3, %v3410_v57  ;;  %2753 = vrot.lane.b32.xlu2 %v2741_v20, %s3536_s27  ;;  %v2296_v62 = vsel %vm3651_vm8, %v2291_v14, %v2295_v30  ;;  %v2309_v34 = vrot.slane %v2307_v60, 5  ;;  %v976_v31 = vld [vmem:[#allocation2 + $0x8] sm:$0xf]  ;;  %981 = vst [vmem:[#allocation2 + $0xc] sm:$0x1] %v980_v59  ;;  %v411_v38 = vrot.slane %v4065_v12, 4 }
  0xb3   :  { %v2675_v49 = vunpack.c.l.b16 %v2296_v62  ;;  %v977_v29 = vsel %vm3602_vm5, %v338_v43, %v976_v31  ;;  %v982_v10 = vld [vmem:[#allocation2 + $0x10] sm:$0xf]  ;;  %v986_v32 = vsel %vm3570_vm2, %v347_v8, %v985_v44  ;;  %v1028_v56 = vsel %vm3570_vm2, %v403_v54, %v1027_v45  ;;  %v1378_v20 = vld [vmem:[#allocation2 + $0x58] sm:$0xf] }
  0xb4   :  { %v1376_v52 = vld [vmem:[#allocation2 + $0x50] sm:$0xf]  ;;  %2611 = vrot.lane.b32.xlu1 %v3411_v26, %s3531_s24  ;;  %v2310_v14 = vsel %vm3651_vm8, %v2305_v53, %v2309_v34  ;;  %978 = vst [vmem:[#allocation2 + $0x8] sm:$0xf] %v977_v29  ;;  %v983_v12 = vsel %vm3602_vm5, %v346_v63, %v982_v10  ;;  %v1034_v23 = vsel %vm3570_vm2, %v411_v38, %v1033_v6  ;;  %v2186_v45 = vshrl.u32 %v1378_v20, 16 }
  0xb5   :  { %v2172_v41 = vshrl.u32 %v1376_v52, 16  ;;  %v202_v39 = vld [vmem:[#allocation2 + $0x190] sm:$0x1]  ;;  %v2676_v44 = vunpack.c.l.b16 %v2310_v14  ;;  %984 = vst [vmem:[#allocation2 + $0x10] sm:$0xf] %v983_v12  ;;  %v2175_v33 = vshll.u32 %v1376_v52, 16  ;;  %v2711_v6 = vpack.c.b16 %v2469_v46, %v5138_v42 }
  0xb6   :  { %v2189_v13 = vshll.u32 %v1378_v20, 16  ;;  %987 = vst [vmem:[#allocation2 + $0x14] sm:$0x1] %v986_v32  ;;  %v203_v50 = vsel %vm3570_vm2, 0, %v202_v39  ;;  %v205_v40 = vld [vmem:[#allocation2 + $0x198] sm:$0x1] }
  0xb7   :  { %v2174_v43 = vrot.slane %v2172_v41, 4  ;;  %v2687_v57 = vpack.c.b16 %v2676_v44, %v2675_v49  ;;  %1029 = vst [vmem:[#allocation2 + $0x54] sm:$0x1] %v1028_v56  ;;  %v2177_v30 = vrot.slane %v2175_v33, 5  ;;  %v2188_v53 = vrot.slane %v2186_v45, 4 }
  0xb8   :  { %v2191_v60 = vrot.slane %v2189_v13, 5  ;;  %v1483_v63 = vld [vmem:[#allocation2 + $0x20c] sm:$0x1]  ;;  %1035 = vst [vmem:[#allocation2 + $0x5c] sm:$0x1] %v1034_v23  ;;  %v206_v3 = vsel %vm3570_vm2, 0, %v205_v40  ;;  %v2763_v44 = vpack.c.b16 %v4018_v48, %v3899_v18 }
  0xb9   :  { %2699 = vrot.lane.b32.xlu0 %v2687_v57, %s3537_s28  ;;  %v1361_v8 = vld [vmem:[#allocation2 + $0xc] sm:$0x1]  ;;  %v1871_v59 = vrot.slane %v1870_v11, 4  ;;  %v1873_v54 = vshll.u32 %v1483_v63, 16  ;;  %v2178_v26 = vor.u32 %v2177_v30, %v2174_v43  ;;  %204 = vst [vmem:[#allocation2 + $0x190] sm:$0x1] %v203_v50 }
  0xba   :  { %v2192_v62 = vor.u32 %v2191_v60, %v2188_v53  ;;  %v1957_v34 = vshll.u32 %v1361_v8, 16  ;;  %207 = vst [vmem:[#allocation2 + $0x198] sm:$0x1] %v206_v3  ;;  %v312_v31 = vld [vmem:[%s5130_s0 + $0xb0] sm:$0xf] }
  0xbb   :  { %v1360_v38 = vld [vmem:[#allocation2 + $0x8] sm:$0xf]  ;;  %v1875_v49 = vrot.slane %v1873_v54, 5  ;;  %v2179_v29 = vrot.slane %v2178_v26, 4  ;;  %v685_v32 = vshrl.u32 %v312_v31, 16  ;;  %v688_v14 = vshll.u32 %v312_v31, 16 }
  0xbc   :  { %v2193_v10 = vrot.slane %v2192_v62, 4  ;;  %2719 = vrot.lane.b32.xlu1 %v2711_v6, %s3534_s16  ;;  %v1362_v56 = vld [vmem:[#allocation2 + $0x10] sm:$0xf]  ;;  %v1948_v52 = vshrl.u32 %v1360_v38, 16  ;;  %v1951_v11 = vshll.u32 %v1360_v38, 16  ;;  %v1959_v20 = vrot.slane %v1957_v34, 5 }
  0xbd   :  { %v1363_v12 = vld [vmem:[#allocation2 + $0x14] sm:$0x1]  ;;  %v1962_v23 = vshrl.u32 %v1362_v56, 16  ;;  %v1965_v41 = vshll.u32 %v1362_v56, 16  ;;  %v1876_v39 = vsel %vm3651_vm8, %v1871_v59, %v1875_v49  ;;  %v687_v6 = vrot.slane %v685_v32, 7 }
  0xbe   :  { %v313_v33 = vld [vmem:[%s5130_s0 + $0xb4] sm:$0xf]  ;;  %v1950_v45 = vrot.slane %v1948_v52, 4  ;;  %v1953_v13 = vrot.slane %v1951_v11, 5  ;;  %v1971_v43 = vshll.u32 %v1363_v12, 16  ;;  %v4152_v50 = vunpack.c.l.b16 %v1876_v39 }
  0xbf   :  { %v1377_v40 = vld [vmem:[#allocation2 + $0x54] sm:$0x1]  ;;  %v1964_v57 = vrot.slane %v1962_v23, 4  ;;  %v1967_v30 = vrot.slane %v1965_v41, 5  ;;  %v1379_v53 = vld [vmem:[#allocation2 + $0x5c] sm:$0x1]  ;;  %v690_v62 = vor.u32 %v688_v14, %v687_v6 }
  0xc0   :  { %v2181_v60 = vshll.u32 %v1377_v40, 16  ;;  %v1954_v63 = vor.u32 %v1953_v13, %v1950_v45  ;;  %v1973_v3 = vrot.slane %v1971_v43, 5  ;;  %v2767_v18 = vpack.c.b16 %v4152_v50, %v4071_v37  ;;  %v1240_v8 = vld [vmem:[#allocation2 + $0x190] sm:$0xf]  ;;  %v1243_v59 = vld [vmem:[#allocation2 + $0x194] sm:$0x1] }
  0xc1   :  { %v2195_v48 = vshll.u32 %v1379_v53, 16  ;;  %v1968_v54 = vor.u32 %v1967_v30, %v1964_v57  ;;  %v691_v34 = vrot.slane %v687_v6, 4  ;;  %v693_v49 = vshrl.u32 %v313_v33, 16  ;;  %v253_v32 = vld [vmem:[#allocation2 + $0x218] sm:$0x1] }
  0xc2   :  { %v2183_v26 = vrot.slane %v2181_v60, 5  ;;  %v1955_v31 = vrot.slane %v1954_v63, 4  ;;  %2779 = vrot.lane.b32.xlu0 %v2767_v18, %s3538_s8  ;;  %v696_v56 = vshll.u32 %v313_v33, 16  ;;  %v1241_v37 = vsel %vm3602_vm5, %v690_v62, %v1240_v8  ;;  %v1246_v14 = vld [vmem:[#allocation2 + $0x198] sm:$0xf] }
  0xc3   :  { %v2197_v38 = vrot.slane %v2195_v48, 5  ;;  %v1969_v52 = vrot.slane %v1968_v54, 4  ;;  %v1244_v12 = vsel %vm3570_vm2, %v691_v34, %v1243_v59  ;;  %v256_v23 = vld [vmem:[#allocation2 + $0x220] sm:$0x1]  ;;  %v327_v41 = vld [vmem:[%s5130_s0 + $0xec] sm:$0xf] }
  0xc4   :  { %v2184_v11 = vsel %vm3651_vm8, %v2179_v29, %v2183_v26  ;;  %v1960_v39 = vsel %vm3651_vm8, %v1955_v31, %v1959_v20  ;;  %2771 = vrot.lane.b32.xlu1 %v2763_v44, %s3538_s8  ;;  %v695_v45 = vrot.slane %v693_v49, 7  ;;  %1242 = vst [vmem:[#allocation2 + $0x190] sm:$0xf] %v1241_v37  ;;  %v328_v13 = vld [vmem:[%s5130_s0 + $0xf0] sm:$0xf]  ;;  %v254_v20 = vsel %vm3570_vm2, 0, %v253_v32 }
  0xc5   :  { %v2198_v29 = vsel %vm3651_vm8, %v2193_v10, %v2197_v38  ;;  %v2667_v33 = vunpack.c.l.b16 %v2184_v11  ;;  %v1974_v43 = vsel %vm3651_vm8, %v1969_v52, %v1973_v3  ;;  %v2627_v40 = vunpack.c.l.b16 %v1960_v39  ;;  %1245 = vst [vmem:[#allocation2 + $0x194] sm:$0x1] %v1244_v12  ;;  %v1249_v30 = vld [vmem:[#allocation2 + $0x19c] sm:$0x1]  ;;  %v196_v62 = vld [vmem:[#allocation2 + $0x180] sm:$0x1] }
  0xc6   :  { %v2668_v57 = vunpack.c.l.b16 %v2198_v29  ;;  %v2628_v44 = vunpack.c.l.b16 %v1974_v43  ;;  %v698_v53 = vor.u32 %v696_v56, %v695_v45  ;;  %v699_v10 = vrot.slane %v695_v45, 4  ;;  %255 = vst [vmem:[#allocation2 + $0x218] sm:$0x1] %v254_v20  ;;  %v1333_v26 = vld [vmem:[#allocation2 + $0x21c] sm:$0x1] }
  0xc7   :  { %v257_v60 = vsel %vm3570_vm2, 0, %v256_v23  ;;  %v805_v63 = vshrl.u32 %v327_v41, 16  ;;  %v808_v18 = vshll.u32 %v327_v41, 16  ;;  %v813_v48 = vshrl.u32 %v328_v13, 16  ;;  %v199_v34 = vld [vmem:[#allocation2 + $0x188] sm:$0x1] }
  0xc8   :  { %v2683_v6 = vpack.c.b16 %v2668_v57, %v2667_v33  ;;  %258 = vst [vmem:[#allocation2 + $0x220] sm:$0x1] %v257_v60  ;;  %v2643_v3 = vpack.c.b16 %v2628_v44, %v2627_v40  ;;  %v1247_v8 = vsel %vm3602_vm5, %v698_v53, %v1246_v14  ;;  %v1250_v59 = vsel %vm3570_vm2, %v699_v10, %v1249_v30  ;;  %v310_v32 = vld [vmem:[%s5130_s0 + $0xa8] sm:$0xf]  ;;  %v1339_v23 = vld [vmem:[#allocation2 + $0x224] sm:$0x1] }
  0xc9   :  { %v816_v54 = vshll.u32 %v328_v13, 16  ;;  %1248 = vst [vmem:[#allocation2 + $0x198] sm:$0xf] %v1247_v8  ;;  %v807_v31 = vrot.slane %v805_v63, 7  ;;  %v815_v38 = vrot.slane %v813_v48, 7  ;;  %v197_v49 = vsel %vm3570_vm2, 0, %v196_v62 }
  0xca   :  { %2651 = vrot.lane.b32.xlu2 %v2643_v3, %s3535_s26  ;;  %2691 = vrot.lane.b32.xlu0 %v2683_v6, %s3537_s28  ;;  %1251 = vst [vmem:[#allocation2 + $0x19c] sm:$0x1] %v1250_v59  ;;  %v200_v56 = vsel %vm3570_vm2, 0, %v199_v34  ;;  %v2737_v33 = vpack.c.b16 %v3822_v5, %v3756_v0  ;;  %v669_v40 = vshrl.u32 %v310_v32, 16  ;;  %v311_v5 = vld [vmem:[%s5130_s0 + $0xac] sm:$0xf] }
  0xcb   :  { %v1452_v52 = vld [vmem:[#allocation2 + $0x190] sm:$0xf]  ;;  %v810_v11 = vor.u32 %v808_v18, %v807_v31  ;;  %v811_v37 = vrot.slane %v807_v31, 4  ;;  %v818_v12 = vor.u32 %v816_v54, %v815_v38  ;;  %v819_v14 = vrot.slane %v815_v38, 4  ;;  %198 = vst [vmem:[#allocation2 + $0x180] sm:$0x1] %v197_v49 }
  0xcc   :  { %v1453_v41 = vld [vmem:[#allocation2 + $0x194] sm:$0x1]  ;;  %v2340_v39 = vshrl.u32 %v1452_v52, 16  ;;  %v2343_v29 = vshll.u32 %v1452_v52, 16  ;;  %201 = vst [vmem:[#allocation2 + $0x188] sm:$0x1] %v200_v56 }
  0xcd   :  { %v2349_v45 = vshll.u32 %v1453_v41, 16  ;;  %v1330_v13 = vld [vmem:[#allocation2 + $0x218] sm:$0xf]  ;;  %v1334_v43 = vsel %vm3570_vm2, %v811_v37, %v1333_v26  ;;  %v1340_v53 = vsel %vm3570_vm2, %v819_v14, %v1339_v23  ;;  %v4206_v10 = vrot.slane %v669_v40, 7  ;;  %v3434_v59 = vld [vmem:[#allocation2 + $0x190] sm:$0xf] }
  0xce   :  { %v2342_v57 = vrot.slane %v2340_v39, 4  ;;  %v2345_v30 = vrot.slane %v2343_v29, 5  ;;  %v1331_v20 = vsel %vm3602_vm5, %v810_v11, %v1330_v13  ;;  %1335 = vst [vmem:[#allocation2 + $0x21c] sm:$0x1] %v1334_v43  ;;  %v672_v60 = vshll.u32 %v310_v32, 16 }
  0xcf   :  { %v1336_v44 = vld [vmem:[#allocation2 + $0x220] sm:$0xf]  ;;  %1332 = vst [vmem:[#allocation2 + $0x218] sm:$0xf] %v1331_v20  ;;  %v2351_v18 = vrot.slane %v2349_v45, 5  ;;  %v677_v31 = vshrl.u32 %v311_v5, 16 }
  0xd0   :  { %v1337_v0 = vsel %vm3602_vm5, %v818_v12, %v1336_v44  ;;  %v1454_v6 = vld [vmem:[#allocation2 + $0x198] sm:$0xf]  ;;  %v2346_v63 = vor.u32 %v2345_v30, %v2342_v57  ;;  %1341 = vst [vmem:[#allocation2 + $0x224] sm:$0x1] %v1340_v53  ;;  %v674_v26 = vor.u32 %v672_v60, %v4206_v10  ;;  %v680_v38 = vshll.u32 %v311_v5, 16 }
  0xd1   :  { %1338 = vst [vmem:[#allocation2 + $0x220] sm:$0xf] %v1337_v0  ;;  %v1455_v48 = vld [vmem:[#allocation2 + $0x19c] sm:$0x1]  ;;  %v2354_v3 = vshrl.u32 %v1454_v6, 16  ;;  %v2357_v8 = vshll.u32 %v1454_v6, 16 }
  0xd2   :  { %v3462_v54 = vld [vmem:[#allocation2 + $0x194] sm:$0xf0]  ;;  %2745 = vrot.lane.b32.xlu2 %v2737_v33, %s3536_s27  ;;  %v2347_v62 = vrot.slane %v2346_v63, 4  ;;  %v2363_v34 = vshll.u32 %v1455_v48, 16  ;;  %v250_v49 = vld [vmem:[#allocation2 + $0x210] sm:$0x1] }
  0xd3   :  { %v2356_v56 = vrot.slane %v2354_v3, 4  ;;  %v2359_v32 = vrot.slane %v2357_v8, 5  ;;  %v1228_v52 = vld [vmem:[#allocation2 + $0x180] sm:$0xf]  ;;  %v251_v11 = vsel %vm3570_vm2, 0, %v250_v49  ;;  %v4214_v14 = vrot.slane %v677_v31, 7 }
  0xd4   :  { %v2352_v37 = vsel %vm3651_vm8, %v2347_v62, %v2351_v18  ;;  %v2365_v12 = vrot.slane %v2363_v34, 5  ;;  %v1229_v23 = vsel %vm3602_vm5, %v674_v26, %v1228_v52  ;;  %v1234_v41 = vld [vmem:[#allocation2 + $0x188] sm:$0xf]  ;;  %252 = vst [vmem:[#allocation2 + $0x210] sm:$0x1] %v251_v11  ;;  %v3435_v13 = vor.u32 %v3462_v54, %v3434_v59 }
  0xd5   :  { %v2360_v39 = vor.u32 %v2359_v32, %v2356_v56  ;;  %v1487_v29 = vld [vmem:[#allocation2 + $0x21c] sm:$0x1]  ;;  %1230 = vst [vmem:[#allocation2 + $0x180] sm:$0xf] %v1229_v23  ;;  %v326_v33 = vld [vmem:[%s5130_s0 + $0xe8] sm:$0xf]  ;;  %v2679_v45 = vunpack.c.l.b16 %v2352_v37  ;;  %v682_v40 = vor.u32 %v680_v38, %v4214_v14 }
  0xd6   :  { %v4221_v43 = vld [vmem:[#allocation2 + $0x218] sm:$0xf]  ;;  %v797_v57 = vshrl.u32 %v326_v33, 16  ;;  %v1901_v0 = vshll.u32 %v1487_v29, 16  ;;  %v800_v18 = vshll.u32 %v326_v33, 16 }
  0xd7   :  { %v2361_v30 = vrot.slane %v2360_v39, 4  ;;  %v1892_v44 = vshrl.u32 %v4221_v43, 16  ;;  %v1895_v53 = vshll.u32 %v4221_v43, 16  ;;  %v1489_v5 = vld [vmem:[#allocation2 + $0x224] sm:$0x1]  ;;  %v1235_v63 = vsel %vm3602_vm5, %v682_v40, %v1234_v41 }
  0xd8   :  { %v4224_v20 = vld [vmem:[#allocation2 + $0x220] sm:$0xf]  ;;  %v1915_v59 = vshll.u32 %v1489_v5, 16  ;;  %1236 = vst [vmem:[#allocation2 + $0x188] sm:$0xf] %v1235_v63  ;;  %v799_v34 = vrot.slane %v797_v57, 7 }
  0xd9   :  { %v1906_v60 = vshrl.u32 %v4224_v20, 16  ;;  %v1909_v6 = vshll.u32 %v4224_v20, 16  ;;  %v2366_v48 = vsel %vm3651_vm8, %v2361_v30, %v2365_v12  ;;  %v1894_v3 = vrot.slane %v1892_v44, 4  ;;  %v1327_v31 = vld [vmem:[#allocation2 + $0x214] sm:$0x1] }
  0xda   :  { %v1897_v8 = vrot.slane %v1895_v53, 5  ;;  %v2680_v54 = vunpack.c.l.b16 %v2366_v48  ;;  %2623 = vrot.lane.b32.xlu2 %v3435_v13, %s3531_s24  ;;  %v1903_v49 = vrot.slane %v1901_v0, 5  ;;  %v1917_v56 = vrot.slane %v1915_v59, 5  ;;  %v175_v52 = vld [vmem:[#allocation2 + $0x148] sm:$0x1] }
  0xdb   :  { %v1908_v26 = vrot.slane %v1906_v60, 4  ;;  %v1911_v62 = vrot.slane %v1909_v6, 5  ;;  %v1324_v32 = vld [vmem:[#allocation2 + $0x210] sm:$0xf]  ;;  %v802_v23 = vor.u32 %v800_v18, %v799_v34  ;;  %v803_v12 = vrot.slane %v799_v34, 4 }
  0xdc   :  { %v1898_v38 = vor.u32 %v1897_v8, %v1894_v3  ;;  %v2689_v11 = vpack.c.b16 %v2680_v54, %v2679_v45  ;;  %v178_v41 = vld [vmem:[#allocation2 + $0x150] sm:$0x1]  ;;  %v176_v29 = vsel %vm3570_vm2, 0, %v175_v52  ;;  %v305_v30 = vld [vmem:[%s5130_s0 + $0x94] sm:$0xf] }
  0xdd   :  { %v1912_v37 = vor.u32 %v1911_v62, %v1908_v26  ;;  %v179_v33 = vsel %vm3570_vm2, 0, %v178_v41  ;;  %v304_v13 = vld [vmem:[%s5130_s0 + $0x90] sm:$0xf]  ;;  %v1325_v45 = vsel %vm3602_vm5, %v802_v23, %v1324_v32  ;;  %v1328_v57 = vsel %vm3570_vm2, %v803_v12, %v1327_v31  ;;  %177 = vst [vmem:[#allocation2 + $0x148] sm:$0x1] %v176_v29 }
  0xde   :  { %v1899_v39 = vrot.slane %v1898_v38, 4  ;;  %2703 = vrot.lane.b32.xlu1 %v2689_v11, %s3537_s28  ;;  %v621_v44 = vshrl.u32 %v304_v13, 16  ;;  %v3430_v0 = vld [vmem:[#allocation2 + $0x180] sm:$0xf]  ;;  %1326 = vst [vmem:[#allocation2 + $0x210] sm:$0xf] %v1325_v45 }
  0xdf   :  { %v1913_v40 = vrot.slane %v1912_v37, 4  ;;  %v624_v5 = vshll.u32 %v304_v13, 16  ;;  %v629_v60 = vshrl.u32 %v305_v30, 16  ;;  %v3461_v18 = vld [vmem:[#allocation2 + $0x184] sm:$0xf0]  ;;  %v632_v59 = vshll.u32 %v305_v30, 16 }
  0xe0   :  { %v1904_v53 = vsel %vm3651_vm8, %v1899_v39, %v1903_v49  ;;  %1329 = vst [vmem:[#allocation2 + $0x214] sm:$0x1] %v1328_v57  ;;  %v623_v48 = vrot.slane %v621_v44, 7  ;;  %v1195_v54 = vld [vmem:[#allocation2 + $0x14c] sm:$0x1]  ;;  %v3431_v26 = vor.u32 %v3461_v18, %v3430_v0 }
  0xe1   :  { %v1918_v6 = vsel %vm3651_vm8, %v1913_v40, %v1917_v56  ;;  %v4254_v63 = vunpack.c.l.b16 %v1904_v53  ;;  %180 = vst [vmem:[#allocation2 + $0x150] sm:$0x1] %v179_v33  ;;  %v631_v8 = vrot.slane %v629_v60, 7  ;;  %v1201_v31 = vld [vmem:[#allocation2 + $0x154] sm:$0x1] }
  0xe2   :  { %v4256_v3 = vunpack.c.l.b16 %v1918_v6  ;;  %v626_v62 = vor.u32 %v624_v5, %v623_v48  ;;  %v627_v34 = vrot.slane %v623_v48, 4  ;;  %v259_v38 = vld [vmem:[#allocation2 + $0x228] sm:$0x1]  ;;  %v329_v52 = vld [vmem:[%s5130_s0 + $0xf4] sm:$0xf] }
  0xe3   :  { %v635_v56 = vrot.slane %v631_v8, 4  ;;  %v260_v32 = vsel %vm3570_vm2, 0, %v259_v38  ;;  %v821_v37 = vshrl.u32 %v329_v52, 16  ;;  %v824_v23 = vshll.u32 %v329_v52, 16  ;;  %v67_v12 = vld [vmem:[#allocation2 + $0x28] sm:$0x1] }
  0xe4   :  { %v2553_v49 = vpack.c.b16 %v4256_v3, %v4254_v63  ;;  %v1196_v11 = vsel %vm3570_vm2, %v627_v34, %v1195_v54  ;;  %261 = vst [vmem:[#allocation2 + $0x228] sm:$0x1] %v260_v32  ;;  %v634_v41 = vor.u32 %v632_v59, %v631_v8  ;;  %v1192_v39 = vld [vmem:[#allocation2 + $0x148] sm:$0xf]  ;;  %v1345_v33 = vld [vmem:[#allocation2 + $0x22c] sm:$0x1] }
  0xe5   :  { %1197 = vst [vmem:[#allocation2 + $0x14c] sm:$0x1] %v1196_v11  ;;  %v1202_v29 = vsel %vm3570_vm2, %v635_v56, %v1201_v31  ;;  %v68_v13 = vsel %vm3570_vm2, 0, %v67_v12  ;;  %v4273_v40 = vld [vmem:[#allocation2 + $0x210] sm:$0xf]  ;;  %v1193_v45 = vsel %vm3602_vm5, %v626_v62, %v1192_v39  ;;  %v823_v57 = vrot.slane %v821_v37, 7 }
  0xe6   :  { %2567 = vrot.lane.b32.xlu0 %v2553_v49, %s3533_s4  ;;  %2621 = vrot.lane.b32.xlu1 %v3431_v26, %s3531_s24  ;;  %1203 = vst [vmem:[#allocation2 + $0x154] sm:$0x1] %v1202_v29  ;;  %v1878_v44 = vshrl.u32 %v4273_v40, 16  ;;  %v1881_v53 = vshll.u32 %v4273_v40, 16  ;;  %v70_v59 = vld [vmem:[#allocation2 + $0x30] sm:$0x1] }
  0xe7   :  { %v1485_v30 = vld [vmem:[#allocation2 + $0x214] sm:$0x1]  ;;  %1194 = vst [vmem:[#allocation2 + $0x148] sm:$0xf] %v1193_v45  ;;  %v826_v60 = vor.u32 %v824_v23, %v823_v57  ;;  %v827_v6 = vrot.slane %v823_v57, 4  ;;  %v71_v34 = vsel %vm3570_vm2, 0, %v70_v59 }
  0xe8   :  { %v1887_v0 = vshll.u32 %v1485_v30, 16  ;;  %v1198_v5 = vld [vmem:[#allocation2 + $0x150] sm:$0xf]  ;;  %69 = vst [vmem:[#allocation2 + $0x28] sm:$0x1] %v68_v13  ;;  %v1880_v18 = vrot.slane %v1878_v44, 4 }
  0xe9   :  { %v1883_v48 = vrot.slane %v1881_v53, 5  ;;  %v1199_v8 = vsel %vm3602_vm5, %v634_v41, %v1198_v5  ;;  %v272_v54 = vld [vmem:[%s5130_s0 + $0x10] sm:$0xf]  ;;  %v1346_v62 = vsel %vm3570_vm2, %v827_v6, %v1345_v33  ;;  %v273_v31 = vld [vmem:[%s5130_s0 + $0x14] sm:$0xf] }
  0xea   :  { %v1889_v26 = vrot.slane %v1887_v0, 5  ;;  %1200 = vst [vmem:[#allocation2 + $0x150] sm:$0xf] %v1199_v8  ;;  %v365_v56 = vshrl.u32 %v272_v54, 16  ;;  %v368_v32 = vshll.u32 %v272_v54, 16  ;;  %v373_v37 = vshrl.u32 %v273_v31, 16 }
  0xeb   :  { %v1884_v38 = vor.u32 %v1883_v48, %v1880_v18  ;;  %v1342_v49 = vld [vmem:[#allocation2 + $0x228] sm:$0xf]  ;;  %1347 = vst [vmem:[#allocation2 + $0x22c] sm:$0x1] %v1346_v62  ;;  %v376_v23 = vshll.u32 %v273_v31, 16 }
  0xec   :  { %v1437_v52 = vld [vmem:[#allocation2 + $0x14c] sm:$0x1]  ;;  %v1343_v11 = vsel %vm3602_vm5, %v826_v60, %v1342_v49  ;;  %72 = vst [vmem:[#allocation2 + $0x30] sm:$0x1] %v71_v34  ;;  %v367_v33 = vrot.slane %v365_v56, 7  ;;  %v375_v13 = vrot.slane %v373_v37, 7 }
  0xed   :  { %v1885_v12 = vrot.slane %v1884_v38, 4  ;;  %v1439_v41 = vld [vmem:[#allocation2 + $0x154] sm:$0x1]  ;;  %v2125_v39 = vshll.u32 %v1437_v52, 16  ;;  %1344 = vst [vmem:[#allocation2 + $0x228] sm:$0xf] %v1343_v11 }
  0xee   :  { %v1436_v29 = vld [vmem:[#allocation2 + $0x148] sm:$0xf]  ;;  %v2139_v44 = vshll.u32 %v1439_v41, 16  ;;  %v370_v60 = vor.u32 %v368_v32, %v367_v33  ;;  %v371_v6 = vrot.slane %v367_v33, 4  ;;  %v1003_v18 = vld [vmem:[#allocation2 + $0x2c] sm:$0x1]  ;;  %v378_v62 = vor.u32 %v376_v23, %v375_v13 }
  0xef   :  { %v1890_v45 = vsel %vm3651_vm8, %v1885_v12, %v1889_v26  ;;  %v2116_v57 = vshrl.u32 %v1436_v29, 16  ;;  %v2119_v30 = vshll.u32 %v1436_v29, 16  ;;  %v1000_v53 = vld [vmem:[#allocation2 + $0x28] sm:$0xf]  ;;  %v2127_v5 = vrot.slane %v2125_v39, 5 }
  0xf0   :  { %v4295_v0 = vunpack.c.l.b16 %v1890_v45  ;;  %v1009_v48 = vld [vmem:[#allocation2 + $0x34] sm:$0x1]  ;;  %v379_v34 = vrot.slane %v375_v13, 4  ;;  %v1001_v56 = vsel %vm3602_vm5, %v370_v60, %v1000_v53  ;;  %v94_v52 = vld [vmem:[#allocation2 + $0x70] sm:$0x1]  ;;  %v1004_v37 = vsel %vm3570_vm2, %v371_v6, %v1003_v18 }
  0xf1   :  { %v1438_v8 = vld [vmem:[#allocation2 + $0x150] sm:$0xf]  ;;  %v2118_v59 = vrot.slane %v2116_v57, 4  ;;  %v2121_v54 = vrot.slane %v2119_v30, 5  ;;  %1002 = vst [vmem:[#allocation2 + $0x28] sm:$0xf] %v1001_v56 }
  0xf2   :  { %v2552_v31 = vpack.c.b16 %v4295_v0, %v4152_v50  ;;  %v2130_v26 = vshrl.u32 %v1438_v8, 16  ;;  %v2133_v38 = vshll.u32 %v1438_v8, 16  ;;  %v1491_v49 = vld [vmem:[#allocation2 + $0x22c] sm:$0x1]  ;;  %v1010_v23 = vsel %vm3570_vm2, %v379_v34, %v1009_v48  ;;  %1005 = vst [vmem:[#allocation2 + $0x2c] sm:$0x1] %v1004_v37 }
  0xf3   :  { %v2122_v11 = vor.u32 %v2121_v54, %v2118_v59  ;;  %v1929_v32 = vshll.u32 %v1491_v49, 16  ;;  %v1006_v12 = vld [vmem:[#allocation2 + $0x30] sm:$0xf]  ;;  %v2141_v30 = vrot.slane %v2139_v44, 5  ;;  %1011 = vst [vmem:[#allocation2 + $0x34] sm:$0x1] %v1010_v23  ;;  %v2480_v44 = vunpack.c.l.b16 %v4224_v20 }
  0xf4   :  { %2565 = vrot.lane.b32.xlu2 %v2552_v31, %s3533_s4  ;;  %v2132_v50 = vrot.slane %v2130_v26, 4  ;;  %v2135_v41 = vrot.slane %v2133_v38, 5  ;;  %v4306_v39 = vld [vmem:[#allocation2 + $0x228] sm:$0xf]  ;;  %v1007_v29 = vsel %vm3602_vm5, %v378_v62, %v1006_v12  ;;  %v95_v53 = vsel %vm3570_vm2, 0, %v94_v52 }
  0xf5   :  { %v2123_v33 = vrot.slane %v2122_v11, 4  ;;  %v1920_v13 = vshrl.u32 %v4306_v39, 16  ;;  %v1923_v45 = vshll.u32 %v4306_v39, 16  ;;  %1008 = vst [vmem:[#allocation2 + $0x30] sm:$0xf] %v1007_v29  ;;  %v1931_v54 = vrot.slane %v1929_v32, 5 }
  0xf6   :  { %v2136_v57 = vor.u32 %v2135_v41, %v2132_v50  ;;  %v97_v60 = vld [vmem:[#allocation2 + $0x78] sm:$0x1]  ;;  %96 = vst [vmem:[#allocation2 + $0x70] sm:$0x1] %v95_v53  ;;  %v2743_v62 = vpack.c.b16 %v3858_v15, %v3919_v25  ;;  %v280_v34 = vld [vmem:[%s5130_s0 + $0x30] sm:$0xf]  ;;  %v5136_v29 = vunpack.c.l.b16 %v4306_v39 }
  0xf7   :  { %v2128_v6 = vsel %vm3651_vm8, %v2123_v33, %v2127_v5  ;;  %v1922_v18 = vrot.slane %v1920_v13, 4  ;;  %v1925_v48 = vrot.slane %v1923_v45, 5  ;;  %v98_v8 = vsel %vm3570_vm2, 0, %v97_v60  ;;  %v281_v26 = vld [vmem:[%s5130_s0 + $0x34] sm:$0xf] }
  0xf8   :  { %v2137_v59 = vrot.slane %v2136_v57, 4  ;;  %99 = vst [vmem:[#allocation2 + $0x78] sm:$0x1] %v98_v8  ;;  %v2639_v31 = vunpack.c.l.b16 %v2128_v6  ;;  %v429_v38 = vshrl.u32 %v280_v34, 16  ;;  %v432_v49 = vshll.u32 %v280_v34, 16 }
  0xf9   :  { %v1926_v5 = vor.u32 %v1925_v48, %v1922_v18  ;;  %v169_v56 = vld [vmem:[#allocation2 + $0x138] sm:$0x1]  ;;  %v1368_v15 = vld [vmem:[#allocation2 + $0x28] sm:$0xf]  ;;  %v437_v25 = vshrl.u32 %v281_v26, 16  ;;  %v440_v11 = vshll.u32 %v281_v26, 16 }
  0xfa   :  { %v2142_v52 = vsel %vm3651_vm8, %v2137_v59, %v2141_v30  ;;  %v170_v32 = vsel %vm3570_vm2, 0, %v169_v56  ;;  %v1369_v23 = vld [vmem:[#allocation2 + $0x2c] sm:$0x1]  ;;  %v2004_v50 = vshrl.u32 %v1368_v15, 16  ;;  %v2007_v41 = vshll.u32 %v1368_v15, 16 }
  0xfb   :  { %v2640_v37 = vunpack.c.l.b16 %v2142_v52  ;;  %v1927_v12 = vrot.slane %v1926_v5, 4  ;;  %v2013_v13 = vshll.u32 %v1369_v23, 16  ;;  %v4333_v45 = vrot.slane %v429_v38, 7  ;;  %v1371_v60 = vld [vmem:[#allocation2 + $0x34] sm:$0x1] }
  0xfc   :  { %2757 = vrot.lane.b32.xlu2 %v2743_v62, %s3536_s27  ;;  %v1370_v33 = vld [vmem:[#allocation2 + $0x30] sm:$0xf]  ;;  %v4335_v57 = vrot.slane %v437_v25, 7  ;;  %v2006_v6 = vrot.slane %v2004_v50, 4  ;;  %v2009_v18 = vrot.slane %v2007_v41, 5  ;;  %v2027_v26 = vshll.u32 %v1371_v60, 16  ;;  %v4358_v50 = vpop.permute.xlu2 %2523 }
  0xfd   :  { %v2649_v30 = vpack.c.b16 %v2640_v37, %v2639_v31  ;;  %v1932_v53 = vsel %vm3651_vm8, %v1927_v12, %v1931_v54  ;;  %171 = vst [vmem:[#allocation2 + $0x138] sm:$0x1] %v170_v32  ;;  %v2015_v8 = vrot.slane %v2013_v13, 5  ;;  %v2018_v59 = vshrl.u32 %v1370_v33, 16  ;;  %v1048_v34 = vld [vmem:[#allocation2 + $0x70] sm:$0xf] }
  0xfe   :  { %v4339_v48 = vunpack.c.l.b16 %v1932_v53  ;;  %v2021_v62 = vshll.u32 %v1370_v33, 16  ;;  %v2010_v5 = vor.u32 %v2009_v18, %v2006_v6  ;;  %v434_v38 = vor.u32 %v432_v49, %v4333_v45  ;;  %v172_v54 = vld [vmem:[#allocation2 + $0x140] sm:$0x1]  ;;  %v302_v37 = vld [vmem:[%s5130_s0 + $0x88] sm:$0xf] }
  0xff   :  { %2663 = vrot.lane.b32.xlu0 %v2649_v30, %s3535_s26  ;;  %v442_v31 = vor.u32 %v440_v11, %v4335_v57  ;;  %v1054_v56 = vld [vmem:[#allocation2 + $0x78] sm:$0xf]  ;;  %v2020_v15 = vrot.slane %v2018_v59, 4  ;;  %v173_v32 = vsel %vm3570_vm2, 0, %v172_v54  ;;  %v2029_v23 = vrot.slane %v2027_v26, 5 }
 0x100   :  { %v2769_v52 = vpack.c.b16 %v4339_v48, %v4256_v3  ;;  %v2023_v25 = vrot.slane %v2021_v62, 5  ;;  %v2011_v12 = vrot.slane %v2010_v5, 4  ;;  %v1049_v49 = vsel %vm3602_vm5, %v434_v38, %v1048_v34  ;;  %174 = vst [vmem:[#allocation2 + $0x140] sm:$0x1] %v173_v32  ;;  %v303_v3 = vld [vmem:[%s5130_s0 + $0x8c] sm:$0xf] }
 0x101   :  { %v1055_v11 = vsel %vm3602_vm5, %v442_v31, %v1054_v56  ;;  %1050 = vst [vmem:[#allocation2 + $0x70] sm:$0xf] %v1049_v49  ;;  %v605_v33 = vshrl.u32 %v302_v37, 16  ;;  %v608_v13 = vshll.u32 %v302_v37, 16  ;;  %v613_v30 = vshrl.u32 %v303_v3, 16 }
 0x102   :  { %2783 = vrot.lane.b32.xlu1 %v2769_v52, %s3538_s8  ;;  %v2024_v41 = vor.u32 %v2023_v25, %v2020_v15  ;;  %v2717_v53 = vpack.c.b16 %v5136_v29, %v2480_v44  ;;  %v2016_v60 = vsel %vm3651_vm8, %v2011_v12, %v2015_v8  ;;  %1056 = vst [vmem:[#allocation2 + $0x78] sm:$0xf] %v1055_v11  ;;  %v616_v6 = vshll.u32 %v303_v3, 16  ;;  %v1183_v5 = vld [vmem:[#allocation2 + $0x13c] sm:$0x1] }
 0x103   :  { %v675_v18 = vrot.slane %v4206_v10, 4  ;;  %v607_v62 = vrot.slane %v605_v33, 7  ;;  %v615_v34 = vrot.slane %v613_v30, 7  ;;  %v683_v26 = vrot.slane %v4214_v14, 4  ;;  %v1189_v56 = vld [vmem:[#allocation2 + $0x144] sm:$0x1] }
 0x104   :  { %v2025_v59 = vrot.slane %v2024_v41, 4  ;;  %v2631_v38 = vunpack.c.l.b16 %v2016_v60  ;;  %v1180_v31 = vld [vmem:[#allocation2 + $0x138] sm:$0xf]  ;;  %v1231_v54 = vld [vmem:[#allocation2 + $0x184] sm:$0x1]  ;;  %v2479_v33 = vunpack.c.l.b16 %v4221_v43 }
 0x105   :  { %v610_v15 = vor.u32 %v608_v13, %v607_v62  ;;  %v611_v25 = vrot.slane %v607_v62, 4  ;;  %v618_v8 = vor.u32 %v616_v6, %v615_v34  ;;  %v1237_v32 = vld [vmem:[#allocation2 + $0x18c] sm:$0x1]  ;;  %v1448_v37 = vld [vmem:[#allocation2 + $0x180] sm:$0xf]  ;;  %v619_v12 = vrot.slane %v615_v34, 4 }
 0x106   :  { %v2030_v52 = vsel %vm3651_vm8, %v2025_v59, %v2029_v23  ;;  %v1450_v49 = vld [vmem:[#allocation2 + $0x188] sm:$0xf]  ;;  %v88_v11 = vld [vmem:[#allocation2 + $0x60] sm:$0x1]  ;;  %v2478_v23 = vunpack.c.l.b16 %v4273_v40  ;;  %v2312_v62 = vshrl.u32 %v1448_v37, 16 }
 0x107   :  { %2731 = vrot.lane.b32.xlu0 %v2717_v53, %s3534_s16  ;;  %v2632_v10 = vunpack.c.l.b16 %v2030_v52  ;;  %v1181_v14 = vsel %vm3602_vm5, %v610_v15, %v1180_v31  ;;  %v1184_v3 = vsel %vm3570_vm2, %v611_v25, %v1183_v5  ;;  %v1186_v41 = vld [vmem:[#allocation2 + $0x140] sm:$0xf]  ;;  %v91_v13 = vld [vmem:[#allocation2 + $0x68] sm:$0x1]  ;;  %v4384_v53 = vld [vmem:[%s5130_s0 + $0x2c] sm:$0xf]  ;;  %v1190_v40 = vsel %vm3570_vm2, %v619_v12, %v1189_v56  ;;  %v2526_v12 = vpop.permute.xlu2 %2525 }
 0x108   :  { %v278_v30 = vld [vmem:[%s5130_s0 + $0x28] sm:$0xf]  ;;  %v3418_v6 = vld [vmem:[#allocation2 + $0x70] sm:$0xf]  ;;  %1182 = vst [vmem:[#allocation2 + $0x138] sm:$0xf] %v1181_v14  ;;  %v1187_v59 = vsel %vm3602_vm5, %v618_v8, %v1186_v41  ;;  %v1232_v5 = vsel %vm3570_vm2, %v675_v18, %v1231_v54  ;;  %v5145_v15 = vunpack.c.l.b16 %v4033_v2  ;;  %v1238_v8 = vsel %vm3570_vm2, %v683_v26, %v1237_v32 }
 0x109   :  { %v2645_v60 = vpack.c.b16 %v2632_v10, %v2631_v38  ;;  %v3458_v34 = vld [vmem:[#allocation2 + $0x74] sm:$0xf0]  ;;  %1185 = vst [vmem:[#allocation2 + $0x13c] sm:$0x1] %v1184_v3  ;;  %v2315_v31 = vshll.u32 %v1448_v37, 16  ;;  %v2326_v52 = vshrl.u32 %v1450_v49, 16 }
 0x10a   :  { %v2488_v25 = vpack.c.b16 %v2478_v23, %v5145_v15  ;;  %v3419_v38 = vor.u32 %v3458_v34, %v3418_v6  ;;  %1188 = vst [vmem:[#allocation2 + $0x140] sm:$0xf] %v1187_v59  ;;  %v2314_v10 = vrot.slane %v2312_v62, 4  ;;  %v2329_v56 = vshll.u32 %v1450_v49, 16  ;;  %v1051_v59 = vld [vmem:[#allocation2 + $0x74] sm:$0x1] }
 0x10b   :  { %2655 = vrot.lane.b32.xlu1 %v2645_v60, %s3535_s26  ;;  %1191 = vst [vmem:[#allocation2 + $0x144] sm:$0x1] %v1190_v40  ;;  %v2317_v14 = vrot.slane %v2315_v31, 5  ;;  %v2328_v3 = vrot.slane %v2326_v52, 4  ;;  %v89_v2 = vsel %vm3570_vm2, 0, %v88_v11  ;;  %v92_v37 = vsel %vm3570_vm2, 0, %v91_v13  ;;  %v4424_v31 = vpop.permute.xlu1 %2619 }
 0x10c   :  { %v4398_v18 = vsel %vm2787_vm9, %v2488_v25, %v2526_v12  ;;  %2615 = vrot.lane.b32.xlu2 %v3419_v38, %s3531_s24  ;;  %1233 = vst [vmem:[#allocation2 + $0x184] sm:$0x1] %v1232_v5  ;;  %v2331_v54 = vrot.slane %v2329_v56, 5  ;;  %v413_v26 = vshrl.u32 %v278_v30, 16  ;;  %v421_v32 = vshrl.u32 %v4384_v53, 16 }
 0x10d   :  { %v2742_v49 = vpack.c.b16 %v3910_v4, %v3800_v17  ;;  %1239 = vst [vmem:[#allocation2 + $0x18c] sm:$0x1] %v1238_v8  ;;  %v2318_v41 = vor.u32 %v2317_v14, %v2314_v10  ;;  %v416_v60 = vshll.u32 %v278_v30, 16  ;;  %v435_v6 = vrot.slane %v4333_v45, 4  ;;  %v4413_v13 = vld [vmem:[#allocation2 + $0x100] sm:$0xf] }
 0x10e   :  { %v2716_v11 = vpack.c.b16 %v2479_v33, %v2478_v23  ;;  %v2332_v40 = vor.u32 %v2331_v54, %v2328_v3  ;;  %90 = vst [vmem:[#allocation2 + $0x60] sm:$0x1] %v89_v2  ;;  %v4411_v62 = vrot.slane %v413_v26, 7  ;;  %v2472_v34 = vunpack.c.l.b16 %v4413_v13  ;;  %v4419_v30 = vld [vmem:[#allocation2 + $0x108] sm:$0xf] }
 0x10f   :  { %v1432_v5 = vld [vmem:[#allocation2 + $0x138] sm:$0xf]  ;;  %93 = vst [vmem:[#allocation2 + $0x68] sm:$0x1] %v92_v37  ;;  %v4416_v17 = vrot.slane %v421_v32, 7  ;;  %v424_v4 = vshll.u32 %v4384_v53, 16  ;;  %v2473_v45 = vunpack.c.l.b16 %v4419_v30  ;;  %v1052_v23 = vsel %vm3570_vm2, %v435_v6, %v1051_v59 }
 0x110   :  { %v1433_v52 = vld [vmem:[#allocation2 + $0x13c] sm:$0x1]  ;;  %v2088_v15 = vshrl.u32 %v1432_v5, 16  ;;  %v2091_v25 = vshll.u32 %v1432_v5, 16  ;;  %v2319_v38 = vrot.slane %v2318_v41, 4  ;;  %v443_v8 = vrot.slane %v4335_v57, 4 }
 0x111   :  { %v1434_v10 = vld [vmem:[#allocation2 + $0x140] sm:$0xf]  ;;  %v2097_v56 = vshll.u32 %v1433_v52, 16  ;;  %v2333_v12 = vrot.slane %v2332_v40, 4  ;;  %v418_v53 = vor.u32 %v416_v60, %v4411_v62  ;;  %1053 = vst [vmem:[#allocation2 + $0x74] sm:$0x1] %v1052_v23  ;;  %v426_v57 = vor.u32 %v424_v4, %v4416_v17 }
 0x112   :  { %v1435_v3 = vld [vmem:[#allocation2 + $0x144] sm:$0x1]  ;;  %v2090_v2 = vrot.slane %v2088_v15, 4  ;;  %v2093_v54 = vrot.slane %v2091_v25, 5  ;;  %v2102_v37 = vshrl.u32 %v1434_v10, 16  ;;  %v2105_v26 = vshll.u32 %v1434_v10, 16 }
 0x113   :  { %2755 = vrot.lane.b32.xlu1 %v2742_v49, %s3536_s27  ;;  %v2099_v32 = vrot.slane %v2097_v56, 5  ;;  %v2111_v41 = vshll.u32 %v1435_v3, 16  ;;  %v1449_v6 = vld [vmem:[#allocation2 + $0x184] sm:$0x1]  ;;  %v1057_v59 = vld [vmem:[#allocation2 + $0x7c] sm:$0x1]  ;;  %v2713_v49 = vpack.c.b16 %v2473_v45, %v2472_v34 }
 0x114   :  { %v2094_v40 = vor.u32 %v2093_v54, %v2090_v2  ;;  %v2104_v5 = vrot.slane %v2102_v37, 4  ;;  %v2107_v60 = vrot.slane %v2105_v26, 5  ;;  %2729 = vrot.lane.b32.xlu2 %v2716_v11, %s3534_s16  ;;  %v1451_v23 = vld [vmem:[#allocation2 + $0x18c] sm:$0x1]  ;;  %v2321_v52 = vshll.u32 %v1449_v6, 16 }
 0x115   :  { %v2113_v29 = vrot.slane %v2111_v41, 5  ;;  %v2335_v15 = vshll.u32 %v1451_v23, 16  ;;  %v1036_v25 = vld [vmem:[#allocation2 + $0x60] sm:$0xf]  ;;  %v1058_v10 = vsel %vm3570_vm2, %v443_v8, %v1057_v59  ;;  %v1384_v4 = vld [vmem:[#allocation2 + $0x70] sm:$0xf] }
 0x116   :  { %v2095_v56 = vrot.slane %v2094_v40, 4  ;;  %v2108_v3 = vor.u32 %v2107_v60, %v2104_v5  ;;  %v2323_v2 = vrot.slane %v2321_v52, 5  ;;  %v1037_v11 = vsel %vm3602_vm5, %v418_v53, %v1036_v25  ;;  %v1042_v54 = vld [vmem:[#allocation2 + $0x68] sm:$0xf]  ;;  %1059 = vst [vmem:[#allocation2 + $0x7c] sm:$0x1] %v1058_v10  ;;  %v2520_v10 = vpop.permute.xlu1 %2519 }
 0x117   :  { %v2337_v37 = vrot.slane %v2335_v15, 5  ;;  %1038 = vst [vmem:[#allocation2 + $0x60] sm:$0xf] %v1037_v11  ;;  %v1043_v26 = vsel %vm3602_vm5, %v426_v57, %v1042_v54  ;;  %v1386_v41 = vld [vmem:[#allocation2 + $0x78] sm:$0xf]  ;;  %v2228_v6 = vshrl.u32 %v1384_v4, 16 }
 0x118   :  { %v4443_v23 = vld [vmem:[#allocation2 + $0xf8] sm:$0xf]  ;;  %v2100_v59 = vsel %vm3651_vm8, %v2095_v56, %v2099_v32  ;;  %v2109_v40 = vrot.slane %v2108_v3, 4  ;;  %v2324_v53 = vsel %vm3651_vm8, %v2319_v38, %v2323_v2  ;;  %1044 = vst [vmem:[#allocation2 + $0x68] sm:$0xf] %v1043_v26  ;;  %v2231_v60 = vshll.u32 %v1384_v4, 16  ;;  %v4458_v3 = vpop.permute.xlu0 %2515 }
 0x119   :  { %v5137_v8 = vunpack.c.l.b16 %v4443_v23  ;;  %v1385_v5 = vld [vmem:[#allocation2 + $0x74] sm:$0x1]  ;;  %v2637_v52 = vunpack.c.l.b16 %v2100_v59  ;;  %v2338_v57 = vsel %vm3651_vm8, %v2333_v12, %v2337_v37  ;;  %v4452_v15 = vunpack.c.l.b16 %v2324_v53  ;;  %v4464_v37 = vld [vmem:[#allocation2 + $0x1f8] sm:$0xf]  ;;  %v1039_v59 = vld [vmem:[#allocation2 + $0x64] sm:$0x1] }
 0x11a   :  { %v2230_v25 = vrot.slane %v2228_v6, 4  ;;  %v2114_v11 = vsel %vm3651_vm8, %v2109_v40, %v2113_v29  ;;  %v4456_v54 = vunpack.c.l.b16 %v2338_v57  ;;  %v2233_v32 = vrot.slane %v2231_v60, 5  ;;  %v1045_v57 = vld [vmem:[#allocation2 + $0x6c] sm:$0x1]  ;;  %v991_v26 = vld [vmem:[#allocation2 + $0x1c] sm:$0x1] }
 0x11b   :  { %v2237_v56 = vshll.u32 %v1385_v5, 16  ;;  %v2638_v38 = vunpack.c.l.b16 %v2114_v11  ;;  %v2242_v2 = vshrl.u32 %v1386_v41, 16  ;;  %v2245_v4 = vshll.u32 %v1386_v41, 16 }
 0x11c   :  { %v2485_v12 = vpack.c.b16 %v2472_v34, %v5137_v8  ;;  %2723 = vrot.lane.b32.xlu2 %v2713_v49, %s3534_s16  ;;  %v2234_v29 = vor.u32 %v2233_v32, %v2230_v25  ;;  %v2765_v8 = vpack.c.b16 %v3979_v16, %v3943_v7  ;;  %v2739_v49 = vpack.c.b16 %v3765_v24, %v3675_v51  ;;  %v61_v32 = vld [vmem:[#allocation2 + $0x18] sm:$0x1]  ;;  %v4507_v24 = vld [vmem:[#allocation2 + $0x110] sm:$0xf] }
 0x11d   :  { %v2239_v6 = vrot.slane %v2237_v56, 5  ;;  %v2648_v40 = vpack.c.b16 %v2638_v38, %v2637_v52  ;;  %v1387_v53 = vld [vmem:[#allocation2 + $0x7c] sm:$0x1]  ;;  %v2244_v5 = vrot.slane %v2242_v2, 4  ;;  %v2247_v60 = vrot.slane %v2245_v4, 5 }
 0x11e   :  { %v4469_v41 = vsel %vm2787_vm9, %v2485_v12, %v2520_v10  ;;  %v3414_v11 = vld [vmem:[#allocation2 + $0x60] sm:$0xf]  ;;  %v2235_v13 = vrot.slane %v2234_v29, 4  ;;  %v2251_v34 = vshll.u32 %v1387_v53, 16  ;;  %v2688_v52 = vpack.c.b16 %v4456_v54, %v4452_v15  ;;  %v4480_v53 = vld [vmem:[#allocation2 + $0xd8] sm:$0xf] }
 0x11f   :  { %v1380_v25 = vld [vmem:[#allocation2 + $0x60] sm:$0xf]  ;;  %2661 = vrot.lane.b32.xlu0 %v2648_v40, %s3535_s26  ;;  %v3457_v56 = vld [vmem:[#allocation2 + $0x64] sm:$0xf0]  ;;  %v2248_v10 = vor.u32 %v2247_v60, %v2244_v5  ;;  %v419_v38 = vrot.slane %v4411_v62, 4  ;;  %v427_v2 = vrot.slane %v4416_v17, 4 }
 0x120   :  { %v1382_v4 = vld [vmem:[#allocation2 + $0x68] sm:$0xf]  ;;  %v3415_v12 = vor.u32 %v3457_v56, %v3414_v11  ;;  %v2253_v29 = vrot.slane %v2251_v34, 5  ;;  %v64_v40 = vld [vmem:[#allocation2 + $0x20] sm:$0x1]  ;;  %v2240_v62 = vsel %vm3651_vm8, %v2235_v13, %v2239_v6  ;;  %v2200_v11 = vshrl.u32 %v1380_v25, 16 }
 0x121   :  { %v270_v15 = vld [vmem:[%s5130_s0 + $0x8] sm:$0xf]  ;;  %v2249_v54 = vrot.slane %v2248_v10, 4  ;;  %v1040_v17 = vsel %vm3570_vm2, %v419_v38, %v1039_v59  ;;  %v1046_v5 = vsel %vm3570_vm2, %v427_v2, %v1045_v57  ;;  %v271_v60 = vld [vmem:[%s5130_s0 + $0xc] sm:$0xf]  ;;  %v2203_v34 = vshll.u32 %v1380_v25, 16  ;;  %v2522_v10 = vpop.permute.xlu1 %2521 }
 0x122   :  { %2613 = vrot.lane.b32.xlu1 %v3415_v12, %s3531_s24  ;;  %1041 = vst [vmem:[#allocation2 + $0x64] sm:$0x1] %v1040_v17  ;;  %v2214_v56 = vshrl.u32 %v1382_v4, 16  ;;  %v2217_v14 = vshll.u32 %v1382_v4, 16  ;;  %v62_v59 = vsel %vm3570_vm2, 0, %v61_v32  ;;  %v65_v57 = vsel %vm3570_vm2, 0, %v64_v40  ;;  %v2518_v17 = vpop.permute.xlu0 %2517 }
 0x123   :  { %v2254_v6 = vsel %vm3651_vm8, %v2249_v54, %v2253_v29  ;;  %1047 = vst [vmem:[#allocation2 + $0x6c] sm:$0x1] %v1046_v5  ;;  %v349_v13 = vshrl.u32 %v270_v15, 16  ;;  %v208_v38 = vld [vmem:[#allocation2 + $0x1a0] sm:$0x1]  ;;  %v4504_v2 = vunpack.c.l.b16 %v2240_v62  ;;  %v2202_v25 = vrot.slane %v2200_v11, 4 }
 0x124   :  { %2749 = vrot.lane.b32.xlu2 %v2739_v49, %s3536_s27  ;;  %v2205_v12 = vrot.slane %v2203_v34, 5  ;;  %v2216_v4 = vrot.slane %v2214_v56, 4  ;;  %63 = vst [vmem:[#allocation2 + $0x18] sm:$0x1] %v62_v59  ;;  %v2219_v29 = vrot.slane %v2217_v14, 5  ;;  %v352_v5 = vshll.u32 %v270_v15, 16 }
 0x125   :  { %66 = vst [vmem:[#allocation2 + $0x20] sm:$0x1] %v65_v57  ;;  %v351_v54 = vrot.slane %v349_v13, 7  ;;  %v357_v32 = vshrl.u32 %v271_v60, 16  ;;  %v2672_v42 = vunpack.c.l.b16 %v2254_v6  ;;  %v360_v40 = vshll.u32 %v271_v60, 16 }
 0x126   :  { %v2206_v51 = vor.u32 %v2205_v12, %v2202_v25  ;;  %v2474_v62 = vunpack.c.l.b16 %v4507_v24  ;;  %v2220_v49 = vor.u32 %v2219_v29, %v2216_v4  ;;  %v997_v59 = vld [vmem:[#allocation2 + $0x24] sm:$0x1]  ;;  %v211_v14 = vld [vmem:[#allocation2 + $0x1a8] sm:$0x1]  ;;  %v4515_v60 = vld [vmem:[#allocation2 + $0xf0] sm:$0xf] }
 0x127   :  { %2701 = vrot.lane.b32.xlu0 %v2688_v52, %s3537_s28  ;;  %v354_v11 = vor.u32 %v352_v5, %v351_v54  ;;  %v355_v34 = vrot.slane %v351_v54, 4  ;;  %v359_v56 = vrot.slane %v357_v32, 7  ;;  %v2470_v6 = vunpack.c.l.b16 %v4515_v60  ;;  %v314_v52 = vld [vmem:[%s5130_s0 + $0xb8] sm:$0xf]  ;;  %v262_v29 = vld [vmem:[#allocation2 + $0x230] sm:$0x1] }
 0x128   :  { %v2207_v57 = vrot.slane %v2206_v51, 4  ;;  %v2486_v15 = vpack.c.b16 %v2474_v62, %v2473_v45  ;;  %v209_v13 = vsel %vm3570_vm2, 0, %v208_v38  ;;  %v315_v51 = vld [vmem:[%s5130_s0 + $0xbc] sm:$0xf]  ;;  %v2221_v30 = vrot.slane %v2220_v49, 4 }
 0x129   :  { %v1381_v25 = vld [vmem:[#allocation2 + $0x64] sm:$0x1]  ;;  %v362_v12 = vor.u32 %v360_v40, %v359_v56  ;;  %v363_v4 = vrot.slane %v359_v56, 4  ;;  %v992_v45 = vsel %vm3570_vm2, %v355_v34, %v991_v26  ;;  %210 = vst [vmem:[#allocation2 + $0x1a0] sm:$0x1] %v209_v13  ;;  %v2484_v26 = vpack.c.b16 %v2470_v6, %v2469_v46  ;;  %v4545_v34 = vpop.permute.xlu2 %2555 }
 0x12a   :  { %v330_v38 = vld [vmem:[%s5130_s0 + $0xf8] sm:$0xf]  ;;  %2775 = vrot.lane.b32.xlu1 %v2765_v8, %s3538_s8  ;;  %v1383_v54 = vld [vmem:[#allocation2 + $0x6c] sm:$0x1]  ;;  %v2209_v5 = vshll.u32 %v1381_v25, 16  ;;  %v4536_v32 = vsel %vm2787_vm9, %v2486_v15, %v2522_v10  ;;  %v212_v40 = vsel %vm3570_vm2, 0, %v211_v14  ;;  %v2685_v49 = vpack.c.b16 %v2672_v42, %v4504_v2 }
 0x12b   :  { %993 = vst [vmem:[#allocation2 + $0x1c] sm:$0x1] %v992_v45  ;;  %v2223_v7 = vshll.u32 %v1383_v54, 16  ;;  %v988_v16 = vld [vmem:[#allocation2 + $0x18] sm:$0xf]  ;;  %v998_v8 = vsel %vm3570_vm2, %v363_v4, %v997_v59  ;;  %v701_v10 = vshrl.u32 %v314_v52, 16  ;;  %v4552_v46 = vsel %vm2787_vm9, %v2484_v26, %v2518_v17 }
 0x12c   :  { %213 = vst [vmem:[#allocation2 + $0x1a8] sm:$0x1] %v212_v40  ;;  %v2211_v56 = vrot.slane %v2209_v5, 5  ;;  %v989_v36 = vsel %vm3602_vm5, %v354_v11, %v988_v16  ;;  %v994_v15 = vld [vmem:[#allocation2 + $0x20] sm:$0xf]  ;;  %v704_v14 = vshll.u32 %v314_v52, 16  ;;  %v4561_v11 = vpop.permute.xlu1 %2529  ;;  %v4567_v5 = vpop.permute.xlu0 %2527 }
 0x12d   :  { %999 = vst [vmem:[#allocation2 + $0x24] sm:$0x1] %v998_v8  ;;  %v265_v42 = vld [vmem:[#allocation2 + $0x238] sm:$0x1]  ;;  %v331_v2 = vld [vmem:[%s5130_s0 + $0xfc] sm:$0xf]  ;;  %v995_v59 = vsel %vm3602_vm5, %v362_v12, %v994_v15 }
 0x12e   :  { %v2225_v13 = vrot.slane %v2223_v7, 5  ;;  %990 = vst [vmem:[#allocation2 + $0x18] sm:$0xf] %v989_v36  ;;  %v4559_v25 = vrot.slane %v701_v10, 7  ;;  %v709_v4 = vshrl.u32 %v315_v51, 16  ;;  %v2212_v17 = vsel %vm3651_vm8, %v2207_v57, %v2211_v56 }
 0x12f   :  { %996 = vst [vmem:[#allocation2 + $0x20] sm:$0xf] %v995_v59  ;;  %v712_v52 = vshll.u32 %v315_v51, 16  ;;  %v263_v45 = vsel %vm3570_vm2, 0, %v262_v29  ;;  %v829_v54 = vshrl.u32 %v330_v38, 16  ;;  %2695 = vrot.lane.b32.xlu0 %v2685_v49, %s3537_s28  ;;  %v2669_v26 = vunpack.c.l.b16 %v2212_v17 }
 0x130   :  { %v2226_v12 = vsel %vm3651_vm8, %v2221_v30, %v2225_v13  ;;  %v706_v40 = vor.u32 %v704_v14, %v4559_v25  ;;  %v4573_v7 = vrot.slane %v709_v4, 7  ;;  %264 = vst [vmem:[#allocation2 + $0x230] sm:$0x1] %v263_v45  ;;  %v1252_v16 = vld [vmem:[#allocation2 + $0x1a0] sm:$0xf]  ;;  %v832_v8 = vshll.u32 %v330_v38, 16 }
 0x131   :  { %v2670_v57 = vunpack.c.l.b16 %v2226_v12  ;;  %v831_v51 = vrot.slane %v829_v54, 7  ;;  %v4579_v29 = vpack.c.b16 %v2480_v44, %v2479_v33  ;;  %v1351_v56 = vld [vmem:[#allocation2 + $0x234] sm:$0x1]  ;;  %v266_v36 = vsel %vm3570_vm2, 0, %v265_v42  ;;  %v100_v17 = vld [vmem:[#allocation2 + $0x80] sm:$0x1] }
 0x132   :  { %v1365_v49 = vld [vmem:[#allocation2 + $0x1c] sm:$0x1]  ;;  %v714_v10 = vor.u32 %v712_v52, %v4573_v7  ;;  %v1253_v30 = vsel %vm3602_vm5, %v706_v40, %v1252_v16  ;;  %v837_v15 = vshrl.u32 %v331_v2, 16  ;;  %v5146_v38 = vpack.c.b16 %v3671_v47, %v3824_v9  ;;  %267 = vst [vmem:[#allocation2 + $0x238] sm:$0x1] %v266_v36 }
 0x133   :  { %v2684_v43 = vpack.c.b16 %v2670_v57, %v2669_v26  ;;  %v1985_v20 = vshll.u32 %v1365_v49, 16  ;;  %1254 = vst [vmem:[#allocation2 + $0x1a0] sm:$0xf] %v1253_v30  ;;  %v1258_v44 = vld [vmem:[#allocation2 + $0x1a8] sm:$0xf]  ;;  %v835_v33 = vrot.slane %v831_v51, 4  ;;  %v834_v59 = vor.u32 %v832_v8, %v831_v51  ;;  %v4604_v57 = vpop.permute.xlu2 %2561 }
 0x134   :  { %2747 = vrot.lane.b32.xlu1 %v5146_v38, %s3536_s27  ;;  %v1367_v14 = vld [vmem:[#allocation2 + $0x24] sm:$0x1]  ;;  %v1259_v13 = vsel %vm3602_vm5, %v714_v10, %v1258_v44  ;;  %v4592_v4 = vrot.slane %v837_v15, 7  ;;  %v840_v42 = vshll.u32 %v331_v2, 16  ;;  %v5147_v52 = vunpack.c.l.b16 %v4464_v37  ;;  %v103_v40 = vld [vmem:[#allocation2 + $0x88] sm:$0x1]  ;;  %v2560_v30 = vpop.permute.xlu1 %2559 }
 0x135   :  { %v5148_v47 = vunpack.c.l.b16 %v4026_v58  ;;  %2693 = vrot.lane.b32.xlu2 %v2684_v43, %s3537_s28  ;;  %v1364_v45 = vld [vmem:[#allocation2 + $0x18] sm:$0xf]  ;;  %v1987_v54 = vrot.slane %v1985_v20, 5  ;;  %v1999_v12 = vshll.u32 %v1367_v14, 16  ;;  %1260 = vst [vmem:[#allocation2 + $0x1a8] sm:$0xf] %v1259_v13  ;;  %v1352_v26 = vsel %vm3570_vm2, %v835_v33, %v1351_v56  ;;  %v2558_v43 = vpop.permute.xlu0 %2557 }
 0x136   :  { %v282_v2 = vld [vmem:[%s5130_s0 + $0x38] sm:$0xf]  ;;  %v5149_v37 = vunpack.c.l.b16 %v4480_v53  ;;  %v5150_v58 = vunpack.c.l.b16 %v3862_v22  ;;  %v1366_v51 = vld [vmem:[#allocation2 + $0x20] sm:$0xf]  ;;  %v1976_v8 = vshrl.u32 %v1364_v45, 16  ;;  %v1979_v49 = vshll.u32 %v1364_v45, 16 }
 0x137   :  { %v2487_v9 = vpack.c.b16 %v5148_v47, %v5147_v52  ;;  %1353 = vst [vmem:[#allocation2 + $0x234] sm:$0x1] %v1352_v26  ;;  %v842_v10 = vor.u32 %v840_v42, %v4592_v4  ;;  %v1990_v56 = vshrl.u32 %v1366_v51, 16  ;;  %v1993_v36 = vshll.u32 %v1366_v51, 16  ;;  %v1348_v38 = vld [vmem:[#allocation2 + $0x230] sm:$0xf] }
 0x138   :  { %v2483_v16 = vpack.c.b16 %v5150_v58, %v5149_v37  ;;  %v2001_v15 = vrot.slane %v1999_v12, 5  ;;  %v5151_v53 = vpack.c.b16 %v4254_v63, %v4295_v0  ;;  %v1978_v22 = vrot.slane %v1976_v8, 4  ;;  %v283_v14 = vld [vmem:[%s5130_s0 + $0x3c] sm:$0xf]  ;;  %v1255_v58 = vld [vmem:[#allocation2 + $0x1a4] sm:$0x1] }
 0x139   :  { %v1981_v20 = vrot.slane %v1979_v49, 5  ;;  %v1349_v44 = vsel %vm3602_vm5, %v834_v59, %v1348_v38  ;;  %v4619_v33 = vsel %vm2812_vm10, %v4469_v41, %v2560_v30  ;;  %v1992_v13 = vrot.slane %v1990_v56, 4  ;;  %v1354_v26 = vld [vmem:[#allocation2 + $0x238] sm:$0xf] }
 0x13a   :  { %2781 = vrot.lane.b32.xlu0 %v5151_v53, %s3538_s8  ;;  %v1995_v42 = vrot.slane %v1993_v36, 5  ;;  %1350 = vst [vmem:[#allocation2 + $0x230] sm:$0xf] %v1349_v44  ;;  %v4626_v63 = vsel %vm2812_vm10, %v4552_v46, %v2558_v43  ;;  %v101_v0 = vsel %vm3570_vm2, 0, %v100_v17  ;;  %v3438_v59 = vld [vmem:[#allocation2 + $0x1a0] sm:$0xf]  ;;  %v4634_v45 = vsel %vm2787_vm9, %v2487_v9, %v4358_v50 }
 0x13b   :  { %v1982_v52 = vor.u32 %v1981_v20, %v1978_v22  ;;  %102 = vst [vmem:[#allocation2 + $0x80] sm:$0x1] %v101_v0  ;;  %v104_v41 = vsel %vm3570_vm2, 0, %v103_v40  ;;  %v445_v47 = vshrl.u32 %v282_v2, 16  ;;  %v448_v37 = vshll.u32 %v282_v2, 16 }
 0x13c   :  { %v1996_v12 = vor.u32 %v1995_v42, %v1992_v13  ;;  %105 = vst [vmem:[#allocation2 + $0x88] sm:$0x1] %v104_v41  ;;  %v453_v46 = vshrl.u32 %v283_v14, 16  ;;  %v3463_v8 = vld [vmem:[#allocation2 + $0x1a4] sm:$0xf0]  ;;  %v1355_v17 = vsel %vm3602_vm5, %v842_v10, %v1354_v26  ;;  %v456_v30 = vshll.u32 %v283_v14, 16  ;;  %v4655_v13 = vpop.permute.xlu2 %2659 }
 0x13d   :  { %v1983_v51 = vrot.slane %v1982_v52, 4  ;;  %v4638_v49 = vrot.slane %v445_v47, 7  ;;  %v4642_v40 = vsel %vm2787_vm9, %v2483_v16, %v4458_v3  ;;  %v3439_v9 = vor.u32 %v3463_v8, %v3438_v59  ;;  %1356 = vst [vmem:[#allocation2 + $0x238] sm:$0xf] %v1355_v17  ;;  %v1261_v53 = vld [vmem:[#allocation2 + $0x1ac] sm:$0x1] }
 0x13e   :  { %v1997_v50 = vrot.slane %v1996_v12, 4  ;;  %v1493_v56 = vld [vmem:[#allocation2 + $0x234] sm:$0x1]  ;;  %v4644_v36 = vrot.slane %v453_v46, 7  ;;  %v707_v10 = vrot.slane %v4559_v25, 4  ;;  %v715_v44 = vrot.slane %v4573_v7, 4 }
 0x13f   :  { %v1988_v2 = vsel %vm3651_vm8, %v1983_v51, %v1987_v54  ;;  %v1943_v38 = vshll.u32 %v1493_v56, 16  ;;  %v450_v43 = vor.u32 %v448_v37, %v4638_v49  ;;  %v1456_v22 = vld [vmem:[#allocation2 + $0x1a0] sm:$0xf]  ;;  %2625 = vrot.lane.b32.xlu1 %v3439_v9, %s3531_s24  ;;  %v1458_v0 = vld [vmem:[#allocation2 + $0x1a8] sm:$0xf]  ;;  %v5152_v17 = vunpack.c.l.b16 %v4306_v39 }
 0x140   :  { %v2002_v3 = vsel %vm3651_vm8, %v1997_v50, %v2001_v15  ;;  %v2629_v16 = vunpack.c.l.b16 %v1988_v2  ;;  %v458_v20 = vor.u32 %v456_v30, %v4644_v36  ;;  %v1256_v25 = vsel %vm3570_vm2, %v707_v10, %v1255_v58  ;;  %v2935_v9 = vld [vmem:[%s5131_s1 + $0x10] sm:$0x3] }
 0x141   :  { %v2630_v14 = vunpack.c.l.b16 %v2002_v3  ;;  %v1492_v54 = vld [vmem:[#allocation2 + $0x230] sm:$0xf]  ;;  %v1945_v42 = vrot.slane %v1943_v38, 5  ;;  %v2368_v52 = vshrl.u32 %v1456_v22, 16  ;;  %1257 = vst [vmem:[#allocation2 + $0x1a4] sm:$0x1] %v1256_v25  ;;  %v1262_v12 = vsel %vm3570_vm2, %v715_v44, %v1261_v53 }
 0x142   :  { %v1934_v59 = vshrl.u32 %v1492_v54, 16  ;;  %v1937_v41 = vshll.u32 %v1492_v54, 16  ;;  %v2482_v15 = vunpack.c.l.b16 %v1492_v54  ;;  %v1060_v47 = vld [vmem:[#allocation2 + $0x80] sm:$0xf]  ;;  %1263 = vst [vmem:[#allocation2 + $0x1ac] sm:$0x1] %v1262_v12  ;;  %v5153_v56 = vunpack.c.l.b16 %v4443_v23 }
 0x143   :  { %v2644_v26 = vpack.c.b16 %v2630_v14, %v2629_v16  ;;  %v1061_v7 = vsel %vm3602_vm5, %v450_v43, %v1060_v47  ;;  %v1066_v37 = vld [vmem:[#allocation2 + $0x88] sm:$0xf]  ;;  %v2370_v46 = vrot.slane %v2368_v52, 4  ;;  %v2371_v51 = vshll.u32 %v1456_v22, 16 }
 0x144   :  { %v1936_v8 = vrot.slane %v1934_v59, 4  ;;  %v1939_v58 = vrot.slane %v1937_v41, 5  ;;  %v2490_v30 = vpack.c.b16 %v2482_v15, %v5152_v17  ;;  %1062 = vst [vmem:[#allocation2 + $0x80] sm:$0xf] %v1061_v7  ;;  %v1067_v50 = vsel %vm3602_vm5, %v458_v20, %v1066_v37  ;;  %v1494_v38 = vld [vmem:[#allocation2 + $0x238] sm:$0xf]  ;;  %v2564_v20 = vpop.permute.xlu0 %2563 }
 0x145   :  { %2653 = vrot.lane.b32.xlu0 %v2644_v26, %s3535_s26  ;;  %v2712_v2 = vpack.c.b16 %v5153_v56, %v2470_v6  ;;  %1068 = vst [vmem:[#allocation2 + $0x88] sm:$0xf] %v1067_v50  ;;  %v2373_v43 = vrot.slane %v2371_v51, 5  ;;  %v2382_v39 = vshrl.u32 %v1458_v0, 16  ;;  %v2949_v10 = vunpack.c.l.b16 %v2935_v9  ;;  %v1357_v59 = vld [vmem:[#allocation2 + $0x23c] sm:$0x1]  ;;  %v4691_v50 = vpop.permute.xlu1 %2727 }
 0x146   :  { %v1940_v53 = vor.u32 %v1939_v58, %v1936_v8  ;;  %v4677_v22 = vsel %vm2787_vm9, %v2490_v30, %v4561_v11  ;;  %v2438_v3 = vshrl.u32 %v1494_v38, 16  ;;  %v2441_v16 = vshll.u32 %v1494_v38, 16  ;;  %v181_v26 = vld [vmem:[#allocation2 + $0x158] sm:$0x1]  ;;  %v4688_v58 = vpop.permute.xlu2 %2753  ;;  %v184_v9 = vld [vmem:[#allocation2 + $0x160] sm:$0x1] }
 0x147   :  { %v2710_v44 = vunpack.c.l.b16 %v1494_v38  ;;  %v2374_v14 = vor.u32 %v2373_v43, %v2370_v46  ;;  %v2384_v54 = vrot.slane %v2382_v39, 4  ;;  %v2385_v60 = vshll.u32 %v1458_v0, 16 }
 0x148   :  { %v1941_v25 = vrot.slane %v1940_v53, 4  ;;  %v2440_v23 = vrot.slane %v2438_v3, 4  ;;  %v2443_v6 = vrot.slane %v2441_v16, 5  ;;  %v2764_v52 = vpack.c.b16 %v3939_v61, %v4022_v55  ;;  %v1457_v47 = vld [vmem:[#allocation2 + $0x1a4] sm:$0x1] }
 0x149   :  { %v2718_v41 = vpack.c.b16 %v2710_v44, %v2482_v15  ;;  %v2387_v12 = vrot.slane %v2385_v60, 5  ;;  %v2822_v11 = vsel %vm2812_vm10, %v4634_v45, %v2564_v20  ;;  %v1459_v37 = vld [vmem:[#allocation2 + $0x1ac] sm:$0x1]  ;;  %v2375_v0 = vrot.slane %v2374_v14, 4  ;;  %v307_v16 = vld [vmem:[%s5130_s0 + $0x9c] sm:$0xf] }
 0x14a   :  { %v1946_v7 = vsel %vm3651_vm8, %v1941_v25, %v1945_v42  ;;  %v2377_v46 = vshll.u32 %v1457_v47, 16  ;;  %v843_v51 = vrot.slane %v4592_v4, 4  ;;  %v2391_v30 = vshll.u32 %v1459_v37, 16  ;;  %v306_v4 = vld [vmem:[%s5130_s0 + $0x98] sm:$0xf] }
 0x14b   :  { %v4686_v8 = vunpack.c.l.b16 %v1946_v7  ;;  %2733 = vrot.lane.b32.xlu1 %v2718_v41, %s3534_s16  ;;  %v3422_v15 = vld [vmem:[#allocation2 + $0x80] sm:$0xf]  ;;  %v2388_v17 = vor.u32 %v2387_v12, %v2384_v54  ;;  %v2952_v45 = vpack.c.b16 %v2949_v10, %v2949_v10  ;;  %v2444_v43 = vor.u32 %v2443_v6, %v2440_v23  ;;  %v3465_v23 = vld [vmem:[%s5131_s1 + $0x8] sm:$0xff]  ;;  %v1207_v47 = vld [vmem:[#allocation2 + $0x15c] sm:$0x1] }
 0x14c   :  { %v3459_v56 = vld [vmem:[#allocation2 + $0x84] sm:$0xf0]  ;;  %v2379_v42 = vrot.slane %v2377_v46, 5  ;;  %v1358_v38 = vsel %vm3570_vm2, %v843_v51, %v1357_v59  ;;  %v2393_v10 = vrot.slane %v2391_v30, 5  ;;  %v182_v14 = vsel %vm3570_vm2, 0, %v181_v26 }
 0x14d   :  { %v2554_v39 = vpack.c.b16 %v4686_v8, %v4339_v48  ;;  %2721 = vrot.lane.b32.xlu0 %v2712_v2, %s3534_s16  ;;  %v3423_v53 = vor.u32 %v3459_v56, %v3422_v15  ;;  %v2389_v3 = vrot.slane %v2388_v17, 4  ;;  %1359 = vst [vmem:[#allocation2 + $0x23c] sm:$0x1] %v1358_v38  ;;  %v2974_v44 = vsel %vm2972_vm12, %v2952_v45, 0  ;;  %v1063_v46 = vld [vmem:[#allocation2 + $0x84] sm:$0x1]  ;;  %v2700_v15 = vpop.permute.xlu0 %2699 }
 0x14e   :  { %v2380_v20 = vsel %vm3651_vm8, %v2375_v0, %v2379_v42  ;;  %v185_v48 = vsel %vm3570_vm2, 0, %v184_v9  ;;  %3467 = vmatpush.bf16.msra.mxu2 %v2974_v44  ;;  %183 = vst [vmem:[#allocation2 + $0x158] sm:$0x1] %v182_v14  ;;  %v637_v60 = vshrl.u32 %v306_v4, 16  ;;  %v640_v25 = vshll.u32 %v306_v4, 16  ;;  %2981 = vmatpush.bf16.msra.mxu0 %v2974_v44  ;;  %v3464_v56 = vld [vmem:[%s5131_s1] sm:$0xff] }
 0x14f   :  { %2569 = vrot.lane.b32.xlu2 %v2554_v39, %s3533_s4  ;;  %v2394_v2 = vsel %vm3651_vm8, %v2389_v3, %v2393_v10  ;;  %v4713_v54 = vunpack.c.l.b16 %v2380_v20  ;;  %186 = vst [vmem:[#allocation2 + $0x160] sm:$0x1] %v185_v48  ;;  %v645_v59 = vshrl.u32 %v307_v16, 16  ;;  %v648_v41 = vshll.u32 %v307_v16, 16  ;;  %3468 = vmatpush.bf16.msra.mxu3 %v2974_v44  ;;  %v1213_v0 = vld [vmem:[#allocation2 + $0x164] sm:$0x1]  ;;  %v2612_v10 = vpop.permute.xlu1 %2611 }
 0x150   :  { %v4718_v6 = vunpack.c.l.b16 %v2394_v2  ;;  %v4723_v12 = vsel %vm2812_vm10, %v4642_v40, %v4545_v34  ;;  %v2839_v26 = vsel %vm2829_vm11, %v2822_v11, %v4424_v31  ;;  %v4727_v7 = vrot.slane %v2444_v43, 4  ;;  %3466 = vmatpush.bf16.msra.mxu1 %v2974_v44  ;;  %v1069_v34 = vld [vmem:[#allocation2 + $0x8c] sm:$0x1]  ;;  %v1388_v40 = vld [vmem:[#allocation2 + $0x80] sm:$0xf] }
 0x151   :  { %v639_v37 = vrot.slane %v637_v60, 7  ;;  %v647_v51 = vrot.slane %v645_v59, 7  ;;  %v451_v17 = vrot.slane %v4638_v49, 4  ;;  %v459_v45 = vrot.slane %v4644_v36, 4  ;;  %v1390_v9 = vld [vmem:[#allocation2 + $0x88] sm:$0xf]  ;;  %v4750_v36 = vpop.permute.xlu2 %2651 }
 0x152   :  { %v2690_v31 = vpack.c.b16 %v4718_v6, %v4713_v54  ;;  %3470 = vmatpush.bf16.msra.mxu2 %v3465_v23  ;;  %v2856_v43 = vsel %vm2846_vm13, %v2839_v26, %v4655_v13  ;;  %v157_v39 = vld [vmem:[#allocation2 + $0x118] sm:$0x1]  ;;  %2982 = vmatpush.bf16.msra.mxu0 %v3465_v23  ;;  %v2256_v20 = vshrl.u32 %v1388_v40, 16  ;;  %v238_v44 = vld [vmem:[#allocation2 + $0x1f0] sm:$0x1]  ;;  %v2259_v61 = vshll.u32 %v1388_v40, 16 }
 0x153   :  { %2617 = vrot.lane.b32.xlu1 %v3423_v53, %s3531_s24  ;;  %v642_v11 = vor.u32 %v640_v25, %v639_v37  ;;  %v643_v30 = vrot.slane %v639_v37, 4  ;;  %v650_v38 = vor.u32 %v648_v41, %v647_v51  ;;  %v651_v49 = vrot.slane %v647_v51, 4  ;;  %v4744_v53 = vld [vmem:[%s5130_s0 + $0x7c] sm:$0xf]  ;;  %3471 = vmatpush.bf16.msra.mxu3 %v3465_v23 }
 0x154   :  { %v1495_v42 = vld [vmem:[#allocation2 + $0x23c] sm:$0x1]  ;;  %v1064_v4 = vsel %vm3570_vm2, %v451_v17, %v1063_v46  ;;  %v2873_v16 = vsel %vm2863_vm14, %v2856_v43, %v2700_v15  ;;  %3469 = vmatpush.bf16.msra.mxu1 %v3465_v23  ;;  %v2270_v55 = vshrl.u32 %v1390_v9, 16  ;;  %v4763_v2 = vsel %vm2812_vm10, %v4536_v32, %v4604_v57 }
 0x155   :  { %2773 = vrot.lane.b32.xlu0 %v2764_v52, %s3538_s8  ;;  %v2447_v3 = vshll.u32 %v1495_v42, 16  ;;  %v1208_v13 = vsel %vm3570_vm2, %v643_v30, %v1207_v47  ;;  %1065 = vst [vmem:[#allocation2 + $0x84] sm:$0x1] %v1064_v4  ;;  %v1204_v14 = vld [vmem:[#allocation2 + $0x158] sm:$0xf]  ;;  %v1214_v48 = vsel %vm3570_vm2, %v651_v49, %v1213_v0  ;;  %v1070_v59 = vsel %vm3570_vm2, %v459_v45, %v1069_v34 }
 0x156   :  { %1209 = vst [vmem:[#allocation2 + $0x15c] sm:$0x1] %v1208_v13  ;;  %v323_v52 = vld [vmem:[%s5130_s0 + $0xdc] sm:$0xf]  ;;  %v1205_v25 = vsel %vm3602_vm5, %v642_v11, %v1204_v14  ;;  %v1210_v23 = vld [vmem:[#allocation2 + $0x160] sm:$0xf]  ;;  %3473 = vmatpush.bf16.msra.mxu2 %v3464_v56  ;;  %2983 = vmatpush.bf16.msra.mxu0 %v3464_v56  ;;  %v2890_v4 = vsel %vm2880_vm15, %v2873_v16, %v4691_v50 }
 0x157   :  { %v2449_v60 = vrot.slane %v2447_v3, 5  ;;  %1215 = vst [vmem:[#allocation2 + $0x164] sm:$0x1] %v1214_v48  ;;  %v2258_v41 = vrot.slane %v2256_v20, 4  ;;  %v1211_v47 = vsel %vm3602_vm5, %v650_v38, %v1210_v23  ;;  %v2261_v26 = vrot.slane %v2259_v61, 5  ;;  %3474 = vmatpush.bf16.msra.mxu3 %v3464_v56  ;;  %v4803_v61 = vpop.permute.xlu1 %2719  ;;  %v2780_v23 = vpop.permute.xlu0 %2779 }
 0x158   :  { %1206 = vst [vmem:[#allocation2 + $0x158] sm:$0xf] %v1205_v25  ;;  %v2272_v37 = vrot.slane %v2270_v55, 4  ;;  %v2273_v0 = vshll.u32 %v1390_v9, 16  ;;  %v158_v57 = vsel %vm3570_vm2, 0, %v157_v39  ;;  %v581_v46 = vshrl.u32 %v4744_v53, 16  ;;  %3472 = vmatpush.bf16.msra.mxu1 %v3464_v56 }
 0x159   :  { %v2450_v32 = vsel %vm3651_vm8, %v4727_v7, %v2449_v60  ;;  %1212 = vst [vmem:[#allocation2 + $0x160] sm:$0xf] %v1211_v47  ;;  %v584_v51 = vshll.u32 %v4744_v53, 16  ;;  %v2262_v17 = vor.u32 %v2261_v26, %v2258_v41  ;;  %v239_v40 = vsel %vm3570_vm2, 0, %v238_v44  ;;  %v21_v11 = vld [vmem:[#allocation2 + $0x4] sm:$0x1]  ;;  %v4801_v6 = vpop.permute.xlu2 %2745 }
 0x15a   :  { %v4778_v15 = vunpack.c.l.b16 %v2450_v32  ;;  %1071 = vst [vmem:[#allocation2 + $0x8c] sm:$0x1] %v1070_v59  ;;  %v2275_v34 = vrot.slane %v2273_v0, 5  ;;  %v2831_v7 = vsel %vm2829_vm11, %v4723_v12, %v2612_v10  ;;  %v4784_v30 = vrot.slane %v581_v46, 7  ;;  %v1309_v44 = vld [vmem:[#allocation2 + $0x1f4] sm:$0x1] }
 0x15b   :  { %159 = vst [vmem:[#allocation2 + $0x118] sm:$0x1] %v158_v57  ;;  %v773_v45 = vshrl.u32 %v323_v52, 16  ;;  %v776_v9 = vshll.u32 %v323_v52, 16  ;;  %v2263_v38 = vrot.slane %v2262_v17, 4  ;;  %v22_v49 = vsel %vm3570_vm2, 0, %v21_v11 }
 0x15c   :  { %v1389_v42 = vld [vmem:[#allocation2 + $0x84] sm:$0x1]  ;;  %v2276_v56 = vor.u32 %v2275_v34, %v2272_v37  ;;  %240 = vst [vmem:[#allocation2 + $0x1f0] sm:$0x1] %v239_v40  ;;  %v2770_v12 = vpack.c.b16 %v4778_v15, %v4686_v8  ;;  %v586_v20 = vor.u32 %v584_v51, %v4784_v30  ;;  %v25_v14 = vld [vmem:[#allocation2 + $0x4c] sm:$0x1]  ;;  %v4799_v54 = vsel %vm2846_vm13, %v2831_v7, %v4750_v36 }
 0x15d   :  { %2705 = vrot.lane.b32.xlu0 %v2690_v31, %s3537_s28  ;;  %v1441_v43 = vld [vmem:[#allocation2 + $0x15c] sm:$0x1]  ;;  %v2265_v39 = vshll.u32 %v1389_v42, 16  ;;  %v775_v53 = vrot.slane %v773_v45, 7  ;;  %23 = vst [vmem:[#allocation2 + $0x4] sm:$0x1] %v22_v49 }
 0x15e   :  { %v1443_v3 = vld [vmem:[#allocation2 + $0x164] sm:$0x1]  ;;  %v2153_v13 = vshll.u32 %v1441_v43, 16  ;;  %v2277_v10 = vrot.slane %v2276_v56, 4  ;;  %v26_v59 = vsel %vm3570_vm2, 0, %v25_v14 }
 0x15f   :  { %v1440_v8 = vld [vmem:[#allocation2 + $0x158] sm:$0xf]  ;;  %v2167_v31 = vshll.u32 %v1443_v3, 16  ;;  %v2267_v48 = vrot.slane %v2265_v39, 5  ;;  %v778_v50 = vor.u32 %v776_v9, %v775_v53  ;;  %v779_v16 = vrot.slane %v775_v53, 4 }
 0x160   :  { %v1442_v55 = vld [vmem:[#allocation2 + $0x160] sm:$0xf]  ;;  %v2144_v52 = vshrl.u32 %v1440_v8, 16  ;;  %v2147_v60 = vshll.u32 %v1440_v8, 16  ;;  %v2155_v25 = vrot.slane %v2153_v13, 5  ;;  %v2907_v13 = vsel %vm2897_vm0, %v2890_v4, %v4688_v58 }
 0x161   :  { %v2158_v41 = vshrl.u32 %v1442_v55, 16  ;;  %v2161_v36 = vshll.u32 %v1442_v55, 16  ;;  %v2169_v47 = vrot.slane %v2167_v31, 5  ;;  %v1391_v26 = vld [vmem:[#allocation2 + $0x8c] sm:$0x1]  ;;  %v2268_v37 = vsel %vm3651_vm8, %v2263_v38, %v2267_v48 }
 0x162   :  { %v2146_v0 = vrot.slane %v2144_v52, 4  ;;  %v2149_v32 = vrot.slane %v2147_v60, 5  ;;  %v2279_v57 = vshll.u32 %v1391_v26, 16  ;;  %v4809_v46 = vunpack.c.l.b16 %v2268_v37  ;;  %v1162_v51 = vld [vmem:[#allocation2 + $0x118] sm:$0xf]  ;;  %v4848_v60 = vpop.permute.xlu2 %2623 }
 0x163   :  { %v2160_v15 = vrot.slane %v2158_v41, 4  ;;  %v2163_v17 = vrot.slane %v2161_v36, 5  ;;  %v1163_v34 = vsel %vm3602_vm5, %v586_v20, %v1162_v51  ;;  %v1306_v40 = vld [vmem:[#allocation2 + $0x1f0] sm:$0xf]  ;;  %v1310_v11 = vsel %vm3570_vm2, %v779_v16, %v1309_v44  ;;  %27 = vst [vmem:[#allocation2 + $0x4c] sm:$0x1] %v26_v59 }
 0x164   :  { %v73_v7 = vld [vmem:[#allocation2 + $0x38] sm:$0x1]  ;;  %v76_v45 = vld [vmem:[#allocation2 + $0x40] sm:$0x1]  ;;  %v2150_v42 = vor.u32 %v2149_v32, %v2146_v0  ;;  %v2281_v38 = vrot.slane %v2279_v57, 5  ;;  %v1307_v56 = vsel %vm3602_vm5, %v778_v50, %v1306_v40  ;;  %v587_v58 = vrot.slane %v4784_v30, 4 }
 0x165   :  { %v4818_v9 = vld [vmem:[%s5130_s0 + $0x18] sm:$0xf]  ;;  %1164 = vst [vmem:[#allocation2 + $0x118] sm:$0xf] %v1163_v34  ;;  %v37_v49 = vld [vmem:[#allocation2 + $0x124] sm:$0x1]  ;;  %2785 = vrot.lane.b32.xlu0 %v2770_v12, %s3538_s8  ;;  %v2164_v39 = vor.u32 %v2163_v17, %v2160_v15  ;;  %v2924_v12 = vsel %vm2914_vm1, %v2907_v13, %v2780_v23  ;;  %v2772_v23 = vpop.permute.xlu1 %2771 }
 0x166   :  { %v1165_v43 = vld [vmem:[#allocation2 + $0x11c] sm:$0x1]  ;;  %1308 = vst [vmem:[#allocation2 + $0x1f0] sm:$0xf] %v1307_v56  ;;  %v38_v53 = vsel %vm3570_vm2, 0, %v37_v49  ;;  %v2151_v20 = vrot.slane %v2150_v42, 4  ;;  %v2282_v44 = vsel %vm3651_vm8, %v2277_v10, %v2281_v38  ;;  %3452 = vmatmul.msk.bf16.vlgmr.msra.gmra.mxu2 %vm2955_vm3, %v2924_v12 }
 0x167   :  { %v41_v3 = vld [vmem:[#allocation2 + $0x16c] sm:$0x1]  ;;  %1311 = vst [vmem:[#allocation2 + $0x1f4] sm:$0x1] %v1310_v11  ;;  %v4835_v8 = vld [vmem:[%s5130_s0 + $0x1c] sm:$0xf]  ;;  %v2674_v48 = vunpack.c.l.b16 %v2282_v44 }
 0x168   :  { %v42_v14 = vsel %vm3570_vm2, 0, %v41_v3  ;;  %v2165_v31 = vrot.slane %v2164_v39, 4  ;;  %39 = vst [vmem:[#allocation2 + $0x124] sm:$0x1] %v38_v53  ;;  %v2156_v4 = vsel %vm3651_vm8, %v2151_v20, %v2155_v25  ;;  %v74_v10 = vsel %vm3570_vm2, 0, %v73_v7 }
 0x169   :  { %43 = vst [vmem:[#allocation2 + $0x16c] sm:$0x1] %v42_v14  ;;  %v77_v50 = vsel %vm3570_vm2, 0, %v76_v45  ;;  %v381_v16 = vshrl.u32 %v4818_v9, 16  ;;  %v2641_v52 = vunpack.c.l.b16 %v2156_v4  ;;  %v2686_v30 = vpack.c.b16 %v2674_v48, %v4809_v46  ;;  %v130_v59 = vld [vmem:[#allocation2 + $0xd0] sm:$0x1] }
 0x16a   :  { %v2170_v55 = vsel %vm3651_vm8, %v2165_v31, %v2169_v47  ;;  %v1166_v25 = vsel %vm3570_vm2, %v587_v58, %v1165_v43  ;;  %75 = vst [vmem:[#allocation2 + $0x38] sm:$0x1] %v74_v10  ;;  %v384_v26 = vshll.u32 %v4818_v9, 16  ;;  %v389_v37 = vshrl.u32 %v4835_v8, 16  ;;  %v1015_v0 = vld [vmem:[#allocation2 + $0x3c] sm:$0x1]  ;;  %v2692_v47 = vpop.permute.xlu0 %2691 }
 0x16b   :  { %v2642_v41 = vunpack.c.l.b16 %v2170_v55  ;;  %1167 = vst [vmem:[#allocation2 + $0x11c] sm:$0x1] %v1166_v25  ;;  %v383_v36 = vrot.slane %v381_v16, 7  ;;  %v392_v57 = vshll.u32 %v4835_v8, 16  ;;  %v2865_v46 = vsel %vm2863_vm14, %v4799_v54, %v2692_v47  ;;  %v291_v39 = vld [vmem:[%s5130_s0 + $0x5c] sm:$0xf] }
 0x16c   :  { %v1426_v32 = vld [vmem:[#allocation2 + $0x118] sm:$0xf]  ;;  %78 = vst [vmem:[#allocation2 + $0x40] sm:$0x1] %v77_v50  ;;  %v131_v51 = vsel %vm3570_vm2, 0, %v130_v59  ;;  %v391_v13 = vrot.slane %v389_v37, 7  ;;  %v2882_v24 = vsel %vm2880_vm15, %v2865_v46, %v4803_v61 }
 0x16d   :  { %v2650_v15 = vpack.c.b16 %v2642_v41, %v2641_v52  ;;  %v2424_v17 = vshrl.u32 %v1426_v32, 16  ;;  %v2427_v34 = vshll.u32 %v1426_v32, 16  ;;  %v2709_v40 = vunpack.c.l.b16 %v1426_v32  ;;  %v1476_v11 = vld [vmem:[#allocation2 + $0x1f0] sm:$0xf]  ;;  %132 = vst [vmem:[#allocation2 + $0xd0] sm:$0x1] %v131_v51  ;;  %2697 = vrot.lane.b32.xlu0 %v2686_v30, %s3537_s28  ;;  %v4874_v50 = vpop.permute.xlu1 %2703 }
 0x16e   :  { %v1477_v7 = vld [vmem:[#allocation2 + $0x1f4] sm:$0x1]  ;;  %v2410_v45 = vshrl.u32 %v1476_v11, 16  ;;  %v2413_v9 = vshll.u32 %v1476_v11, 16  ;;  %v386_v42 = vor.u32 %v384_v26, %v383_v36  ;;  %v387_v38 = vrot.slane %v383_v36, 4 }
 0x16f   :  { %2665 = vrot.lane.b32.xlu2 %v2650_v15, %s3535_s26  ;;  %v2426_v56 = vrot.slane %v2424_v17, 4  ;;  %v2429_v54 = vrot.slane %v2427_v34, 5  ;;  %v2714_v49 = vpack.c.b16 %v2709_v40, %v2474_v62  ;;  %v2419_v43 = vshll.u32 %v1477_v7, 16  ;;  %v1021_v44 = vld [vmem:[#allocation2 + $0x44] sm:$0x1] }
 0x170   :  { %v2412_v53 = vrot.slane %v2410_v45, 4  ;;  %v2415_v3 = vrot.slane %v2413_v9, 5  ;;  %v1016_v20 = vsel %vm3570_vm2, %v387_v38, %v1015_v0  ;;  %v517_v62 = vshrl.u32 %v291_v39, 16 }
 0x171   :  { %2725 = vrot.lane.b32.xlu1 %v2714_v49, %s3534_s16  ;;  %v2421_v14 = vrot.slane %v2419_v43, 5  ;;  %v2430_v12 = vor.u32 %v2429_v54, %v2426_v56  ;;  %v1012_v8 = vld [vmem:[#allocation2 + $0x38] sm:$0xf]  ;;  %1017 = vst [vmem:[#allocation2 + $0x3c] sm:$0x1] %v1016_v20  ;;  %v394_v58 = vor.u32 %v392_v57, %v391_v13  ;;  %v395_v4 = vrot.slane %v391_v13, 4 }
 0x172   :  { %v2416_v31 = vor.u32 %v2415_v3, %v2412_v53  ;;  %v1427_v48 = vld [vmem:[#allocation2 + $0x11c] sm:$0x1]  ;;  %v1013_v10 = vsel %vm3602_vm5, %v386_v42, %v1012_v8 }
 0x173   :  { %8 = vsyncpa [#allocation4], 0  ;;  %v2431_v16 = vrot.slane %v2430_v12, 4  ;;  %v2433_v55 = vshll.u32 %v1427_v48, 16  ;;  %1014 = vst [vmem:[#allocation2 + $0x38] sm:$0xf] %v1013_v10  ;;  %v2899_v30 = vsel %vm2897_vm0, %v2882_v24, %v4801_v6  ;;  %v2568_v25 = vpop.permute.xlu0 %2567  ;;  %v4878_v59 = vpop.permute.xlu2 %2565  ;;  %v1022_v36 = vsel %vm3570_vm2, %v395_v4, %v1021_v44 }
 0x174   :  { %v1018_v52 = vld [vmem:[#allocation2 + $0x40] sm:$0xf]  ;;  %v2417_v61 = vrot.slane %v2416_v31, 4  ;;  %v2916_v26 = vsel %vm2914_vm1, %v2899_v30, %v2772_v23  ;;  %v519_v0 = vrot.slane %v517_v62, 7  ;;  %v520_v47 = vshll.u32 %v291_v39, 16  ;;  %s3542_s28 = smov 104  }
 0x175   :  { %v1019_v41 = vsel %vm3602_vm5, %v394_v58, %v1018_v52  ;;  %v2435_v37 = vrot.slane %v2433_v55, 5  ;;  %3448 = vmatmul.msk.bf16.vlgmr.msra.gmra.mxu0 %vm2955_vm3, %v2916_v26  ;;  %1023 = vst [vmem:[#allocation2 + $0x44] sm:$0x1] %v1022_v36  ;;  %v1114_v32 = vld [vmem:[#allocation2 + $0xd0] sm:$0xf]  ;;  %v2808_v45 = vsel %vm2787_vm9, %v4579_v29, %v4567_v5  ;;  %v4899_v38 = vpop.permute.xlu1 %2621  ;;  %s3544_s14 = smov 88  }
 0x176   :  { %1020 = vst [vmem:[#allocation2 + $0x40] sm:$0xf] %v1019_v41  ;;  %v2422_v6 = vsel %vm3651_vm8, %v2417_v61, %v2421_v14  ;;  %v1117_v57 = vld [vmem:[#allocation2 + $0xd4] sm:$0x1]  ;;  %v522_v15 = vor.u32 %v520_v47, %v519_v0  ;;  %v523_v17 = vrot.slane %v519_v0, 4  ;;  %v2826_v27 = vsel %vm2812_vm10, %v2808_v45, %v2568_v25  ;;  %s3545_s15 = smov 72  }
 0x177   :  { %v2736_v46 = vunpack.c.l.b16 %v2422_v6  ;;  %v2436_v51 = vsel %vm3651_vm8, %v2431_v16, %v2435_v37  ;;  %v2843_v13 = vsel %vm2829_vm11, %v2826_v27, %v4848_v60  ;;  %s3396_s19 = sshll.u32 %s5133_s3, 4  ;;  %s3548_s20 = smov [#allocation3]   ;;  %s3397_s19 = int_to_ptr.hbm [resolvable:$true] %s3396_s19 }
 0x178   :  { %v2761_v34 = vunpack.c.l.b16 %v2436_v51  ;;  %v1373_v23 = vld [vmem:[#allocation2 + $0x3c] sm:$0x1]  ;;  %v1115_v11 = vsel %vm3602_vm5, %v522_v15, %v1114_v32  ;;  %v1118_v7 = vsel %vm3570_vm2, %v523_v17, %v1117_v57  ;;  %vm3150_vm2 = vcmask 1047556   ;;  %s3394_s21 = sshll.u32 %s3548_s20, 4  ;;  %s3549_s3 = smov 128   ;;  %s3395_s21 = int_to_ptr.vmem [resolvable:$true] %s3394_s21 }
 0x179   :  { %v2744_v40 = vpack.c.b16 %v2736_v46, %v3860_v21  ;;  %1116 = vst [vmem:[#allocation2 + $0xd0] sm:$0xf] %v1115_v11  ;;  %v2041_v54 = vshll.u32 %v1373_v23, 16 }
 0x17a   :  { %v2766_v9 = vpack.c.b16 %v2761_v34, %v3987_v35  ;;  %v1372_v42 = vld [vmem:[#allocation2 + $0x38] sm:$0xf]  ;;  %1119 = vst [vmem:[#allocation2 + $0xd4] sm:$0x1] %v1118_v7 }
 0x17b   :  { %2759 = vrot.lane.b32.xlu2 %v2744_v40, %s3536_s27  ;;  %v2032_v56 = vshrl.u32 %v1372_v42, 16  ;;  %v2035_v21 = vshll.u32 %v1372_v42, 16  ;;  %v2664_v1 = vpop.permute.xlu0 %2663  ;;  %v2758_v3 = vpop.permute.xlu2 %2757  ;;  %v2043_v44 = vrot.slane %v2041_v54, 5 }
 0x17c   :  { %2777 = vrot.lane.b32.xlu0 %v2766_v9, %s3538_s8  ;;  %v1375_v43 = vld [vmem:[#allocation2 + $0x44] sm:$0x1]  ;;  %v2860_v8 = vsel %vm2846_vm13, %v2843_v13, %v2664_v1  ;;  %s3543_s8 = smov 96  }
 0x17d   :  { %v1374_v49 = vld [vmem:[#allocation2 + $0x40] sm:$0xf]  ;;  %v2034_v5 = vrot.slane %v2032_v56, 4  ;;  %v2037_v29 = vrot.slane %v2035_v21, 5  ;;  %v2055_v53 = vshll.u32 %v1375_v43, 16  ;;  %v2784_v16 = vpop.permute.xlu1 %2783  ;;  %v2877_v60 = vsel %vm2863_vm14, %v2860_v8, %v4874_v50 }
 0x17e   :  { %v2046_v35 = vshrl.u32 %v1374_v49, 16  ;;  %v2049_v39 = vshll.u32 %v1374_v49, 16  ;;  %v2824_v56 = vsel %vm2812_vm10, %v4398_v18, %v4878_v59 }
 0x17f   :  { %v2038_v20 = vor.u32 %v2037_v29, %v2034_v5  ;;  %v2057_v31 = vrot.slane %v2055_v53, 5  ;;  %v2841_v21 = vsel %vm2829_vm11, %v2824_v56, %v4899_v38 }
 0x180   :  { %v2048_v14 = vrot.slane %v2046_v35, 4  ;;  %v2051_v12 = vrot.slane %v2049_v39, 5  ;;  %v1408_v48 = vld [vmem:[#allocation2 + $0xd0] sm:$0xf] }
 0x181   :  { %v2039_v24 = vrot.slane %v2038_v20, 4  ;;  %v1409_v58 = vld [vmem:[#allocation2 + $0xd4] sm:$0x1]  ;;  %v2396_v4 = vshrl.u32 %v1408_v48, 16  ;;  %v2399_v10 = vshll.u32 %v1408_v48, 16 }
 0x182   :  { %v2052_v62 = vor.u32 %v2051_v12, %v2048_v14  ;;  %v2405_v30 = vshll.u32 %v1409_v58, 16 }
 0x183   :  { %v2044_v55 = vsel %vm3651_vm8, %v2039_v24, %v2043_v44  ;;  %v2732_v25 = vpop.permute.xlu0 %2731  ;;  %v2398_v41 = vrot.slane %v2396_v4, 4  ;;  %v2401_v36 = vrot.slane %v2399_v10, 5  ;;  %v2616_v50 = vpop.permute.xlu2 %2615 }
 0x184   :  { %v2053_v52 = vrot.slane %v2052_v62, 4  ;;  %v2633_v61 = vunpack.c.l.b16 %v2044_v55  ;;  %v2894_v26 = vsel %vm2880_vm15, %v2877_v60, %v2732_v25  ;;  %v2407_v32 = vrot.slane %v2405_v30, 5 }
 0x185   :  { %v2911_v0 = vsel %vm2897_vm0, %v2894_v26, %v2758_v3  ;;  %v2402_v6 = vor.u32 %v2401_v36, %v2398_v41  ;;  %v2656_v17 = vpop.permute.xlu1 %2655  ;;  %v2835_v28 = vsel %vm2829_vm11, %v4619_v33, %v2616_v50 }
 0x186   :  { %v2058_v37 = vsel %vm3651_vm8, %v2053_v52, %v2057_v31  ;;  %v2928_v57 = vsel %vm2914_vm1, %v2911_v0, %v2784_v16 }
 0x187   :  { %v2634_v47 = vunpack.c.l.b16 %v2058_v37  ;;  %3454 = vmatmul.msk.bf16.vlgmr.msra.gmra.mxu3 %vm2955_vm3, %v2928_v57  ;;  %v2403_v51 = vrot.slane %v2402_v6, 4  ;;  %v4965_v57 = vld [vmem:[%s5132_s2] ss:$0 sm:$0xff]  ;;  %s3539_s2 = smov 120  }
 0x189   :  { %v2646_v46 = vpack.c.b16 %v2634_v47, %v2633_v61  ;;  %v2408_v15 = vsel %vm3651_vm8, %v2403_v51, %v2407_v32 }
 0x18a   :  { %v2735_v34 = vunpack.c.l.b16 %v2408_v15 }
 0x18b   :  { %2657 = vrot.lane.b32.xlu2 %v2646_v46, %s3535_s26  ;;  %v2730_v40 = vpop.permute.xlu2 %2729  ;;  %s3540_s26 = smov 112  }
 0x18c   :  { %v2740_v23 = vpack.c.b16 %v2735_v34, %v3770_v19  ;;  %v2852_v19 = vsel %vm2846_vm13, %v2835_v28, %v2656_v17 }
 0x18d   :  { %v2756_v11 = vpop.permute.xlu1 %2755 }
 0x191   :  { %v2662_v7 = vpop.permute.xlu0 %2661 }
 0x192   :  { %v2858_v27 = vsel %vm2846_vm13, %v2841_v21, %v2662_v7 }
 0x193   :  { %2751 = vrot.lane.b32.xlu2 %v2740_v23, %s3536_s27  ;;  %v2724_v9 = vpop.permute.xlu2 %2723  ;;  %s3541_s27 = smov 80  }
 0x195   :  { %v2614_v45 = vpop.permute.xlu1 %2613 }
 0x196   :  { %v2833_v13 = vsel %vm2829_vm11, %v4626_v63, %v2614_v45 }
 0x199   :  { %v2702_v42 = vpop.permute.xlu0 %2701 }
 0x19a   :  { %v2875_v5 = vsel %vm2863_vm14, %v2858_v27, %v2702_v42 }
 0x19b   :  { %v2750_v43 = vpop.permute.xlu2 %2749  ;;  %v2892_v59 = vsel %vm2880_vm15, %v2875_v5, %v2730_v40 }
 0x19c   :  { %v2909_v35 = vsel %vm2897_vm0, %v2892_v59, %v2756_v11 }
 0x19d   :  { %v2776_v49 = vpop.permute.xlu1 %2775 }
 0x1a1   :  { %v2696_v54 = vpop.permute.xlu0 %2695 }
 0x1a2   :  { %v2869_v1 = vsel %vm2863_vm14, %v2852_v19, %v2696_v54 }
 0x1a3   :  { %v2886_v29 = vsel %vm2880_vm15, %v2869_v1, %v2724_v9  ;;  %v2694_v3 = vpop.permute.xlu2 %2693 }
 0x1a4   :  { %v2903_v18 = vsel %vm2897_vm0, %v2886_v29, %v2750_v43 }
 0x1a5   :  { %v2920_v33 = vsel %vm2914_vm1, %v2903_v18, %v2776_v49 }
 0x1a6   :  { %3450 = vmatmul.msk.bf16.vlgmr.msra.gmra.mxu1 %vm2955_vm3, %v2920_v33  ;;  %v2748_v20 = vpop.permute.xlu1 %2747 }
 0x1ab   :  { %v2570_v8 = vpop.permute.xlu2 %2569 }
 0x1ac   :  { %v2782_v38 = vpop.permute.xlu0 %2781  ;;  %v2828_v63 = vsel %vm2812_vm10, %v4677_v22, %v2570_v8 }
 0x1ad   :  { %v2926_v39 = vsel %vm2914_vm1, %v2909_v35, %v2782_v38 }
 0x1ae   :  { %3453 = vmatmul.msk.bf16.gmra.mxu2 %vm2955_vm3, %v2926_v39 }
 0x1b1   :  { %v2626_v58 = vpop.permute.xlu1 %2625 }
 0x1b2   :  { %v2845_v10 = vsel %vm2829_vm11, %v2828_v63, %v2626_v58 }
 0x1b7   :  { %v2654_v53 = vpop.permute.xlu0 %2653 }
 0x1b8   :  { %v2850_v14 = vsel %vm2846_vm13, %v2833_v13, %v2654_v53 }
 0x1b9   :  { %v2867_v12 = vsel %vm2863_vm14, %v2850_v14, %v2694_v3 }
 0x1bd   :  { %v2734_v30 = vpop.permute.xlu1 %2733 }
 0x1bf   :  { %v2722_v44 = vpop.permute.xlu0 %2721 }
 0x1c0   :  { %v2884_v24 = vsel %vm2880_vm15, %v2867_v12, %v2722_v44 }
 0x1c1   :  { %v2901_v31 = vsel %vm2897_vm0, %v2884_v24, %v2748_v20 }
 0x1c5   :  { %v2618_v22 = vpop.permute.xlu1 %2617 }
 0x1c6   :  { %v2837_v26 = vsel %vm2829_vm11, %v4763_v2, %v2618_v22  ;;  %v3546_v22 = vmov 1983009808  }
 0x1c7   :  { %v2774_v62 = vpop.permute.xlu0 %2773 }
 0x1c8   :  { %v2918_v48 = vsel %vm2914_vm1, %v2901_v31, %v2774_v62 }
 0x1c9   :  { %3449 = vmatmul.msk.bf16.gmra.mxu0 %vm2955_vm3, %v2918_v48  ;;  %v2666_v4 = vpop.permute.xlu2 %2665 }
 0x1ca   :  { %v2862_v55 = vsel %vm2846_vm13, %v2845_v10, %v2666_v4 }
 0x1cf   :  { %v2706_v16 = vpop.permute.xlu0 %2705 }
 0x1d0   :  { %v2879_v52 = vsel %vm2863_vm14, %v2862_v55, %v2706_v16 }
 0x1d1   :  { %v2896_v60 = vsel %vm2880_vm15, %v2879_v52, %v2734_v30 }
 0x1d5   :  { %v2760_v25 = vpop.permute.xlu2 %2759 }
 0x1d6   :  { %v2913_v41 = vsel %vm2897_vm0, %v2896_v60, %v2760_v25 }
 0x1d7   :  { %v2786_v61 = vpop.permute.xlu0 %2785 }
 0x1d8   :  { %v2930_v36 = vsel %vm2914_vm1, %v2913_v41, %v2786_v61 }
 0x1d9   :  { %3455 = vmatmul.msk.bf16.gmra.mxu3 %vm2955_vm3, %v2930_v36 }
 0x1df   :  { %v2698_v0 = vpop.permute.xlu0 %2697 }
 0x1e3   :  { %v2726_v32 = vpop.permute.xlu1 %2725 }
 0x1e5   :  { %v2658_v37 = vpop.permute.xlu2 %2657 }
 0x1e6   :  { %v2854_v47 = vsel %vm2846_vm13, %v2837_v26, %v2658_v37  ;;  %v3155_v26 = vunpack.c.l.s4 %v3546_v22 }
 0x1e7   :  { %v2871_v6 = vsel %vm2863_vm14, %v2854_v47, %v2698_v0 }
 0x1e8   :  { %v2888_v46 = vsel %vm2880_vm15, %v2871_v6, %v2726_v32  ;;  %v4996_v6 = vunpack.c.0.s8 %v3155_v26 }
 0x1e9   :  { %v3005_v51 = vpop.f32.mrf.mxu2 }
 0x1ea   :  { %v3006_v15 = vadd.f32 %v4965_v57, %v3005_v51 }
 0x1ec   :  { %v3033_v23 = vmax.f32 %v3006_v15, 0.0 }
 0x1ed   :  { %v2752_v50 = vpop.permute.xlu2 %2751 }
 0x1ee   :  { %v2905_v2 = vsel %vm2897_vm0, %v2888_v46, %v2752_v50  ;;  %v2778_v17 = vpop.permute.xlu0 %2777  ;;  %3073 = vxpose.xlu2.b32.start [1/8] (short) (narrow) %v3033_v23, 8 }
 0x1ef   :  { %v2922_v34 = vsel %vm2914_vm1, %v2905_v2, %v2778_v17 }
 0x1f0   :  { %3451 = vmatmul.msk.bf16.gmra.mxu1 %vm2955_vm3, %v2922_v34 }
 0x1f1   :  { %v3007_v7 = vpop.f32.mrf.mxu2 }
 0x1f2   :  { %v2985_v40 = vpop.f32.mrf.mxu0  ;;  %v3008_v9 = vadd.f32 %v4965_v57, %v3007_v7 }
 0x1f3   :  { %v2986_v11 = vadd.f32 %v4965_v57, %v2985_v40 }
 0x1f4   :  { %v3034_v42 = vmax.f32 %v3008_v9, 0.0 }
 0x1f5   :  { %v3025_v45 = vmax.f32 %v2986_v11, 0.0 }
 0x1f6   :  { %3074 = vxpose.xlu2.b32.cont [2/8] (short) (narrow) %v3034_v42, 8 }
 0x1f7   :  { %3041 = vxpose.xlu1.b32.start [1/8] (short) (narrow) %v3025_v45, 8 }
 0x1fa   :  { %v2987_v56 = vpop.f32.mrf.mxu0 }
 0x1fb   :  { %v2988_v28 = vadd.f32 %v4965_v57, %v2987_v56 }
 0x1fd   :  { %v3026_v21 = vmax.f32 %v2988_v28, 0.0 }
 0x1ff   :  { %3042 = vxpose.xlu1.b32.cont [2/8] (short) (narrow) %v3026_v21, 8 }
 0x20a   :  { %v3015_v43 = vpop.f32.mrf.mxu3 }
 0x20b   :  { %v3016_v29 = vadd.f32 %v4965_v57, %v3015_v43 }
 0x20d   :  { %v3037_v18 = vmax.f32 %v3016_v29, 0.0  ;;  %v3547_v29 = vmov 1934713408  }
 0x212   :  { %v3017_v33 = vpop.f32.mrf.mxu3 }
 0x213   :  { %v3018_v38 = vadd.f32 %v4965_v57, %v3017_v33 }
 0x215   :  { %v3038_v53 = vmax.f32 %v3018_v38, 0.0 }
 0x223   :  { %v2995_v20 = vpop.f32.mrf.mxu1 }
 0x224   :  { %v2996_v14 = vadd.f32 %v4965_v57, %v2995_v20 }
 0x226   :  { %v3029_v12 = vmax.f32 %v2996_v14, 0.0 }
 0x22b   :  { %v2997_v8 = vpop.f32.mrf.mxu1 }
 0x22c   :  { %v2998_v62 = vadd.f32 %v4965_v57, %v2997_v8 }
 0x22e   :  { %v3030_v58 = vmax.f32 %v2998_v62, 0.0 }
 0x231   :  { %v3010_v19 = vpop.f32.mrf.mxu2 }
 0x232   :  { %v3011_v54 = vadd.f32 %v4965_v57, %v3010_v19 }
 0x234   :  { %v3035_v27 = vmax.f32 %v3011_v54, 0.0 }
 0x236   :  { %3075 = vxpose.xlu2.b32.cont [3/8] (short) (narrow) %v3035_v27, 8 }
 0x239   :  { %v3012_v1 = vpop.f32.mrf.mxu2 }
 0x23a   :  { %v3013_v49 = vadd.f32 %v4965_v57, %v3012_v1 }
 0x23c   :  { %v3036_v5 = vmax.f32 %v3013_v49, 0.0 }
 0x23e   :  { %3076 = vxpose.xlu2.b32.cont [4/8] (short) (narrow) %v3036_v5, 8 }
 0x246   :  { %3077 = vxpose.xlu2.b32.cont [5/8] (short) (narrow) %v3037_v18, 8  ;;  %v2990_v59 = vpop.f32.mrf.mxu0  ;;  %v3203_v18 = vunpack.c.l.s4 %v3547_v29 }
 0x247   :  { %v2991_v35 = vadd.f32 %v4965_v57, %v2990_v59 }
 0x248   :  { %v5011_v38 = vunpack.c.0.s8 %v3203_v18 }
 0x249   :  { %v3027_v39 = vmax.f32 %v2991_v35, 0.0 }
 0x24b   :  { %3043 = vxpose.xlu1.b32.cont [3/8] (short) (narrow) %v3027_v39, 8 }
 0x24e   :  { %3078 = vxpose.xlu2.b32.cont [6/8] (short) (narrow) %v3038_v53, 8  ;;  %v2992_v3 = vpop.f32.mrf.mxu0 }
 0x24f   :  { %v2993_v13 = vadd.f32 %v4965_v57, %v2992_v3 }
 0x251   :  { %v3028_v44 = vmax.f32 %v2993_v13, 0.0 }
 0x253   :  { %3044 = vxpose.xlu1.b32.cont [4/8] (short) (narrow) %v3028_v44, 8 }
 0x25b   :  { %3045 = vxpose.xlu1.b32.cont [5/8] (short) (narrow) %v3029_v12, 8 }
 0x25c   :  { %v3020_v24 = vpop.f32.mrf.mxu3 }
 0x25d   :  { %v3021_v31 = vadd.f32 %v4965_v57, %v3020_v24 }
 0x25f   :  { %v3039_v48 = vmax.f32 %v3021_v31, 0.0 }
 0x261   :  { %3079 = vxpose.xlu2.b32.cont [7/8] (short) (narrow) %v3039_v48, 8 }
 0x263   :  { %3046 = vxpose.xlu1.b32.cont [6/8] (short) (narrow) %v3030_v58, 8 }
 0x264   :  { %v3022_v63 = vpop.f32.mrf.mxu3 }
 0x265   :  { %v3023_v4 = vadd.f32 %v4965_v57, %v3022_v63 }
 0x267   :  { %v3040_v10 = vmax.f32 %v3023_v4, 0.0 }
 0x269   :  { %3080 = vxpose.xlu2.b32.end [8/8] (short) (narrow) %v3040_v10, 8 }
 0x26d   :  { %v3000_v16 = vpop.f32.mrf.mxu1 }
 0x26e   :  { %v3001_v55 = vadd.f32 %v4965_v57, %v3000_v16 }
 0x270   :  { %v3031_v52 = vmax.f32 %v3001_v55, 0.0 }
 0x272   :  { %3047 = vxpose.xlu1.b32.cont [7/8] (short) (narrow) %v3031_v52, 8 }
 0x275   :  { %v3002_v30 = vpop.f32.mrf.mxu1 }
 0x276   :  { %v3003_v60 = vadd.f32 %v4965_v57, %v3002_v30 }
 0x278   :  { %v3032_v25 = vmax.f32 %v3003_v60, 0.0 }
 0x27a   :  { %3048 = vxpose.xlu1.b32.end [8/8] (short) (narrow) %v3032_v25, 8 }
 0x2ca   :  { %v4987_v41 = vpop.trf.xlu2 }
 0x2cb   :  { %v3264_v33 = vrot.slane %v4987_v41, 4 }
 0x2d2   :  { %3139 = vrot.lane.b32.xlu2 %v4987_v41, %s3541_s27 }
 0x2e6   :  { %v3057_v61 = vpop.trf.xlu1 }
 0x2e7   :  { %3107 = vrot.lane.b32.xlu0 %v3057_v61, %s3539_s2  ;;  %v3152_v0 = vrot.slane %v3057_v61, 4 }
 0x2ef   :  { %3113 = vrot.lane.b32.xlu0 %v3057_v61, %s3540_s26 }
 0x2f7   :  { %3119 = vrot.lane.b32.xlu0 %v3057_v61, %s3542_s28 }
 0x2ff   :  { %3125 = vrot.lane.b32.xlu0 %v3057_v61, %s3543_s8 }
 0x307   :  { %3131 = vrot.lane.b32.xlu0 %v3057_v61, %s3544_s14 }
 0x30f   :  { %3137 = vrot.lane.b32.xlu0 %v3057_v61, %s3541_s27 }
 0x317   :  { %3109 = vrot.lane.b32.xlu0 %v4987_v41, %s3539_s2 }
 0x31f   :  { %3115 = vrot.lane.b32.xlu0 %v4987_v41, %s3540_s26 }
 0x327   :  { %3121 = vrot.lane.b32.xlu0 %v4987_v41, %s3542_s28 }
 0x32c   :  { %v3140_v62 = vpop.permute.xlu2 %3139 }
 0x32d   :  { %v3286_v16 = vrot.slane %v3140_v62, 4 }
 0x32f   :  { %3127 = vrot.lane.b32.xlu0 %v4987_v41, %s3543_s8 }
 0x337   :  { %3133 = vrot.lane.b32.xlu0 %v4987_v41, %s3544_s14 }
 0x33f   :  { %3143 = vrot.lane.b32.xlu0 %v3057_v61, %s3545_s15 }
 0x347   :  { %3145 = vrot.lane.b32.xlu0 %v4987_v41, %s3545_s15 }
 0x359   :  { %v3108_v36 = vpop.permute.xlu0 %3107 }
 0x35a   :  { %v3164_v50 = vrot.slane %v3108_v36, 4 }
 0x361   :  { %v3114_v37 = vpop.permute.xlu0 %3113 }
 0x362   :  { %v3149_v47 = vrot.slane %v3114_v37, 4  ;;  %v3153_v32 = vsel %vm3150_vm2, %v3114_v37, %v3152_v0 }
 0x363   :  { %v3161_v46 = vperm.slane %v3153_v32, %v4996_v6 }
 0x364   :  { %v3151_v57 = vsel %vm3150_vm2, %v3149_v47, %v3057_v61 }
 0x365   :  { %v3157_v51 = vperm.slane %v3151_v57, %v4996_v6  ;;  %v3212_v34 = vrot.slane %v3161_v46, 4 }
 0x367   :  { %v3200_v11 = vrot.slane %v3157_v51, 4 }
 0x369   :  { %v3120_v15 = vpop.permute.xlu0 %3119 }
 0x36a   :  { %v3162_v2 = vrot.slane %v3120_v15, 4  ;;  %v3165_v17 = vsel %vm3150_vm2, %v3120_v15, %v3164_v50 }
 0x36b   :  { %v3173_v23 = vperm.slane %v3165_v17, %v4996_v6 }
 0x36c   :  { %v3163_v40 = vsel %vm3150_vm2, %v3162_v2, %v3108_v36 }
 0x36d   :  { %v3169_v7 = vperm.slane %v3163_v40, %v4996_v6  ;;  %v3210_v45 = vrot.slane %v3173_v23, 4  ;;  %v3213_v9 = vsel %vm3150_vm2, %v3173_v23, %v3212_v34 }
 0x36e   :  { %v5024_v24 = vperm.slane %v3213_v9, %v5011_v38 }
 0x36f   :  { %v3198_v42 = vrot.slane %v3169_v7, 4  ;;  %v3201_v56 = vsel %vm3150_vm2, %v3169_v7, %v3200_v11  ;;  %v3211_v28 = vsel %vm3150_vm2, %v3210_v45, %v3161_v46 }
 0x370   :  { %v5021_v8 = vperm.slane %v3201_v56, %v5011_v38  ;;  %v5029_v58 = vperm.slane %v3211_v28, %v5011_v38  ;;  %v3260_v25 = vrot.slane %v5024_v24, 4 }
 0x371   :  { %v3199_v21 = vsel %vm3150_vm2, %v3198_v42, %v3157_v51  ;;  %v3126_v19 = vpop.permute.xlu0 %3125 }
 0x372   :  { %v3176_v20 = vrot.slane %v3126_v19, 4  ;;  %v5037_v60 = vperm.slane %v3199_v21, %v5011_v38  ;;  %v3252_v36 = vrot.slane %v5021_v8, 4  ;;  %v3256_v22 = vrot.slane %v5029_v58, 4 }
 0x374   :  { %v3248_v17 = vrot.slane %v5037_v60, 4 }
 0x379   :  { %v3132_v54 = vpop.permute.xlu0 %3131 }
 0x37a   :  { %v3188_v61 = vrot.slane %v3132_v54, 4 }
 0x381   :  { %v3138_v27 = vpop.permute.xlu0 %3137 }
 0x382   :  { %v3174_v3 = vrot.slane %v3138_v27, 4  ;;  %v3177_v31 = vsel %vm3150_vm2, %v3138_v27, %v3176_v20 }
 0x383   :  { %v3185_v55 = vperm.slane %v3177_v31, %v4996_v6 }
 0x384   :  { %v3175_v63 = vsel %vm3150_vm2, %v3174_v3, %v3126_v19 }
 0x385   :  { %v3236_v50 = vrot.slane %v3185_v55, 4 }
 0x389   :  { %v3110_v1 = vpop.permute.xlu0 %3109 }
 0x38a   :  { %v3276_v35 = vrot.slane %v3110_v1, 4 }
 0x391   :  { %v3116_v49 = vpop.permute.xlu0 %3115 }
 0x392   :  { %v3262_v59 = vrot.slane %v3116_v49, 4  ;;  %v3265_v39 = vsel %vm3150_vm2, %v3116_v49, %v3264_v33 }
 0x393   :  { %v3273_v12 = vperm.slane %v3265_v39, %v4996_v6 }
 0x394   :  { %v3263_v44 = vsel %vm3150_vm2, %v3262_v59, %v4987_v41  ;;  %v3181_v41 = vperm.slane %v3175_v63, %v4996_v6 }
 0x395   :  { %v3269_v4 = vperm.slane %v3263_v44, %v4996_v6  ;;  %v3324_v52 = vrot.slane %v3273_v12, 4 }
 0x396   :  { %v3224_v34 = vrot.slane %v3181_v41, 4 }
 0x397   :  { %v3312_v26 = vrot.slane %v3269_v4, 4 }
 0x399   :  { %v3122_v43 = vpop.permute.xlu0 %3121 }
 0x39a   :  { %v3274_v53 = vrot.slane %v3122_v43, 4  ;;  %v3277_v14 = vsel %vm3150_vm2, %v3122_v43, %v3276_v35 }
 0x39b   :  { %v3285_v10 = vperm.slane %v3277_v14, %v4996_v6 }
 0x39c   :  { %v3275_v48 = vsel %vm3150_vm2, %v3274_v53, %v3110_v1 }
 0x39d   :  { %v3281_v30 = vperm.slane %v3275_v48, %v4996_v6  ;;  %v3325_v37 = vsel %vm3150_vm2, %v3285_v10, %v3324_v52  ;;  %v3322_v47 = vrot.slane %v3285_v10, 4 }
 0x39e   :  { %v5049_v23 = vperm.slane %v3325_v37, %v5011_v38 }
 0x39f   :  { %v3310_v51 = vrot.slane %v3281_v30, 4  ;;  %v3313_v15 = vsel %vm3150_vm2, %v3281_v30, %v3312_v26  ;;  %v3323_v56 = vsel %vm3150_vm2, %v3322_v47, %v3273_v12 }
 0x3a0   :  { %v5056_v42 = vperm.slane %v3313_v15, %v5011_v38  ;;  %v3329_v14 = vperm.slane %v3323_v56, %v5011_v38 }
 0x3a1   :  { %v3128_v5 = vpop.permute.xlu0 %3127  ;;  %v3311_v19 = vsel %vm3150_vm2, %v3310_v51, %v3269_v4 }
 0x3a2   :  { %v3288_v32 = vrot.slane %v3128_v5, 4  ;;  %v3287_v11 = vsel %vm3150_vm2, %v3286_v16, %v3128_v5  ;;  %v3317_v48 = vperm.slane %v3311_v19, %v5011_v38  ;;  %v3368_v37 = vrot.slane %v3329_v14, 4 }
 0x3a3   :  { %v3293_v49 = vperm.slane %v3287_v11, %v4996_v6 }
 0x3a4   :  { %v3289_v28 = vsel %vm3150_vm2, %v3140_v62, %v3288_v32  ;;  %v3360_v47 = vrot.slane %v3317_v48, 4 }
 0x3a5   :  { %v3297_v18 = vperm.slane %v3289_v28, %v4996_v6 }
 0x3a7   :  { %v3348_v16 = vrot.slane %v3297_v18, 4 }
 0x3a9   :  { %v5014_v13 = vpop.permute.xlu0 %3133 }
 0x3aa   :  { %v3300_v33 = vrot.slane %v5014_v13, 4 }
 0x3b1   :  { %v3144_v0 = vpop.permute.xlu0 %3143 }
 0x3b2   :  { %v3186_v57 = vrot.slane %v3144_v0, 4  ;;  %v3189_v46 = vsel %vm3150_vm2, %v3144_v0, %v3188_v61 }
 0x3b3   :  { %v3197_v2 = vperm.slane %v3189_v46, %v4996_v6 }
 0x3b4   :  { %v3187_v40 = vsel %vm3150_vm2, %v3186_v57, %v3132_v54 }
 0x3b5   :  { %v3193_v7 = vperm.slane %v3187_v40, %v4996_v6  ;;  %v3234_v45 = vrot.slane %v3197_v2, 4  ;;  %v3237_v9 = vsel %vm3150_vm2, %v3197_v2, %v3236_v50 }
 0x3b6   :  { %v3245_v21 = vperm.slane %v3237_v9, %v5011_v38 }
 0x3b7   :  { %v3222_v27 = vrot.slane %v3193_v7, 4  ;;  %v3225_v54 = vsel %vm3150_vm2, %v3193_v7, %v3224_v34  ;;  %v3235_v1 = vsel %vm3150_vm2, %v3234_v45, %v3185_v55 }
 0x3b8   :  { %v3233_v43 = vperm.slane %v3225_v54, %v5011_v38  ;;  %v3241_v5 = vperm.slane %v3235_v1, %v5011_v38  ;;  %v3261_v29 = vsel %vm3150_vm2, %v3245_v21, %v3260_v25  ;;  %v3258_v35 = vrot.slane %v3245_v21, 4 }
 0x3b9   :  { %v3223_v59 = vsel %vm3150_vm2, %v3222_v27, %v3181_v41  ;;  %3381 = vst.msk [vmem:[#allocation3 + $0x38] sm:$0xff] %vm2812_vm10, %v3261_v29  ;;  %v3146_v39 = vpop.permute.xlu0 %3145  ;;  %v3336_v25 = vrot.slane %v3293_v49, 4 }
 0x3ba   :  { %v3229_v53 = vperm.slane %v3223_v59, %v5011_v38  ;;  %v3250_v3 = vrot.slane %v3233_v43, 4  ;;  %v3253_v20 = vsel %vm3150_vm2, %v3233_v43, %v3252_v36  ;;  %v3254_v44 = vrot.slane %v3241_v5, 4 }
 0x3bb   :  { %v3257_v12 = vsel %vm3150_vm2, %v3241_v5, %v3256_v22  ;;  %3377 = vst.msk [vmem:[#allocation3 + $0x18] sm:$0xff] %vm2812_vm10, %v3253_v20  ;;  %v3298_v62 = vrot.slane %v3146_v39, 4  ;;  %v3301_v31 = vsel %vm3150_vm2, %v3146_v39, %v3300_v33 }
 0x3bc   :  { %v3246_v63 = vrot.slane %v3229_v53, 4  ;;  %v3249_v4 = vsel %vm3150_vm2, %v3229_v53, %v3248_v17  ;;  %v3251_v10 = vsel %vm3150_vm2, %v3250_v3, %v5021_v8  ;;  %3379 = vst.msk [vmem:[#allocation3 + $0x28] sm:$0xff] %vm2812_vm10, %v3257_v12  ;;  %v3255_v55 = vsel %vm3150_vm2, %v3254_v44, %v5029_v58 }
 0x3bd   :  { %3375 = vst.msk [vmem:[#allocation3 + $0x8] sm:$0xff] %vm2812_vm10, %v3249_v4  ;;  %v3299_v52 = vsel %vm3150_vm2, %v3298_v62, %v5014_v13  ;;  %v3309_v30 = vperm.slane %v3301_v31, %v4996_v6  ;;  %v3259_v8 = vsel %vm3150_vm2, %v3258_v35, %v5024_v24  ;;  %v3372_v13 = vrot.slane %v5049_v23, 4 }
 0x3be   :  { %v3247_v61 = vsel %vm3150_vm2, %v3246_v63, %v5037_v60  ;;  %3376 = vst.msk [vmem:[#allocation3 + $0x10] sm:$0xff] %vm2812_vm10, %v3251_v10  ;;  %v3305_v41 = vperm.slane %v3299_v52, %v4996_v6  ;;  %v3364_v24 = vrot.slane %v5056_v42, 4 }
 0x3bf   :  { %3374 = vst.msk [vmem:[#allocation3] sm:$0xff] %vm2812_vm10, %v3247_v61  ;;  %v3346_v58 = vrot.slane %v3309_v30, 4  ;;  %v3349_v36 = vsel %vm3150_vm2, %v3309_v30, %v3348_v16 }
 0x3c0   :  { %3378 = vst.msk [vmem:[#allocation3 + $0x20] sm:$0xff] %vm2812_vm10, %v3255_v55  ;;  %v3334_v22 = vrot.slane %v3305_v41, 4  ;;  %v3337_v26 = vsel %vm3150_vm2, %v3305_v41, %v3336_v25  ;;  %v3357_v60 = vperm.slane %v3349_v36, %v5011_v38 }
 0x3c1   :  { %3380 = vst.msk [vmem:[#allocation3 + $0x30] sm:$0xff] %vm2812_vm10, %v3259_v8  ;;  %v3345_v6 = vperm.slane %v3337_v26, %v5011_v38  ;;  %v3347_v0 = vsel %vm3150_vm2, %v3346_v58, %v3297_v18 }
 0x3c2   :  { %v3335_v32 = vsel %vm3150_vm2, %v3334_v22, %v3293_v49  ;;  %v3353_v57 = vperm.slane %v3347_v0, %v5011_v38  ;;  %v3373_v46 = vsel %vm3150_vm2, %v3357_v60, %v3372_v13  ;;  %v3370_v2 = vrot.slane %v3357_v60, 4 }
 0x3c3   :  { %v3341_v50 = vperm.slane %v3335_v32, %v5011_v38  ;;  %v3362_v51 = vrot.slane %v3345_v6, 4  ;;  %v3365_v15 = vsel %vm3150_vm2, %v3345_v6, %v3364_v24  ;;  %3389 = vst.msk [vmem:[#allocation3 + $0x78] sm:$0xff] %vm2812_vm10, %v3373_v46 }
 0x3c4   :  { %v3366_v17 = vrot.slane %v3353_v57, 4  ;;  %v3369_v34 = vsel %vm3150_vm2, %v3353_v57, %v3368_v37  ;;  %3385 = vst.msk [vmem:[#allocation3 + $0x58] sm:$0xff] %vm2812_vm10, %v3365_v15  ;;  %v3371_v9 = vsel %vm3150_vm2, %v3370_v2, %v5049_v23 }
 0x3c5   :  { %v3358_v40 = vrot.slane %v3341_v50, 4  ;;  %v3361_v11 = vsel %vm3150_vm2, %v3341_v50, %v3360_v47  ;;  %v3363_v38 = vsel %vm3150_vm2, %v3362_v51, %v5056_v42  ;;  %3387 = vst.msk [vmem:[#allocation3 + $0x68] sm:$0xff] %vm2812_vm10, %v3369_v34 }
 0x3c6   :  { %v3367_v7 = vsel %vm3150_vm2, %v3366_v17, %v3329_v14  ;;  %3383 = vst.msk [vmem:[#allocation3 + $0x48] sm:$0xff] %vm2812_vm10, %v3361_v11 }
 0x3c7   :  { %v3359_v45 = vsel %vm3150_vm2, %v3358_v40, %v3317_v48  ;;  %3384 = vst.msk [vmem:[#allocation3 + $0x50] sm:$0xff] %vm2812_vm10, %v3363_v38 }
 0x3c8   :  { %3382 = vst.msk [vmem:[#allocation3 + $0x40] sm:$0xff] %vm2812_vm10, %v3359_v45 }
 0x3c9   :  { %3386 = vst.msk [vmem:[#allocation3 + $0x60] sm:$0xff] %vm2812_vm10, %v3367_v7 }
 0x3ca   :  { %3388 = vst.msk [vmem:[#allocation3 + $0x70] sm:$0xff] %vm2812_vm10, %v3371_v9 }
 0x3cb   :  { %3402 = dma.vmem_to_hbm [thread:$0]  %s3395_s21, 2048, %s3397_s19, [#allocation4], %s3549_s3, %s3549_s3, %s3533_s4  }
 0x3cc   :  { %3528 = dma.done.wait [#allocation4], 2048  }
 0x3cd   :  { %3529 = vsyncadd [#allocation4], 4294965248 }
 0x3ce   :  { %3407 = vsyncpa [#allocation4], 1 }

</bundles_post_ra>
